<compile_context>
chip_gen: v7x
topology: tpu7x:2x2x1
jax: 0.10.0
libtpu: 0.0.40
codegen_flags: <defaults>
</compile_context>

<pallas_src>
import numpy as np
import jax
import jax.numpy as jnp
from jax.experimental import pallas as pl
from jax.experimental.pallas import tpu as pltpu


# ------------------------------ Pallas kernel --------------------------------

def _actor_fused_kernel(g1_ref, s2_ref, w1_ref, b1_ref, w2_ref, b2_ref,
                        w3_ref, b3_ref, wf_ref, bf_ref, wa1_ref, ba1_ref,
                        wa2_ref, ba2_ref, mask_ref, o_ref, g2_ref, g3_ref):
    f32, bf16 = jnp.float32, jnp.bfloat16
    BT = o_ref.shape[0]           # batch tile (8)
    M2 = 9 * BT                   # conv2 output rows per tile (pos-major)

    # ---- conv1: wrapper-side im2col -> one deep-K matmul -------------------
    h1 = jnp.dot(g1_ref[...], w1_ref[...], preferred_element_type=f32)
    h1 = jnp.maximum(h1 + b1_ref[...], 0.0)                  # (BT*64, 128) f32
    h1b = h1.astype(bf16)

    # ---- conv2: 4 stacked gather matmuls -> im2col scratch -> 1 deep matmul
    for kh in range(4):                                       # static unroll
        rows = jnp.dot(s2_ref[kh], h1b, preferred_element_type=f32)  # (4*M2,128)
        for kw in range(4):
            t = kh * 4 + kw
            g2_ref[:, t * 128:(t + 1) * 128] = (
                rows[kw * M2:(kw + 1) * M2, :].astype(bf16))
    h2 = jnp.dot(g2_ref[...], w2_ref[...], preferred_element_type=f32)
    h2 = jnp.maximum(h2 + b2_ref[...], 0.0)                   # (9*BT, 128), row = pos*BT + b

    # ---- conv3: gather = 9 aligned slices -> 1 deep-K matmul ---------------
    for t in range(9):
        g3_ref[:, t * 128:(t + 1) * 128] = h2[t * BT:(t + 1) * BT, :].astype(bf16)
    h3 = jnp.dot(g3_ref[...], w3_ref[...], preferred_element_type=f32)
    h3 = jnp.maximum(h3 + b3_ref[...], 0.0)                    # (BT, 128) f32

    # ---- MLP head: bf16 operands, f32 elementwise --------------------------
    f = jnp.tanh(jnp.dot(h3.astype(bf16), wf_ref[...],
                         preferred_element_type=f32) + bf_ref[...])
    g = jnp.tanh(jnp.dot(f.astype(bf16), wa1_ref[...],
                         preferred_element_type=f32) + ba1_ref[...])
    logits = jnp.dot(g.astype(bf16), wa2_ref[...],
                     preferred_element_type=f32) + ba2_ref[...]

    # mask padded lanes (>= nA) with -1e30, then stable log_softmax (f32)
    logits = logits + mask_ref[...]
    m = jnp.max(logits, axis=-1, keepdims=True)
    lse = m + jnp.log(jnp.sum(jnp.exp(logits - m), axis=-1, keepdims=True))
    o_ref[...] = logits - lse                                  # (BT, 128) lane-dense


# ------------------------------ forward wrapper -------------------------------

def actor_forward(packed, state_nchw, n_act):
    BT = packed["s2"].shape[2] // 64          # batch tile size baked into S2
    B, C, H, W = state_nchw.shape
    assert H == 36 and W == 36, "Linear(64,20) requires 36x36 input (conv stack -> 1x1x64)"
    k1p = packed["w1s"].shape[0]
    assert 64 * C <= k1p, "packed params built for a different channel count"

    # pad batch to a multiple of the tile; padded rows are sliced off at the end
    pad_b = (-B) % BT
    x = state_nchw.astype(jnp.float32)
    if pad_b:
        x = jnp.pad(x, ((0, pad_b), (0, 0), (0, 0), (0, 0)))
    Bp = B + pad_b

    # conv1 im2col (kernel 8, stride 4): rows = (b, oh, ow), cols = (kh, kw, c)
    xt = jnp.transpose(x, (0, 2, 3, 1))                       # (Bp,36,36,C)
    y = xt.reshape(Bp, 9, 4, 9, 4, C)                         # h = 4i+r, w = 4j+s
    blocks = [[y[:, q:q + 8, :, p:p + 8, :, :] for p in range(2)] for q in range(2)]
    patches = jnp.stack([jnp.stack(row, axis=0) for row in blocks], axis=0)
    # (q,p,b,oh,r,ow,s,c) -> (b,oh,ow,q,r,p,s,c);  kh = 4q+r, kw = 4p+s
    patches = jnp.transpose(patches, (2, 3, 5, 0, 4, 1, 6, 7))
    g1 = patches.reshape(Bp * 64, 64 * C)
    if 64 * C < k1p:
        g1 = jnp.pad(g1, ((0, 0), (0, k1p - 64 * C)))
    g1 = g1.astype(jnp.bfloat16)                               # (Bp*64, k1p)

    consts = (packed["s2"], packed["w1s"], packed["b1"], packed["w2s"], packed["b2"],
              packed["w3s"], packed["b3"], packed["wf"], packed["bf"],
              packed["wa1"], packed["ba1"], packed["wa2"], packed["ba2"], packed["mask"])

    def const_spec(a):
        nd = a.ndim
        return pl.BlockSpec(a.shape, lambda i, _nd=nd: (0,) * _nd)

    num_tiles = Bp // BT
    out_pad = pl.pallas_call(
        _actor_fused_kernel,
        grid=(num_tiles,),
        in_specs=[pl.BlockSpec((BT * 64, k1p), lambda i: (i, 0))]
                 + [const_spec(a) for a in consts],
        out_specs=pl.BlockSpec((BT, 128), lambda i: (i, 0)),
        out_shape=jax.ShapeDtypeStruct((Bp, 128), jnp.float32),
        scratch_shapes=[pltpu.VMEM((9 * BT, 16 * 128), jnp.bfloat16),   # conv2 im2col
                        pltpu.VMEM((BT, 9 * 128), jnp.bfloat16)],       # conv3 im2col
        compiler_params=pltpu.CompilerParams(dimension_semantics=("parallel",)),
    )(g1, *consts)
    return out_pad[:B, :n_act]


# --------------------------- one-time parameter packing -----------------------

def pack_params(params, nA, C, BT=8):
    """Pre-transpose / tap-stack / zero-pad all weights (bf16), build the fixed
    per-tile 0/1 conv2 gather matrices.  Nothing here depends on total batch."""
    assert BT % 8 == 0, "batch tile must be a multiple of 8 sublanes"
    f32 = np.float32

    def pad2(a, rows=128, cols=128):
        return np.pad(a, ((0, rows - a.shape[0]), (0, cols - a.shape[1])))

    def pad_row(b):
        b = np.asarray(b, f32).reshape(1, -1)
        return np.pad(b, ((0, 0), (0, 128 - b.shape[1])))

    c1 = np.asarray(params["c1_w"], f32)      # (32, C, 8, 8)
    c2 = np.asarray(params["c2_w"], f32)      # (64, 32, 4, 4)
    c3 = np.asarray(params["c3_w"], f32)      # (64, 64, 3, 3)

    # conv1: im2col weight, rows ordered (kh, kw, cin), K padded to 128 multiple
    k1 = 8 * 8 * C
    k1p = ((k1 + 127) // 128) * 128
    w1s = np.zeros((k1p, 128), f32)
    w1s[:k1, :32] = np.transpose(c1, (2, 3, 1, 0)).reshape(k1, 32)

    # conv2: per-tile gather (rows stacked kw-major per kh; output pos-major)
    M2 = 9 * BT
    s2 = np.zeros((4, 4 * M2, BT * 64), f32)
    for kh in range(4):
        for kw in range(4):
            for b in range(BT):
                for oh in range(3):
                    for ow in range(3):
                        s2[kh, kw * M2 + (oh * 3 + ow) * BT + b,
                           b * 64 + (2 * oh + kh) * 8 + (2 * ow + kw)] = 1.0
    w2s = np.zeros((16 * 128, 128), f32)      # tap-stacked conv2 weights
    for kh in range(4):
        for kw in range(4):
            t = kh * 4 + kw
            w2s[t * 128:t * 128 + 32, :64] = c2[:, :, kh, kw].T

    # conv3: gather is slice-based in-kernel; only tap-stacked weights needed
    w3s = np.zeros((9 * 128, 128), f32)
    for kh in range(3):
        for kw in range(3):
            t = kh * 3 + kw
            w3s[t * 128:t * 128 + 64, :64] = c3[:, :, kh, kw].T

    mask = np.zeros((1, 128), f32)
    mask[0, nA:] = -1e30

    bf16 = jnp.bfloat16
    return {
        "s2": jnp.asarray(s2, bf16),
        "w1s": jnp.asarray(w1s, bf16), "b1": jnp.asarray(pad_row(params["c1_b"])),
        "w2s": jnp.asarray(w2s, bf16), "b2": jnp.asarray(pad_row(params["c2_b"])),
        "w3s": jnp.asarray(w3s, bf16), "b3": jnp.asarray(pad_row(params["c3_b"])),
        "wf": jnp.asarray(pad2(np.asarray(params["fc_w"], f32).T), bf16),
        "bf": jnp.asarray(pad_row(params["fc_b"])),
        "wa1": jnp.asarray(pad2(np.asarray(params["a1_w"], f32).T), bf16),
        "ba1": jnp.asarray(pad_row(params["a1_b"])),
        "wa2": jnp.asarray(pad2(np.asarray(params["a2_w"], f32).T), bf16),
        "ba2": jnp.asarray(pad_row(params["a2_b"])),
        "mask": jnp.asarray(mask),
    }


# --------------------------- parameter init (matches torch) -------------------

def _orthogonal(key, shape, gain):
    rows = shape[0]
    cols = int(np.prod(shape[1:]))
    a = jax.random.normal(key, (rows, cols), dtype=jnp.float32)
    if rows < cols:
        a = a.T
    q, r = jnp.linalg.qr(a)
    q = q * jnp.sign(jnp.diagonal(r))
    if rows < cols:
        q = q.T
    return (gain * q).reshape(shape).astype(jnp.float32)


def _uniform_bias(key, n, fan_in):
    bound = 1.0 / np.sqrt(fan_in)
    return jax.random.uniform(key, (n,), jnp.float32, -bound, bound)


def init_params(key, nS, nA):
    C = nS[0]
    ks = jax.random.split(key, 12)
    g2, ga = float(np.sqrt(2.0)), 0.01
    return {
        "c1_w": _orthogonal(ks[0], (32, C, 8, 8), g2),
        "c1_b": _uniform_bias(ks[1], 32, C * 8 * 8),
        "c2_w": _orthogonal(ks[2], (64, 32, 4, 4), g2),
        "c2_b": _uniform_bias(ks[3], 64, 32 * 4 * 4),
        "c3_w": _orthogonal(ks[4], (64, 64, 3, 3), g2),
        "c3_b": _uniform_bias(ks[5], 64, 64 * 3 * 3),
        "fc_w": _orthogonal(ks[6], (20, 64), g2),
        "fc_b": _uniform_bias(ks[7], 20, 64),
        "a1_w": _orthogonal(ks[8], (20, 20), ga),
        "a1_b": _uniform_bias(ks[9], 20, 20),
        "a2_w": _orthogonal(ks[10], (nA, 20), ga),
        "a2_b": _uniform_bias(ks[11], nA, 20),
    }


# --------------------------- pure-JAX reference -------------------------------

def reference_forward(params, state_nchw):
    x = state_nchw.astype(jnp.float32)

    def conv(x, w, b, s):
        y = jax.lax.conv_general_dilated(
            x, w, (s, s), "VALID",
            dimension_numbers=("NCHW", "OIHW", "NCHW"))
        return jax.nn.relu(y + b.reshape(1, -1, 1, 1))

    x = conv(x, params["c1_w"], params["c1_b"], 4)
    x = conv(x, params["c2_w"], params["c2_b"], 2)
    x = conv(x, params["c3_w"], params["c3_b"], 1)
    x = x.reshape(x.shape[0], -1)
    x = jnp.tanh(x @ params["fc_w"].T + params["fc_b"])
    x = jnp.tanh(x @ params["a1_w"].T + params["a1_b"])
    x = x @ params["a2_w"].T + params["a2_b"]
    return jax.nn.log_softmax(x, axis=1)


# ------------------------------------ main ------------------------------------

if __name__ == "__main__":
    # 36x36 spatial is required by the architecture: Linear(64, 20) implies the
    # conv stack must flatten to exactly 64 features (1x1x64).
    nS = (4, 36, 36)   # (C, H, W)
    nA = 6
    B = 16             # two batch tiles of 8 -> exercises the batch grid

    key = jax.random.PRNGKey(0)
    pkey, xkey = jax.random.split(key)
    params = init_params(pkey, nS, nA)
    packed = pack_params(params, nA=nA, C=nS[0], BT=8)             # one-time packing
    state = jax.random.normal(xkey, (B,) + nS, dtype=jnp.float32)  # NCHW input

    fwd = jax.jit(actor_forward, static_argnames=("n_act",))
    out = jax.block_until_ready(fwd(packed, state, n_act=nA))

    ref = reference_forward(params, state)
    np.testing.assert_allclose(np.asarray(out), np.asarray(ref),
                               rtol=2e-2, atol=2e-2)
    assert out.shape == (B, nA)
    np.testing.assert_allclose(np.exp(np.asarray(out)).sum(axis=1),
                               np.ones(B), rtol=1e-4, atol=1e-4)
    print("KERNEL_OK")
</pallas_src>

<mosaic_0001>
module attributes {stable_mosaic.version = 11 : i64} {
  func.func @_actor_fused_kernel(%arg0: i32, %arg1: memref<512x256xbf16, #tpu.memory_space<vmem>>, %arg2: memref<4x288x512xbf16, #tpu.memory_space<vmem>>, %arg3: memref<256x128xbf16, #tpu.memory_space<vmem>>, %arg4: memref<1x128xf32, #tpu.memory_space<vmem>>, %arg5: memref<2048x128xbf16, #tpu.memory_space<vmem>>, %arg6: memref<1x128xf32, #tpu.memory_space<vmem>>, %arg7: memref<1152x128xbf16, #tpu.memory_space<vmem>>, %arg8: memref<1x128xf32, #tpu.memory_space<vmem>>, %arg9: memref<128x128xbf16, #tpu.memory_space<vmem>>, %arg10: memref<1x128xf32, #tpu.memory_space<vmem>>, %arg11: memref<128x128xbf16, #tpu.memory_space<vmem>>, %arg12: memref<1x128xf32, #tpu.memory_space<vmem>>, %arg13: memref<128x128xbf16, #tpu.memory_space<vmem>>, %arg14: memref<1x128xf32, #tpu.memory_space<vmem>>, %arg15: memref<1x128xf32, #tpu.memory_space<vmem>>, %arg16: memref<8x128xf32, #tpu.memory_space<vmem>>, %arg17: memref<72x2048xbf16, #tpu.memory_space<vmem>>, %arg18: memref<8x1152xbf16, #tpu.memory_space<vmem>>) attributes {dimension_semantics = [#tpu.dimension_semantics<parallel>], iteration_bounds = array<i64: 2>, scalar_prefetch = 0 : i64, scratch_operands = 2 : i64, tpu.core_type = #tpu.core_type<tc>, window_params = [{transform_indices = @transform_0, window_bounds = array<i64: 512, 256>}, {pipeline_mode = #tpu.pipeline_mode<synchronous>, transform_indices = @transform_1, window_bounds = array<i64: 4, 288, 512>}, {pipeline_mode = #tpu.pipeline_mode<synchronous>, transform_indices = @transform_2, window_bounds = array<i64: 256, 128>}, {pipeline_mode = #tpu.pipeline_mode<synchronous>, transform_indices = @transform_3, window_bounds = array<i64: 1, 128>}, {pipeline_mode = #tpu.pipeline_mode<synchronous>, transform_indices = @transform_4, window_bounds = array<i64: 2048, 128>}, {pipeline_mode = #tpu.pipeline_mode<synchronous>, transform_indices = @transform_5, window_bounds = array<i64: 1, 128>}, {pipeline_mode = #tpu.pipeline_mode<synchronous>, transform_indices = @transform_6, window_bounds = array<i64: 1152, 128>}, {pipeline_mode = #tpu.pipeline_mode<synchronous>, transform_indices = @transform_7, window_bounds = array<i64: 1, 128>}, {pipeline_mode = #tpu.pipeline_mode<synchronous>, transform_indices = @transform_8, window_bounds = array<i64: 128, 128>}, {pipeline_mode = #tpu.pipeline_mode<synchronous>, transform_indices = @transform_9, window_bounds = array<i64: 1, 128>}, {pipeline_mode = #tpu.pipeline_mode<synchronous>, transform_indices = @transform_10, window_bounds = array<i64: 128, 128>}, {pipeline_mode = #tpu.pipeline_mode<synchronous>, transform_indices = @transform_11, window_bounds = array<i64: 1, 128>}, {pipeline_mode = #tpu.pipeline_mode<synchronous>, transform_indices = @transform_12, window_bounds = array<i64: 128, 128>}, {pipeline_mode = #tpu.pipeline_mode<synchronous>, transform_indices = @transform_13, window_bounds = array<i64: 1, 128>}, {pipeline_mode = #tpu.pipeline_mode<synchronous>, transform_indices = @transform_14, window_bounds = array<i64: 1, 128>}, {transform_indices = @transform_15, window_bounds = array<i64: 8, 128>}]} {
    %c0 = arith.constant 0 : index
    %c0_0 = arith.constant 0 : index
    %0 = vector.load %arg1[%c0, %c0_0] : memref<512x256xbf16, #tpu.memory_space<vmem>>, vector<512x256xbf16>
    %c0_1 = arith.constant 0 : index
    %c0_2 = arith.constant 0 : index
    %1 = vector.load %arg3[%c0_1, %c0_2] : memref<256x128xbf16, #tpu.memory_space<vmem>>, vector<256x128xbf16>
    %cst = arith.constant dense<0.000000e+00> : vector<512x128xf32>
    %2 = tpu.matmul %0, %1, %cst {dimension_numbers = #tpu.dot_dimension_numbers<[1], [0], [0], [1], [0, 0, 1, 1], [], []>} : vector<512x256xbf16>, vector<256x128xbf16>, vector<512x128xf32> -> vector<512x128xf32>
    %c0_3 = arith.constant 0 : index
    %c0_4 = arith.constant 0 : index
    %3 = vector.load %arg4[%c0_3, %c0_4] : memref<1x128xf32, #tpu.memory_space<vmem>>, vector<1x128xf32>
    %4 = vector.broadcast %3 : vector<1x128xf32> to vector<512x128xf32>
    %5 = arith.addf %2, %4 : vector<512x128xf32>
    %cst_5 = arith.constant 0.000000e+00 : f32
    %6 = vector.broadcast %cst_5 : f32 to vector<512x128xf32>
    %7 = arith.maximumf %5, %6 : vector<512x128xf32>
    %8 = arith.truncf %7 : vector<512x128xf32> to vector<512x128xbf16>
    %c0_6 = arith.constant 0 : index
    %c0_7 = arith.constant 0 : index
    %c0_8 = arith.constant 0 : index
    %9 = vector.load %arg2[%c0_6, %c0_7, %c0_8] : memref<4x288x512xbf16, #tpu.memory_space<vmem>>, vector<1x288x512xbf16>
    %10 = vector.shape_cast %9 : vector<1x288x512xbf16> to vector<288x512xbf16>
    %cst_9 = arith.constant dense<0.000000e+00> : vector<288x128xf32>
    %11 = tpu.matmul %10, %8, %cst_9 {dimension_numbers = #tpu.dot_dimension_numbers<[1], [0], [0], [1], [0, 0, 1, 1], [], []>} : vector<288x512xbf16>, vector<512x128xbf16>, vector<288x128xf32> -> vector<288x128xf32>
    %12 = vector.extract_strided_slice %11 {offsets = [0, 0], sizes = [72, 128], strides = [1, 1]} : vector<288x128xf32> to vector<72x128xf32>
    %13 = arith.truncf %12 : vector<72x128xf32> to vector<72x128xbf16>
    %c0_10 = arith.constant 0 : index
    %c0_11 = arith.constant 0 : index
    %14 = vector.load %arg17[%c0_10, %c0_11] : memref<72x2048xbf16, #tpu.memory_space<vmem>>, vector<72x128xbf16>
    tpu.vector_store %arg17[%c0_10, %c0_11], %13 {strides = array<i32>} : memref<72x2048xbf16, #tpu.memory_space<vmem>>, vector<72x128xbf16>,
    %15 = vector.extract_strided_slice %11 {offsets = [72, 0], sizes = [72, 128], strides = [1, 1]} : vector<288x128xf32> to vector<72x128xf32>
    %16 = arith.truncf %15 : vector<72x128xf32> to vector<72x128xbf16>
    %c0_12 = arith.constant 0 : index
    %c128 = arith.constant 128 : index
    %17 = vector.load %arg17[%c0_12, %c128] : memref<72x2048xbf16, #tpu.memory_space<vmem>>, vector<72x128xbf16>
    tpu.vector_store %arg17[%c0_12, %c128], %16 {strides = array<i32>} : memref<72x2048xbf16, #tpu.memory_space<vmem>>, vector<72x128xbf16>,
    %18 = vector.extract_strided_slice %11 {offsets = [144, 0], sizes = [72, 128], strides = [1, 1]} : vector<288x128xf32> to vector<72x128xf32>
    %19 = arith.truncf %18 : vector<72x128xf32> to vector<72x128xbf16>
    %c0_13 = arith.constant 0 : index
    %c256 = arith.constant 256 : index
    %20 = vector.load %arg17[%c0_13, %c256] : memref<72x2048xbf16, #tpu.memory_space<vmem>>, vector<72x128xbf16>
    tpu.vector_store %arg17[%c0_13, %c256], %19 {strides = array<i32>} : memref<72x2048xbf16, #tpu.memory_space<vmem>>, vector<72x128xbf16>,
    %21 = vector.extract_strided_slice %11 {offsets = [216, 0], sizes = [72, 128], strides = [1, 1]} : vector<288x128xf32> to vector<72x128xf32>
    %22 = arith.truncf %21 : vector<72x128xf32> to vector<72x128xbf16>
    %c0_14 = arith.constant 0 : index
    %c384 = arith.constant 384 : index
    %23 = vector.load %arg17[%c0_14, %c384] : memref<72x2048xbf16, #tpu.memory_space<vmem>>, vector<72x128xbf16>
    tpu.vector_store %arg17[%c0_14, %c384], %22 {strides = array<i32>} : memref<72x2048xbf16, #tpu.memory_space<vmem>>, vector<72x128xbf16>,
    %c1 = arith.constant 1 : index
    %c0_15 = arith.constant 0 : index
    %c0_16 = arith.constant 0 : index
    %24 = vector.load %arg2[%c1, %c0_15, %c0_16] : memref<4x288x512xbf16, #tpu.memory_space<vmem>>, vector<1x288x512xbf16>
    %25 = vector.shape_cast %24 : vector<1x288x512xbf16> to vector<288x512xbf16>
    %cst_17 = arith.constant dense<0.000000e+00> : vector<288x128xf32>
    %26 = tpu.matmul %25, %8, %cst_17 {dimension_numbers = #tpu.dot_dimension_numbers<[1], [0], [0], [1], [0, 0, 1, 1], [], []>} : vector<288x512xbf16>, vector<512x128xbf16>, vector<288x128xf32> -> vector<288x128xf32>
    %27 = vector.extract_strided_slice %26 {offsets = [0, 0], sizes = [72, 128], strides = [1, 1]} : vector<288x128xf32> to vector<72x128xf32>
    %28 = arith.truncf %27 : vector<72x128xf32> to vector<72x128xbf16>
    %c0_18 = arith.constant 0 : index
    %c512 = arith.constant 512 : index
    %29 = vector.load %arg17[%c0_18, %c512] : memref<72x2048xbf16, #tpu.memory_space<vmem>>, vector<72x128xbf16>
    tpu.vector_store %arg17[%c0_18, %c512], %28 {strides = array<i32>} : memref<72x2048xbf16, #tpu.memory_space<vmem>>, vector<72x128xbf16>,
    %30 = vector.extract_strided_slice %26 {offsets = [72, 0], sizes = [72, 128], strides = [1, 1]} : vector<288x128xf32> to vector<72x128xf32>
    %31 = arith.truncf %30 : vector<72x128xf32> to vector<72x128xbf16>
    %c0_19 = arith.constant 0 : index
    %c640 = arith.constant 640 : index
    %32 = vector.load %arg17[%c0_19, %c640] : memref<72x2048xbf16, #tpu.memory_space<vmem>>, vector<72x128xbf16>
    tpu.vector_store %arg17[%c0_19, %c640], %31 {strides = array<i32>} : memref<72x2048xbf16, #tpu.memory_space<vmem>>, vector<72x128xbf16>,
    %33 = vector.extract_strided_slice %26 {offsets = [144, 0], sizes = [72, 128], strides = [1, 1]} : vector<288x128xf32> to vector<72x128xf32>
    %34 = arith.truncf %33 : vector<72x128xf32> to vector<72x128xbf16>
    %c0_20 = arith.constant 0 : index
    %c768 = arith.constant 768 : index
    %35 = vector.load %arg17[%c0_20, %c768] : memref<72x2048xbf16, #tpu.memory_space<vmem>>, vector<72x128xbf16>
    tpu.vector_store %arg17[%c0_20, %c768], %34 {strides = array<i32>} : memref<72x2048xbf16, #tpu.memory_space<vmem>>, vector<72x128xbf16>,
    %36 = vector.extract_strided_slice %26 {offsets = [216, 0], sizes = [72, 128], strides = [1, 1]} : vector<288x128xf32> to vector<72x128xf32>
    %37 = arith.truncf %36 : vector<72x128xf32> to vector<72x128xbf16>
    %c0_21 = arith.constant 0 : index
    %c896 = arith.constant 896 : index
    %38 = vector.load %arg17[%c0_21, %c896] : memref<72x2048xbf16, #tpu.memory_space<vmem>>, vector<72x128xbf16>
    tpu.vector_store %arg17[%c0_21, %c896], %37 {strides = array<i32>} : memref<72x2048xbf16, #tpu.memory_space<vmem>>, vector<72x128xbf16>,
    %c2 = arith.constant 2 : index
    %c0_22 = arith.constant 0 : index
    %c0_23 = arith.constant 0 : index
    %39 = vector.load %arg2[%c2, %c0_22, %c0_23] : memref<4x288x512xbf16, #tpu.memory_space<vmem>>, vector<1x288x512xbf16>
    %40 = vector.shape_cast %39 : vector<1x288x512xbf16> to vector<288x512xbf16>
    %cst_24 = arith.constant dense<0.000000e+00> : vector<288x128xf32>
    %41 = tpu.matmul %40, %8, %cst_24 {dimension_numbers = #tpu.dot_dimension_numbers<[1], [0], [0], [1], [0, 0, 1, 1], [], []>} : vector<288x512xbf16>, vector<512x128xbf16>, vector<288x128xf32> -> vector<288x128xf32>
    %42 = vector.extract_strided_slice %41 {offsets = [0, 0], sizes = [72, 128], strides = [1, 1]} : vector<288x128xf32> to vector<72x128xf32>
    %43 = arith.truncf %42 : vector<72x128xf32> to vector<72x128xbf16>
    %c0_25 = arith.constant 0 : index
    %c1024 = arith.constant 1024 : index
    %44 = vector.load %arg17[%c0_25, %c1024] : memref<72x2048xbf16, #tpu.memory_space<vmem>>, vector<72x128xbf16>
    tpu.vector_store %arg17[%c0_25, %c1024], %43 {strides = array<i32>} : memref<72x2048xbf16, #tpu.memory_space<vmem>>, vector<72x128xbf16>,
    %45 = vector.extract_strided_slice %41 {offsets = [72, 0], sizes = [72, 128], strides = [1, 1]} : vector<288x128xf32> to vector<72x128xf32>
    %46 = arith.truncf %45 : vector<72x128xf32> to vector<72x128xbf16>
    %c0_26 = arith.constant 0 : index
    %c1152 = arith.constant 1152 : index
    %47 = vector.load %arg17[%c0_26, %c1152] : memref<72x2048xbf16, #tpu.memory_space<vmem>>, vector<72x128xbf16>
    tpu.vector_store %arg17[%c0_26, %c1152], %46 {strides = array<i32>} : memref<72x2048xbf16, #tpu.memory_space<vmem>>, vector<72x128xbf16>,
    %48 = vector.extract_strided_slice %41 {offsets = [144, 0], sizes = [72, 128], strides = [1, 1]} : vector<288x128xf32> to vector<72x128xf32>
    %49 = arith.truncf %48 : vector<72x128xf32> to vector<72x128xbf16>
    %c0_27 = arith.constant 0 : index
    %c1280 = arith.constant 1280 : index
    %50 = vector.load %arg17[%c0_27, %c1280] : memref<72x2048xbf16, #tpu.memory_space<vmem>>, vector<72x128xbf16>
    tpu.vector_store %arg17[%c0_27, %c1280], %49 {strides = array<i32>} : memref<72x2048xbf16, #tpu.memory_space<vmem>>, vector<72x128xbf16>,
    %51 = vector.extract_strided_slice %41 {offsets = [216, 0], sizes = [72, 128], strides = [1, 1]} : vector<288x128xf32> to vector<72x128xf32>
    %52 = arith.truncf %51 : vector<72x128xf32> to vector<72x128xbf16>
    %c0_28 = arith.constant 0 : index
    %c1408 = arith.constant 1408 : index
    %53 = vector.load %arg17[%c0_28, %c1408] : memref<72x2048xbf16, #tpu.memory_space<vmem>>, vector<72x128xbf16>
    tpu.vector_store %arg17[%c0_28, %c1408], %52 {strides = array<i32>} : memref<72x2048xbf16, #tpu.memory_space<vmem>>, vector<72x128xbf16>,
    %c3 = arith.constant 3 : index
    %c0_29 = arith.constant 0 : index
    %c0_30 = arith.constant 0 : index
    %54 = vector.load %arg2[%c3, %c0_29, %c0_30] : memref<4x288x512xbf16, #tpu.memory_space<vmem>>, vector<1x288x512xbf16>
    %55 = vector.shape_cast %54 : vector<1x288x512xbf16> to vector<288x512xbf16>
    %cst_31 = arith.constant dense<0.000000e+00> : vector<288x128xf32>
    %56 = tpu.matmul %55, %8, %cst_31 {dimension_numbers = #tpu.dot_dimension_numbers<[1], [0], [0], [1], [0, 0, 1, 1], [], []>} : vector<288x512xbf16>, vector<512x128xbf16>, vector<288x128xf32> -> vector<288x128xf32>
    %57 = vector.extract_strided_slice %56 {offsets = [0, 0], sizes = [72, 128], strides = [1, 1]} : vector<288x128xf32> to vector<72x128xf32>
    %58 = arith.truncf %57 : vector<72x128xf32> to vector<72x128xbf16>
    %c0_32 = arith.constant 0 : index
    %c1536 = arith.constant 1536 : index
    %59 = vector.load %arg17[%c0_32, %c1536] : memref<72x2048xbf16, #tpu.memory_space<vmem>>, vector<72x128xbf16>
    tpu.vector_store %arg17[%c0_32, %c1536], %58 {strides = array<i32>} : memref<72x2048xbf16, #tpu.memory_space<vmem>>, vector<72x128xbf16>,
    %60 = vector.extract_strided_slice %56 {offsets = [72, 0], sizes = [72, 128], strides = [1, 1]} : vector<288x128xf32> to vector<72x128xf32>
    %61 = arith.truncf %60 : vector<72x128xf32> to vector<72x128xbf16>
    %c0_33 = arith.constant 0 : index
    %c1664 = arith.constant 1664 : index
    %62 = vector.load %arg17[%c0_33, %c1664] : memref<72x2048xbf16, #tpu.memory_space<vmem>>, vector<72x128xbf16>
    tpu.vector_store %arg17[%c0_33, %c1664], %61 {strides = array<i32>} : memref<72x2048xbf16, #tpu.memory_space<vmem>>, vector<72x128xbf16>,
    %63 = vector.extract_strided_slice %56 {offsets = [144, 0], sizes = [72, 128], strides = [1, 1]} : vector<288x128xf32> to vector<72x128xf32>
    %64 = arith.truncf %63 : vector<72x128xf32> to vector<72x128xbf16>
    %c0_34 = arith.constant 0 : index
    %c1792 = arith.constant 1792 : index
    %65 = vector.load %arg17[%c0_34, %c1792] : memref<72x2048xbf16, #tpu.memory_space<vmem>>, vector<72x128xbf16>
    tpu.vector_store %arg17[%c0_34, %c1792], %64 {strides = array<i32>} : memref<72x2048xbf16, #tpu.memory_space<vmem>>, vector<72x128xbf16>,
    %66 = vector.extract_strided_slice %56 {offsets = [216, 0], sizes = [72, 128], strides = [1, 1]} : vector<288x128xf32> to vector<72x128xf32>
    %67 = arith.truncf %66 : vector<72x128xf32> to vector<72x128xbf16>
    %c0_35 = arith.constant 0 : index
    %c1920 = arith.constant 1920 : index
    %68 = vector.load %arg17[%c0_35, %c1920] : memref<72x2048xbf16, #tpu.memory_space<vmem>>, vector<72x128xbf16>
    tpu.vector_store %arg17[%c0_35, %c1920], %67 {strides = array<i32>} : memref<72x2048xbf16, #tpu.memory_space<vmem>>, vector<72x128xbf16>,
    %c0_36 = arith.constant 0 : index
    %c0_37 = arith.constant 0 : index
    %69 = vector.load %arg17[%c0_36, %c0_37] : memref<72x2048xbf16, #tpu.memory_space<vmem>>, vector<72x2048xbf16>
    %c0_38 = arith.constant 0 : index
    %c0_39 = arith.constant 0 : index
    %70 = vector.load %arg5[%c0_38, %c0_39] : memref<2048x128xbf16, #tpu.memory_space<vmem>>, vector<2048x128xbf16>
    %cst_40 = arith.constant dense<0.000000e+00> : vector<72x128xf32>
    %71 = tpu.matmul %69, %70, %cst_40 {dimension_numbers = #tpu.dot_dimension_numbers<[1], [0], [0], [1], [0, 0, 1, 1], [], []>} : vector<72x2048xbf16>, vector<2048x128xbf16>, vector<72x128xf32> -> vector<72x128xf32>
    %c0_41 = arith.constant 0 : index
    %c0_42 = arith.constant 0 : index
    %72 = vector.load %arg6[%c0_41, %c0_42] : memref<1x128xf32, #tpu.memory_space<vmem>>, vector<1x128xf32>
    %73 = vector.broadcast %72 : vector<1x128xf32> to vector<72x128xf32>
    %74 = arith.addf %71, %73 : vector<72x128xf32>
    %cst_43 = arith.constant 0.000000e+00 : f32
    %75 = vector.broadcast %cst_43 : f32 to vector<72x128xf32>
    %76 = arith.maximumf %74, %75 : vector<72x128xf32>
    %77 = vector.extract_strided_slice %76 {offsets = [0, 0], sizes = [8, 128], strides = [1, 1]} : vector<72x128xf32> to vector<8x128xf32>
    %78 = arith.truncf %77 : vector<8x128xf32> to vector<8x128xbf16>
    %c0_44 = arith.constant 0 : index
    %c0_45 = arith.constant 0 : index
    %79 = vector.load %arg18[%c0_44, %c0_45] : memref<8x1152xbf16, #tpu.memory_space<vmem>>, vector<8x128xbf16>
    tpu.vector_store %arg18[%c0_44, %c0_45], %78 {strides = array<i32>} : memref<8x1152xbf16, #tpu.memory_space<vmem>>, vector<8x128xbf16>,
    %80 = vector.extract_strided_slice %76 {offsets = [8, 0], sizes = [8, 128], strides = [1, 1]} : vector<72x128xf32> to vector<8x128xf32>
    %81 = arith.truncf %80 : vector<8x128xf32> to vector<8x128xbf16>
    %c0_46 = arith.constant 0 : index
    %c128_47 = arith.constant 128 : index
    %82 = vector.load %arg18[%c0_46, %c128_47] : memref<8x1152xbf16, #tpu.memory_space<vmem>>, vector<8x128xbf16>
    tpu.vector_store %arg18[%c0_46, %c128_47], %81 {strides = array<i32>} : memref<8x1152xbf16, #tpu.memory_space<vmem>>, vector<8x128xbf16>,
    %83 = vector.extract_strided_slice %76 {offsets = [16, 0], sizes = [8, 128], strides = [1, 1]} : vector<72x128xf32> to vector<8x128xf32>
    %84 = arith.truncf %83 : vector<8x128xf32> to vector<8x128xbf16>
    %c0_48 = arith.constant 0 : index
    %c256_49 = arith.constant 256 : index
    %85 = vector.load %arg18[%c0_48, %c256_49] : memref<8x1152xbf16, #tpu.memory_space<vmem>>, vector<8x128xbf16>
    tpu.vector_store %arg18[%c0_48, %c256_49], %84 {strides = array<i32>} : memref<8x1152xbf16, #tpu.memory_space<vmem>>, vector<8x128xbf16>,
    %86 = vector.extract_strided_slice %76 {offsets = [24, 0], sizes = [8, 128], strides = [1, 1]} : vector<72x128xf32> to vector<8x128xf32>
    %87 = arith.truncf %86 : vector<8x128xf32> to vector<8x128xbf16>
    %c0_50 = arith.constant 0 : index
    %c384_51 = arith.constant 384 : index
    %88 = vector.load %arg18[%c0_50, %c384_51] : memref<8x1152xbf16, #tpu.memory_space<vmem>>, vector<8x128xbf16>
    tpu.vector_store %arg18[%c0_50, %c384_51], %87 {strides = array<i32>} : memref<8x1152xbf16, #tpu.memory_space<vmem>>, vector<8x128xbf16>,
    %89 = vector.extract_strided_slice %76 {offsets = [32, 0], sizes = [8, 128], strides = [1, 1]} : vector<72x128xf32> to vector<8x128xf32>
    %90 = arith.truncf %89 : vector<8x128xf32> to vector<8x128xbf16>
    %c0_52 = arith.constant 0 : index
    %c512_53 = arith.constant 512 : index
    %91 = vector.load %arg18[%c0_52, %c512_53] : memref<8x1152xbf16, #tpu.memory_space<vmem>>, vector<8x128xbf16>
    tpu.vector_store %arg18[%c0_52, %c512_53], %90 {strides = array<i32>} : memref<8x1152xbf16, #tpu.memory_space<vmem>>, vector<8x128xbf16>,
    %92 = vector.extract_strided_slice %76 {offsets = [40, 0], sizes = [8, 128], strides = [1, 1]} : vector<72x128xf32> to vector<8x128xf32>
    %93 = arith.truncf %92 : vector<8x128xf32> to vector<8x128xbf16>
    %c0_54 = arith.constant 0 : index
    %c640_55 = arith.constant 640 : index
    %94 = vector.load %arg18[%c0_54, %c640_55] : memref<8x1152xbf16, #tpu.memory_space<vmem>>, vector<8x128xbf16>
    tpu.vector_store %arg18[%c0_54, %c640_55], %93 {strides = array<i32>} : memref<8x1152xbf16, #tpu.memory_space<vmem>>, vector<8x128xbf16>,
    %95 = vector.extract_strided_slice %76 {offsets = [48, 0], sizes = [8, 128], strides = [1, 1]} : vector<72x128xf32> to vector<8x128xf32>
    %96 = arith.truncf %95 : vector<8x128xf32> to vector<8x128xbf16>
    %c0_56 = arith.constant 0 : index
    %c768_57 = arith.constant 768 : index
    %97 = vector.load %arg18[%c0_56, %c768_57] : memref<8x1152xbf16, #tpu.memory_space<vmem>>, vector<8x128xbf16>
    tpu.vector_store %arg18[%c0_56, %c768_57], %96 {strides = array<i32>} : memref<8x1152xbf16, #tpu.memory_space<vmem>>, vector<8x128xbf16>,
    %98 = vector.extract_strided_slice %76 {offsets = [56, 0], sizes = [8, 128], strides = [1, 1]} : vector<72x128xf32> to vector<8x128xf32>
    %99 = arith.truncf %98 : vector<8x128xf32> to vector<8x128xbf16>
    %c0_58 = arith.constant 0 : index
    %c896_59 = arith.constant 896 : index
    %100 = vector.load %arg18[%c0_58, %c896_59] : memref<8x1152xbf16, #tpu.memory_space<vmem>>, vector<8x128xbf16>
    tpu.vector_store %arg18[%c0_58, %c896_59], %99 {strides = array<i32>} : memref<8x1152xbf16, #tpu.memory_space<vmem>>, vector<8x128xbf16>,
    %101 = vector.extract_strided_slice %76 {offsets = [64, 0], sizes = [8, 128], strides = [1, 1]} : vector<72x128xf32> to vector<8x128xf32>
    %102 = arith.truncf %101 : vector<8x128xf32> to vector<8x128xbf16>
    %c0_60 = arith.constant 0 : index
    %c1024_61 = arith.constant 1024 : index
    %103 = vector.load %arg18[%c0_60, %c1024_61] : memref<8x1152xbf16, #tpu.memory_space<vmem>>, vector<8x128xbf16>
    tpu.vector_store %arg18[%c0_60, %c1024_61], %102 {strides = array<i32>} : memref<8x1152xbf16, #tpu.memory_space<vmem>>, vector<8x128xbf16>,
    %c0_62 = arith.constant 0 : index
    %c0_63 = arith.constant 0 : index
    %104 = vector.load %arg18[%c0_62, %c0_63] : memref<8x1152xbf16, #tpu.memory_space<vmem>>, vector<8x1152xbf16>
    %c0_64 = arith.constant 0 : index
    %c0_65 = arith.constant 0 : index
    %105 = vector.load %arg7[%c0_64, %c0_65] : memref<1152x128xbf16, #tpu.memory_space<vmem>>, vector<1152x128xbf16>
    %cst_66 = arith.constant dense<0.000000e+00> : vector<8x128xf32>
    %106 = tpu.matmul %104, %105, %cst_66 {dimension_numbers = #tpu.dot_dimension_numbers<[1], [0], [0], [1], [0, 0, 1, 1], [], []>} : vector<8x1152xbf16>, vector<1152x128xbf16>, vector<8x128xf32> -> vector<8x128xf32>
    %c0_67 = arith.constant 0 : index
    %c0_68 = arith.constant 0 : index
    %107 = vector.load %arg8[%c0_67, %c0_68] : memref<1x128xf32, #tpu.memory_space<vmem>>, vector<1x128xf32>
    %108 = vector.broadcast %107 : vector<1x128xf32> to vector<8x128xf32>
    %109 = arith.addf %106, %108 : vector<8x128xf32>
    %cst_69 = arith.constant 0.000000e+00 : f32
    %110 = vector.broadcast %cst_69 : f32 to vector<8x128xf32>
    %111 = arith.maximumf %109, %110 : vector<8x128xf32>
    %112 = arith.truncf %111 : vector<8x128xf32> to vector<8x128xbf16>
    %c0_70 = arith.constant 0 : index
    %c0_71 = arith.constant 0 : index
    %113 = vector.load %arg9[%c0_70, %c0_71] : memref<128x128xbf16, #tpu.memory_space<vmem>>, vector<128x128xbf16>
    %cst_72 = arith.constant dense<0.000000e+00> : vector<8x128xf32>
    %114 = tpu.matmul %112, %113, %cst_72 {dimension_numbers = #tpu.dot_dimension_numbers<[1], [0], [0], [1], [0, 0, 1, 1], [], []>} : vector<8x128xbf16>, vector<128x128xbf16>, vector<8x128xf32> -> vector<8x128xf32>
    %c0_73 = arith.constant 0 : index
    %c0_74 = arith.constant 0 : index
    %115 = vector.load %arg10[%c0_73, %c0_74] : memref<1x128xf32, #tpu.memory_space<vmem>>, vector<1x128xf32>
    %116 = vector.broadcast %115 : vector<1x128xf32> to vector<8x128xf32>
    %117 = arith.addf %114, %116 : vector<8x128xf32>
    %118 = math.tanh %117 : vector<8x128xf32>
    %119 = arith.truncf %118 : vector<8x128xf32> to vector<8x128xbf16>
    %c0_75 = arith.constant 0 : index
    %c0_76 = arith.constant 0 : index
    %120 = vector.load %arg11[%c0_75, %c0_76] : memref<128x128xbf16, #tpu.memory_space<vmem>>, vector<128x128xbf16>
    %cst_77 = arith.constant dense<0.000000e+00> : vector<8x128xf32>
    %121 = tpu.matmul %119, %120, %cst_77 {dimension_numbers = #tpu.dot_dimension_numbers<[1], [0], [0], [1], [0, 0, 1, 1], [], []>} : vector<8x128xbf16>, vector<128x128xbf16>, vector<8x128xf32> -> vector<8x128xf32>
    %c0_78 = arith.constant 0 : index
    %c0_79 = arith.constant 0 : index
    %122 = vector.load %arg12[%c0_78, %c0_79] : memref<1x128xf32, #tpu.memory_space<vmem>>, vector<1x128xf32>
    %123 = vector.broadcast %122 : vector<1x128xf32> to vector<8x128xf32>
    %124 = arith.addf %121, %123 : vector<8x128xf32>
    %125 = math.tanh %124 : vector<8x128xf32>
    %126 = arith.truncf %125 : vector<8x128xf32> to vector<8x128xbf16>
    %c0_80 = arith.constant 0 : index
    %c0_81 = arith.constant 0 : index
    %127 = vector.load %arg13[%c0_80, %c0_81] : memref<128x128xbf16, #tpu.memory_space<vmem>>, vector<128x128xbf16>
    %cst_82 = arith.constant dense<0.000000e+00> : vector<8x128xf32>
    %128 = tpu.matmul %126, %127, %cst_82 {dimension_numbers = #tpu.dot_dimension_numbers<[1], [0], [0], [1], [0, 0, 1, 1], [], []>} : vector<8x128xbf16>, vector<128x128xbf16>, vector<8x128xf32> -> vector<8x128xf32>
    %c0_83 = arith.constant 0 : index
    %c0_84 = arith.constant 0 : index
    %129 = vector.load %arg14[%c0_83, %c0_84] : memref<1x128xf32, #tpu.memory_space<vmem>>, vector<1x128xf32>
    %130 = vector.broadcast %129 : vector<1x128xf32> to vector<8x128xf32>
    %131 = arith.addf %128, %130 : vector<8x128xf32>
    %c0_85 = arith.constant 0 : index
    %c0_86 = arith.constant 0 : index
    %132 = vector.load %arg15[%c0_85, %c0_86] : memref<1x128xf32, #tpu.memory_space<vmem>>, vector<1x128xf32>
    %133 = vector.broadcast %132 : vector<1x128xf32> to vector<8x128xf32>
    %134 = arith.addf %131, %133 : vector<8x128xf32>
    %cst_87 = arith.constant dense<0xFF800000> : vector<8xf32>
    %135 = vector.multi_reduction <maximumf>, %134, %cst_87 [1] : vector<8x128xf32> to vector<8xf32>
    %136 = vector.shape_cast %135 : vector<8xf32> to vector<8x1xf32>
    %137 = vector.broadcast %136 : vector<8x1xf32> to vector<8x128xf32>
    %138 = arith.subf %134, %137 : vector<8x128xf32>
    %139 = math.exp %138 : vector<8x128xf32>
    %cst_88 = arith.constant dense<0.000000e+00> : vector<8xf32>
    %140 = vector.multi_reduction <add>, %139, %cst_88 [1] : vector<8x128xf32> to vector<8xf32>
    %141 = vector.shape_cast %140 : vector<8xf32> to vector<8x1xf32>
    %142 = math.log %141 : vector<8x1xf32>
    %143 = arith.addf %136, %142 : vector<8x1xf32>
    %144 = vector.broadcast %143 : vector<8x1xf32> to vector<8x128xf32>
    %145 = arith.subf %134, %144 : vector<8x128xf32>
    %c0_89 = arith.constant 0 : index
    %c0_90 = arith.constant 0 : index
    %146 = vector.load %arg16[%c0_89, %c0_90] : memref<8x128xf32, #tpu.memory_space<vmem>>, vector<8x128xf32>
    tpu.vector_store %arg16[%c0_89, %c0_90], %145 {strides = array<i32>} : memref<8x128xf32, #tpu.memory_space<vmem>>, vector<8x128xf32>,
    return
  }
  func.func @transform_0(%arg0: i32) -> (i32, i32) {
    %c0_i32 = arith.constant 0 : i32
    %c0_i32_0 = arith.constant 0 : i32
    return %arg0, %c0_i32 : i32, i32
  }
  func.func @transform_1(%arg0: i32) -> (i32, i32, i32) {
    %c0_i32 = arith.constant 0 : i32
    %c0_i32_0 = arith.constant 0 : i32
    %c0_i32_1 = arith.constant 0 : i32
    %c0_i32_2 = arith.constant 0 : i32
    return %c0_i32, %c0_i32_0, %c0_i32_1 : i32, i32, i32
  }
  func.func @transform_2(%arg0: i32) -> (i32, i32) {
    %c0_i32 = arith.constant 0 : i32
    %c0_i32_0 = arith.constant 0 : i32
    %c0_i32_1 = arith.constant 0 : i32
    return %c0_i32, %c0_i32_0 : i32, i32
  }
  func.func @transform_3(%arg0: i32) -> (i32, i32) {
    %c0_i32 = arith.constant 0 : i32
    %c0_i32_0 = arith.constant 0 : i32
    %c0_i32_1 = arith.constant 0 : i32
    return %c0_i32, %c0_i32_0 : i32, i32
  }
  func.func @transform_4(%arg0: i32) -> (i32, i32) {
    %c0_i32 = arith.constant 0 : i32
    %c0_i32_0 = arith.constant 0 : i32
    %c0_i32_1 = arith.constant 0 : i32
    return %c0_i32, %c0_i32_0 : i32, i32
  }
  func.func @transform_5(%arg0: i32) -> (i32, i32) {
    %c0_i32 = arith.constant 0 : i32
    %c0_i32_0 = arith.constant 0 : i32
    %c0_i32_1 = arith.constant 0 : i32
    return %c0_i32, %c0_i32_0 : i32, i32
  }
  func.func @transform_6(%arg0: i32) -> (i32, i32) {
    %c0_i32 = arith.constant 0 : i32
    %c0_i32_0 = arith.constant 0 : i32
    %c0_i32_1 = arith.constant 0 : i32
    return %c0_i32, %c0_i32_0 : i32, i32
  }
  func.func @transform_7(%arg0: i32) -> (i32, i32) {
    %c0_i32 = arith.constant 0 : i32
    %c0_i32_0 = arith.constant 0 : i32
    %c0_i32_1 = arith.constant 0 : i32
    return %c0_i32, %c0_i32_0 : i32, i32
  }
  func.func @transform_8(%arg0: i32) -> (i32, i32) {
    %c0_i32 = arith.constant 0 : i32
    %c0_i32_0 = arith.constant 0 : i32
    %c0_i32_1 = arith.constant 0 : i32
    return %c0_i32, %c0_i32_0 : i32, i32
  }
  func.func @transform_9(%arg0: i32) -> (i32, i32) {
    %c0_i32 = arith.constant 0 : i32
    %c0_i32_0 = arith.constant 0 : i32
    %c0_i32_1 = arith.constant 0 : i32
    return %c0_i32, %c0_i32_0 : i32, i32
  }
  func.func @transform_10(%arg0: i32) -> (i32, i32) {
    %c0_i32 = arith.constant 0 : i32
    %c0_i32_0 = arith.constant 0 : i32
    %c0_i32_1 = arith.constant 0 : i32
    return %c0_i32, %c0_i32_0 : i32, i32
  }
  func.func @transform_11(%arg0: i32) -> (i32, i32) {
    %c0_i32 = arith.constant 0 : i32
    %c0_i32_0 = arith.constant 0 : i32
    %c0_i32_1 = arith.constant 0 : i32
    return %c0_i32, %c0_i32_0 : i32, i32
  }
  func.func @transform_12(%arg0: i32) -> (i32, i32) {
    %c0_i32 = arith.constant 0 : i32
    %c0_i32_0 = arith.constant 0 : i32
    %c0_i32_1 = arith.constant 0 : i32
    return %c0_i32, %c0_i32_0 : i32, i32
  }
  func.func @transform_13(%arg0: i32) -> (i32, i32) {
    %c0_i32 = arith.constant 0 : i32
    %c0_i32_0 = arith.constant 0 : i32
    %c0_i32_1 = arith.constant 0 : i32
    return %c0_i32, %c0_i32_0 : i32, i32
  }
  func.func @transform_14(%arg0: i32) -> (i32, i32) {
    %c0_i32 = arith.constant 0 : i32
    %c0_i32_0 = arith.constant 0 : i32
    %c0_i32_1 = arith.constant 0 : i32
    return %c0_i32, %c0_i32_0 : i32, i32
  }
  func.func @transform_15(%arg0: i32) -> (i32, i32) {
    %c0_i32 = arith.constant 0 : i32
    %c0_i32_0 = arith.constant 0 : i32
    return %arg0, %c0_i32 : i32, i32
  }
}

</mosaic_0001>

<bundles_post_ra>
// kernel: actor_forward.1
= control target key start
LH: loop header
LB: loop body
LE: loop exit
PB: predicated region body
PF: predicated region fallthrough
CT: control target
= control target key end

     0   :  { %s11591_s18 = smov 0   ;;  %s13845_s0 = inlined_call_operand.vmem [shape: bf16[1024,256], index: 0, kind: input, shape index: {}]   ;;  %s13846_s1 = inlined_call_operand.vmem [shape: bf16[4,288,512], index: 1, kind: input, shape index: {}]   ;;  %s13847_s2 = inlined_call_operand.vmem [shape: bf16[256,128], index: 2, kind: input, shape index: {}]   ;;  %s13848_s3 = inlined_call_operand.vmem [shape: f32[1,128], index: 3, kind: input, shape index: {}]   ;;  %s13849_s4 = inlined_call_operand.vmem [shape: bf16[2048,128], index: 4, kind: input, shape index: {}]   ;;  %s13850_s5 = inlined_call_operand.vmem [shape: f32[1,128], index: 5, kind: input, shape index: {}]   ;;  %s13851_s6 = inlined_call_operand.vmem [shape: bf16[1152,128], index: 6, kind: input, shape index: {}]   ;;  %s13852_s7 = inlined_call_operand.vmem [shape: f32[1,128], index: 7, kind: input, shape index: {}]   ;;  %s13853_s8 = inlined_call_operand.vmem [shape: bf16[128,128], index: 8, kind: input, shape index: {}]   ;;  %s13854_s9 = inlined_call_operand.vmem [shape: f32[1,128], index: 9, kind: input, shape index: {}]   ;;  %s13855_s10 = inlined_call_operand.vmem [shape: bf16[128,128], index: 10, kind: input, shape index: {}]   ;;  %s13856_s11 = inlined_call_operand.vmem [shape: f32[1,128], index: 11, kind: input, shape index: {}]   ;;  %s13857_s12 = inlined_call_operand.vmem [shape: bf16[128,128], index: 12, kind: input, shape index: {}]   ;;  %s13858_s13 = inlined_call_operand.vmem [shape: f32[1,128], index: 13, kind: input, shape index: {}]   ;;  %s13859_s14 = inlined_call_operand.vmem [shape: f32[1,128], index: 14, kind: input, shape index: {}]   ;;  %s13860_s15 = inlined_call_operand.vmem [shape: f32[16,128], index: 15, kind: output, shape index: {}]  }
   0x1 LB: > { %s11597_s19 = sadd.s32 4294967295, %s11506_s18   ;;  %p8604_p0 = scmp.ge.s32.totalorder %s11506_s18, 1  ;;  %s11506_s18 = sphi %s11591_s18, %s25_s18  }
   0x2   : > { %p439_p1 = scmp.lt.s32.totalorder %s11506_s18, 3 }
   0x4   : > { %p440_p2 = pnand %p8604_p0, %p439_p1 }
   0x5   : > { %v10698_v0 = vld [vmem:[%s13847_s2] sm:$0xff] (!%p440_p2)   ;;  %v11508_v1 = vmov (!%p440_p2), 0   ;;  %s8605_s22 = sshll.u32 (!%p440_p2), %s11597_s19, 6  ;;  %v10699_v2 = vld [vmem:[%s13847_s2 + $0x8] sm:$0xff] (!%p440_p2)   ;;  %v10700_v3 = vld [vmem:[%s13847_s2 + $0x10] sm:$0xff] (!%p440_p2)   ;;  %vm11510_vm0 = vmmov (!%p440_p2), 0  }
   0x6   : > { %443 = sbr.rel (%p440_p2) target bundleno = 2724 (0xaa4), region = 80  ;;  %1018 = vmatprep.subr.bf16.mxu0 (!%p440_p2), %v11508_v1  ;;  %1835 = vmatprep.subr.bf16.mxu1 (!%p440_p2), %v11508_v1  ;;  %p488_p3 = scmp.lt.s32.totalorder (!%p440_p2), %s8605_s22, 127  ;;  %v10701_v4 = vld [vmem:[%s13847_s2 + $0x18] sm:$0xff] (!%p440_p2)   ;;  %v10702_v5 = vld [vmem:[%s13847_s2 + $0x20] sm:$0xff] (!%p440_p2)   ;;  %v10703_v7 = vld [vmem:[%s13847_s2 + $0x28] sm:$0xff] (!%p440_p2)  }
   0x7   : > { %1019 = vmatpush1.bf16.msra.mxu0 (!%p440_p2), %v10698_v0  ;;  %v10704_v8 = vld [vmem:[%s13847_s2 + $0x30] sm:$0xff] (!%p440_p2)   ;;  %v10705_v9 = vld [vmem:[%s13847_s2 + $0x38] sm:$0xff] (!%p440_p2)   ;;  %v10706_v10 = vld [vmem:[%s13847_s2 + $0x40] sm:$0xff] (!%p440_p2)   ;;  %p494_p4 = scmp.lt.s32.totalorder (!%p440_p2), %s11597_s19, 1 }
   0x8   : > { %1020 = vmatprep.subr.bf16.mxu0 (!%p440_p2), %v11508_v1  ;;  %v10707_v11 = vld [vmem:[%s13847_s2 + $0x48] sm:$0xff] (!%p440_p2)   ;;  %v10708_v12 = vld [vmem:[%s13847_s2 + $0x50] sm:$0xff] (!%p440_p2)   ;;  %v10709_v13 = vld [vmem:[%s13847_s2 + $0x58] sm:$0xff] (!%p440_p2)  }
   0x9   : > { %v10710_v14 = vld [vmem:[%s13847_s2 + $0x60] sm:$0xff] (!%p440_p2)   ;;  %v10711_v15 = vld [vmem:[%s13847_s2 + $0x68] sm:$0xff] (!%p440_p2)   ;;  %v10712_v16 = vld [vmem:[%s13847_s2 + $0x70] sm:$0xff] (!%p440_p2)  }
   0xa   : > { %v10713_v17 = vld [vmem:[%s13847_s2 + $0x78] sm:$0xff] (!%p440_p2)  }
   0xb   : > { %1021 = vmatpush1.bf16.msra.mxu0 (!%p440_p2), %v10699_v2 }
   0xc   : > { %1022 = vmatprep.subr.bf16.mxu0 (!%p440_p2), %v11508_v1 }
   0xd   : > { %s13862_s22 = smov (!%p488_p3, %s8605_s22), 127  ;;  %s13864_s19 = smov (!%p494_p4, %s11597_s19), 1 }
   0xe   : > { %s9659_s29 = sshll.u32 %s13862_s22, 3  ;;  %s8608_s17 = sshll.u32 %s13864_s19, 3 }
   0xf   : > { %1023 = vmatpush1.bf16.msra.mxu0 %v10700_v3  ;;  %s11625_s21 = scalar_lea.vmem %s13845_s0, %s9659_s29  ;;  %s497_s24 = scalar_lea.vmem %s13860_s15, %s8608_s17 }
  0x10   : > { %1024 = vmatprep.subr.bf16.mxu0 %v11508_v1  ;;  %v10716_v6 = vld [vmem:[%s11625_s21 + $0x4] ss:$8 sps:$4 sm:$0xff]   ;;  %v10714_v18 = vld [vmem:[%s11625_s21] ss:$8 sps:$4 sm:$0xff]   ;;  %v10717_v19 = vld [vmem:[%s11625_s21 + $0x14] ss:$8 sps:$4 sm:$0xff]  }
  0x11   : > { %1050 = vmatprep.mubr.bf16.mxu0 %v10716_v6  ;;  %v10719_v20 = vld [vmem:[%s11625_s21 + $0x10] ss:$8 sps:$4 sm:$0xff]   ;;  %v10720_v21 = vld [vmem:[%s11625_s21 + $0x24] ss:$8 sps:$4 sm:$0xff]   ;;  %v10722_v22 = vld [vmem:[%s11625_s21 + $0x20] ss:$8 sps:$4 sm:$0xff]  }
  0x12   : > { %v10723_v23 = vld [vmem:[%s11625_s21 + $0x34] ss:$8 sps:$4 sm:$0xff]   ;;  %v10725_v24 = vld [vmem:[%s11625_s21 + $0x30] ss:$8 sps:$4 sm:$0xff]   ;;  %v10726_v25 = vld [vmem:[%s11625_s21 + $0x44] ss:$8 sps:$4 sm:$0xff]  }
  0x13   : > { %1025 = vmatpush1.bf16.msra.mxu0 %v10701_v4  ;;  %v10728_v26 = vld [vmem:[%s11625_s21 + $0x40] ss:$8 sps:$4 sm:$0xff]   ;;  %v10729_v27 = vld [vmem:[%s11625_s21 + $0x54] ss:$8 sps:$4 sm:$0xff]   ;;  %v10731_v28 = vld [vmem:[%s11625_s21 + $0x50] ss:$8 sps:$4 sm:$0xff]  }
  0x14   : > { %1026 = vmatprep.subr.bf16.mxu0 %v11508_v1  ;;  %v10732_v29 = vld [vmem:[%s11625_s21 + $0x64] ss:$8 sps:$4 sm:$0xff]   ;;  %v10734_v30 = vld [vmem:[%s11625_s21 + $0x60] ss:$8 sps:$4 sm:$0xff]   ;;  %v10735_v31 = vld [vmem:[%s11625_s21 + $0x74] ss:$8 sps:$4 sm:$0xff]  }
  0x15   : > { %v10737_v32 = vld [vmem:[%s11625_s21 + $0x70] ss:$8 sps:$4 sm:$0xff]   ;;  %v10738_v33 = vld [vmem:[%s11625_s21 + $0x84] ss:$8 sps:$4 sm:$0xff]   ;;  %v10740_v34 = vld [vmem:[%s11625_s21 + $0x80] ss:$8 sps:$4 sm:$0xff]  }
  0x16   : > { %v10741_v35 = vld [vmem:[%s11625_s21 + $0x94] ss:$8 sps:$4 sm:$0xff]   ;;  %v10743_v36 = vld [vmem:[%s11625_s21 + $0x90] ss:$8 sps:$4 sm:$0xff]   ;;  %v10744_v37 = vld [vmem:[%s11625_s21 + $0xa4] ss:$8 sps:$4 sm:$0xff]  }
  0x17   : > { %1027 = vmatpush1.bf16.msra.mxu0 %v10702_v5  ;;  %v10746_v38 = vld [vmem:[%s11625_s21 + $0xa0] ss:$8 sps:$4 sm:$0xff]   ;;  %v10747_v39 = vld [vmem:[%s11625_s21 + $0xb4] ss:$8 sps:$4 sm:$0xff]   ;;  %v10749_v40 = vld [vmem:[%s11625_s21 + $0xb0] ss:$8 sps:$4 sm:$0xff]  }
  0x18   : > { %1028 = vmatprep.subr.bf16.mxu0 %v11508_v1  ;;  %v10750_v41 = vld [vmem:[%s11625_s21 + $0xc4] ss:$8 sps:$4 sm:$0xff]   ;;  %v10752_v42 = vld [vmem:[%s11625_s21 + $0xc0] ss:$8 sps:$4 sm:$0xff]   ;;  %v10753_v43 = vld [vmem:[%s11625_s21 + $0xd4] ss:$8 sps:$4 sm:$0xff]  }
  0x19   : > { %v10755_v44 = vld [vmem:[%s11625_s21 + $0xd0] ss:$8 sps:$4 sm:$0xff]   ;;  %v10756_v45 = vld [vmem:[%s11625_s21 + $0xe4] ss:$8 sps:$4 sm:$0xff]   ;;  %v10758_v46 = vld [vmem:[%s11625_s21 + $0xe0] ss:$8 sps:$4 sm:$0xff]  }
  0x1a   : > { %v10759_v47 = vld [vmem:[%s11625_s21 + $0xf4] ss:$8 sps:$4 sm:$0xff]   ;;  %v10761_v48 = vld [vmem:[%s11625_s21 + $0xf0] ss:$8 sps:$4 sm:$0xff]   ;;  %v10762_v49 = vld [vmem:[%s11625_s21 + $0x104] ss:$8 sps:$4 sm:$0xff]  }
  0x1b   : > { %1029 = vmatpush1.bf16.msra.mxu0 %v10703_v7  ;;  %v10764_v50 = vld [vmem:[%s11625_s21 + $0x100] ss:$8 sps:$4 sm:$0xff]   ;;  %v10765_v51 = vld [vmem:[%s11625_s21 + $0x114] ss:$8 sps:$4 sm:$0xff]   ;;  %v10767_v52 = vld [vmem:[%s11625_s21 + $0x110] ss:$8 sps:$4 sm:$0xff]  }
  0x1c   : > { %1030 = vmatprep.subr.bf16.mxu0 %v11508_v1  ;;  %v10768_v53 = vld [vmem:[%s11625_s21 + $0x124] ss:$8 sps:$4 sm:$0xff]   ;;  %v10770_v54 = vld [vmem:[%s11625_s21 + $0x120] ss:$8 sps:$4 sm:$0xff]   ;;  %v10771_v55 = vld [vmem:[%s11625_s21 + $0x134] ss:$8 sps:$4 sm:$0xff]  }
  0x1d   : > { %v10773_v56 = vld [vmem:[%s11625_s21 + $0x130] ss:$8 sps:$4 sm:$0xff]   ;;  %v10774_v57 = vld [vmem:[%s11625_s21 + $0x144] ss:$8 sps:$4 sm:$0xff]   ;;  %v10776_v58 = vld [vmem:[%s11625_s21 + $0x140] ss:$8 sps:$4 sm:$0xff]  }
  0x1e   : > { %v10777_v59 = vld [vmem:[%s11625_s21 + $0x154] ss:$8 sps:$4 sm:$0xff]   ;;  %v10779_v60 = vld [vmem:[%s11625_s21 + $0x150] ss:$8 sps:$4 sm:$0xff]   ;;  %v10780_v61 = vld [vmem:[%s11625_s21 + $0x164] ss:$8 sps:$4 sm:$0xff]  }
  0x1f   : > { %1031 = vmatpush1.bf16.msra.mxu0 %v10704_v8  ;;  %v10782_v62 = vld [vmem:[%s11625_s21 + $0x160] ss:$8 sps:$4 sm:$0xff]   ;;  %v10783_v63 = vld [vmem:[%s11625_s21 + $0x174] ss:$8 sps:$4 sm:$0xff]   ;;  %v10785_v0 = vld [vmem:[%s11625_s21 + $0x170] ss:$8 sps:$4 sm:$0xff]  }
  0x20   : > { %1032 = vmatprep.subr.bf16.mxu0 %v11508_v1  ;;  %v10786_v2 = vld [vmem:[%s11625_s21 + $0x184] ss:$8 sps:$4 sm:$0xff]   ;;  %v10788_v3 = vld [vmem:[%s11625_s21 + $0x180] ss:$8 sps:$4 sm:$0xff]   ;;  %v10789_v4 = vld [vmem:[%s11625_s21 + $0x194] ss:$8 sps:$4 sm:$0xff]  }
  0x21   : > { %v10791_v5 = vld [vmem:[%s11625_s21 + $0x190] ss:$8 sps:$4 sm:$0xff]   ;;  %v10792_v6 = vld [vmem:[%s11625_s21 + $0x1a4] ss:$8 sps:$4 sm:$0xff]   ;;  %v10794_v7 = vld [vmem:[%s11625_s21 + $0x1a0] ss:$8 sps:$4 sm:$0xff]  }
  0x22   : > { %v10795_v8 = vld [vmem:[%s11625_s21 + $0x1b4] ss:$8 sps:$4 sm:$0xff]  }
  0x23   : > { %1033 = vmatpush1.bf16.msra.mxu0 %v10705_v9  ;;  %v11731_v9 = vld [vmem:[%s13848_s3] ss:$0 sm:$0xff] }
  0x24   : > { %1034 = vmatprep.subr.bf16.mxu0 %v11508_v1 }
  0x27   : > { %1035 = vmatpush1.bf16.msra.mxu0 %v10706_v10 }
  0x28   : > { %1036 = vmatprep.subr.bf16.mxu0 %v11508_v1 }
  0x2b   : > { %1037 = vmatpush1.bf16.msra.mxu0 %v10707_v11 }
  0x2c   : > { %1038 = vmatprep.subr.bf16.mxu0 %v11508_v1 }
  0x2f   : > { %1039 = vmatpush1.bf16.msra.mxu0 %v10708_v12 }
  0x30   : > { %1040 = vmatprep.subr.bf16.mxu0 %v11508_v1 }
  0x33   : > { %1041 = vmatpush1.bf16.msra.mxu0 %v10709_v13  ;;  %v10797_v13 = vld [vmem:[%s11625_s21 + $0x1b0] ss:$8 sps:$4 sm:$0xff]  }
  0x34   : > { %1042 = vmatprep.subr.bf16.mxu0 %v11508_v1 }
  0x37   : > { %1043 = vmatpush1.bf16.msra.mxu0 %v10710_v14  ;;  %v10812_v14 = vld [vmem:[%s13846_s1 + $0x4] ss:$16 sps:$4 sm:$0xff]  }
  0x38   : > { %1044 = vmatprep.subr.bf16.mxu0 %v11508_v1  ;;  %1867 = vmatprep.mubr.bf16.mxu1 %v10812_v14 }
  0x3b   : > { %1045 = vmatpush1.bf16.msra.mxu0 %v10711_v15 }
  0x3c   : > { %1046 = vmatprep.subr.bf16.mxu0 %v11508_v1 }
  0x3f   : > { %1047 = vmatpush1.bf16.msra.mxu0 %v10712_v16  ;;  %v10798_v16 = vld [vmem:[%s11625_s21 + $0x1c4] ss:$8 sps:$4 sm:$0xff]  }
  0x40   : > { %1048 = vmatprep.subr.bf16.mxu0 %v11508_v1 }
  0x43   : > { %1049 = vmatpush1.bf16.msra.mxu0 %v10713_v17 }
  0x44   : > { %2806 = vmatprep.subr.bf16.mxu0 %v11508_v1 }
  0x46   : > { %1051 = vmatmul.mubr.bf16.vlgmr.msra.gmra.mrb[0].mxu0 %v10714_v18 }
  0x47   : > { %1058 = vmatprep.mubr.bf16.mxu0 %v10717_v19 }
  0x4e   : > { %1059 = vmatmul.mubr.bf16.gmra.mrb[4].mxu0 %v10719_v20 }
  0x4f   : > { %1066 = vmatprep.mubr.bf16.mxu0 %v10720_v21 }
  0x56   : > { %1067 = vmatmul.mubr.bf16.gmra.mrb[8].mxu0 %v10722_v22  ;;  %v10800_v22 = vld [vmem:[%s11625_s21 + $0x1c0] ss:$8 sps:$4 sm:$0xff]  }
  0x57   : > { %1074 = vmatprep.mubr.bf16.mxu0 %v10723_v23 }
  0x5e   : > { %1075 = vmatmul.mubr.bf16.gmra.mrb[12].mxu0 %v10725_v24 }
  0x5f   : > { %1082 = vmatprep.mubr.bf16.mxu0 %v10726_v25 }
  0x66   : > { %1083 = vmatmul.mubr.bf16.gmra.mrb[16].mxu0 %v10728_v26 }
  0x67   : > { %1090 = vmatprep.mubr.bf16.mxu0 %v10729_v27  ;;  %v10801_v27 = vld [vmem:[%s11625_s21 + $0x1d4] ss:$8 sps:$4 sm:$0xff]  }
  0x6e   : > { %1091 = vmatmul.mubr.bf16.gmra.mrb[20].mxu0 %v10731_v28 }
  0x6f   : > { %1098 = vmatprep.mubr.bf16.mxu0 %v10732_v29 }
  0x76   : > { %1099 = vmatmul.mubr.bf16.gmra.mrb[24].mxu0 %v10734_v30 }
  0x77   : > { %1106 = vmatprep.mubr.bf16.mxu0 %v10735_v31 }
  0x7e   : > { %1107 = vmatmul.mubr.bf16.gmra.mrb[28].mxu0 %v10737_v32 }
  0x7f   : > { %1114 = vmatprep.mubr.bf16.mxu0 %v10738_v33  ;;  %v10803_v33 = vld [vmem:[%s11625_s21 + $0x1d0] ss:$8 sps:$4 sm:$0xff]  }
  0x86   : > { %1115 = vmatmul.mubr.bf16.gmra.mrb[32].mxu0 %v10740_v34 }
  0x87   : > { %1122 = vmatprep.mubr.bf16.mxu0 %v10741_v35 }
  0x8e   : > { %1123 = vmatmul.mubr.bf16.gmra.mrb[36].mxu0 %v10743_v36 }
  0x8f   : > { %1130 = vmatprep.mubr.bf16.mxu0 %v10744_v37 }
  0x96   : > { %1131 = vmatmul.mubr.bf16.gmra.mrb[40].mxu0 %v10746_v38  ;;  %v10804_v38 = vld [vmem:[%s11625_s21 + $0x1e4] ss:$8 sps:$4 sm:$0xff]  }
  0x97   : > { %1138 = vmatprep.mubr.bf16.mxu0 %v10747_v39 }
  0x9e   : > { %1139 = vmatmul.mubr.bf16.gmra.mrb[44].mxu0 %v10749_v40 }
  0x9f   : > { %1146 = vmatprep.mubr.bf16.mxu0 %v10750_v41 }
  0xa6   : > { %1147 = vmatmul.mubr.bf16.gmra.mrb[48].mxu0 %v10752_v42 }
  0xa7   : > { %1154 = vmatprep.mubr.bf16.mxu0 %v10753_v43 }
  0xae   : > { %1155 = vmatmul.mubr.bf16.gmra.mrb[52].mxu0 %v10755_v44  ;;  %v10806_v44 = vld [vmem:[%s11625_s21 + $0x1e0] ss:$8 sps:$4 sm:$0xff]  }
  0xaf   : > { %1162 = vmatprep.mubr.bf16.mxu0 %v10756_v45 }
  0xb6   : > { %1163 = vmatmul.mubr.bf16.gmra.mrb[56].mxu0 %v10758_v46 }
  0xb7   : > { %1170 = vmatprep.mubr.bf16.mxu0 %v10759_v47 }
  0xbe   : > { %1171 = vmatmul.mubr.bf16.gmra.mrb[60].mxu0 %v10761_v48 }
  0xbf   : > { %1178 = vmatprep.mubr.bf16.mxu0 %v10762_v49  ;;  %v10807_v49 = vld [vmem:[%s11625_s21 + $0x1f4] ss:$8 sps:$4 sm:$0xff]  }
  0xc6   : > { %1179 = vmatmul.mubr.bf16.gmra.mrb[64].mxu0 %v10764_v50 }
  0xc7   : > { %1186 = vmatprep.mubr.bf16.mxu0 %v10765_v51 }
  0xce   : > { %1187 = vmatmul.mubr.bf16.gmra.mrb[68].mxu0 %v10767_v52 }
  0xcf   : > { %1194 = vmatprep.mubr.bf16.mxu0 %v10768_v53 }
  0xd6   : > { %1195 = vmatmul.mubr.bf16.gmra.mrb[72].mxu0 %v10770_v54  ;;  %v10809_v54 = vld [vmem:[%s11625_s21 + $0x1f0] ss:$8 sps:$4 sm:$0xff]  }
  0xd7   : > { %1202 = vmatprep.mubr.bf16.mxu0 %v10771_v55 }
  0xde   : > { %1203 = vmatmul.mubr.bf16.gmra.mrb[76].mxu0 %v10773_v56 }
  0xdf   : > { %1210 = vmatprep.mubr.bf16.mxu0 %v10774_v57 }
  0xe6   : > { %1211 = vmatmul.mubr.bf16.gmra.mrb[80].mxu0 %v10776_v58 }
  0xe7   : > { %1218 = vmatprep.mubr.bf16.mxu0 %v10777_v59 }
  0xee   : > { %1219 = vmatmul.mubr.bf16.gmra.mrb[84].mxu0 %v10779_v60  ;;  %v10815_v60 = vld [vmem:[%s13846_s1 + $0x244] ss:$16 sps:$4 sm:$0xff]  }
  0xef   : > { %1226 = vmatprep.mubr.bf16.mxu0 %v10780_v61 }
  0xf6   : > { %1227 = vmatmul.mubr.bf16.gmra.mrb[88].mxu0 %v10782_v62 }
  0xf7   : > { %1234 = vmatprep.mubr.bf16.mxu0 %v10783_v63 }
  0xfe   : > { %1235 = vmatmul.mubr.bf16.gmra.mrb[92].mxu0 %v10785_v0 }
  0xff   : > { %1242 = vmatprep.mubr.bf16.mxu0 %v10786_v2 }
 0x106   : > { %1243 = vmatmul.mubr.bf16.gmra.mrb[96].mxu0 %v10788_v3 }
 0x107   : > { %1250 = vmatprep.mubr.bf16.mxu0 %v10789_v4 }
 0x10e   : > { %1251 = vmatmul.mubr.bf16.gmra.mrb[100].mxu0 %v10791_v5 }
 0x10f   : > { %1258 = vmatprep.mubr.bf16.mxu0 %v10792_v6 }
 0x116   : > { %1259 = vmatmul.mubr.bf16.gmra.mrb[104].mxu0 %v10794_v7 }
 0x117   : > { %1266 = vmatprep.mubr.bf16.mxu0 %v10795_v8 }
 0x119   : > { %v1052_v10 = vpop.f32.mrb[0].mxu0 }
 0x11a   : > { %v1053_v11 = vadd.f32 %v11731_v9, %v1052_v10  ;;  %v1054_v12 = vpop.f32.mrb[1].mxu0 }
 0x11b   : > { %v1055_v15 = vpop.f32.mrb[2].mxu0 }
 0x11c   : > { %v1056_v17 = vadd.f32 %v11731_v9, %v1055_v15  ;;  %v1057_v18 = vpop.f32.mrb[3].mxu0  ;;  %v1307_v19 = vmax.f32 %v1053_v11, 0.0 }
 0x11e   : > { %v1308_v20 = vmax.f32 %v1056_v17, 0.0  ;;  %1267 = vmatmul.mubr.bf16.gmra.mrb[108].mxu0 %v10797_v13 }
 0x11f   : > { %1274 = vmatprep.mubr.bf16.mxu0 %v10798_v16 }
 0x120   : > { %v11740_v21 = vpack.c.bf16 %v1308_v20, %v1307_v19 }
 0x121   : > { %v1060_v23 = vpop.f32.mrb[4].mxu0 }
 0x122   : > { %1836 = vmatpush1.bf16.msra.mxu1 %v11740_v21  ;;  %2807 = vmatpush1.bf16.msra.mxu0 %v11740_v21  ;;  %v1061_v24 = vadd.f32 %v11731_v9, %v1060_v23  ;;  %v1062_v25 = vpop.f32.mrb[5].mxu0 }
 0x123   : > { %v1063_v26 = vpop.f32.mrb[6].mxu0  ;;  %1837 = vmatprep.subr.bf16.mxu1 %v11508_v1  ;;  %2808 = vmatprep.subr.bf16.mxu0 %v11508_v1 }
 0x124   : > { %v1064_v28 = vadd.f32 %v11731_v9, %v1063_v26  ;;  %v1065_v29 = vpop.f32.mrb[7].mxu0  ;;  %v1309_v30 = vmax.f32 %v1061_v24, 0.0 }
 0x126   : > { %v1310_v31 = vmax.f32 %v1064_v28, 0.0  ;;  %1275 = vmatmul.mubr.bf16.gmra.mrb[112].mxu0 %v10800_v22 }
 0x127   : > { %1282 = vmatprep.mubr.bf16.mxu0 %v10801_v27 }
 0x128   : > { %v11750_v32 = vpack.c.bf16 %v1310_v31, %v1309_v30 }
 0x129   : > { %v1068_v34 = vpop.f32.mrb[8].mxu0 }
 0x12a   : > { %1838 = vmatpush1.bf16.msra.mxu1 %v11750_v32  ;;  %2809 = vmatpush1.bf16.msra.mxu0 %v11750_v32  ;;  %v1069_v35 = vadd.f32 %v11731_v9, %v1068_v34  ;;  %v1070_v36 = vpop.f32.mrb[9].mxu0 }
 0x12b   : > { %v1071_v37 = vpop.f32.mrb[10].mxu0  ;;  %1839 = vmatprep.subr.bf16.mxu1 %v11508_v1  ;;  %2810 = vmatprep.subr.bf16.mxu0 %v11508_v1 }
 0x12c   : > { %v1072_v39 = vadd.f32 %v11731_v9, %v1071_v37  ;;  %v1073_v40 = vpop.f32.mrb[11].mxu0  ;;  %v1311_v41 = vmax.f32 %v1069_v35, 0.0 }
 0x12e   : > { %v1312_v42 = vmax.f32 %v1072_v39, 0.0  ;;  %1283 = vmatmul.mubr.bf16.gmra.mrb[116].mxu0 %v10803_v33 }
 0x12f   : > { %1290 = vmatprep.mubr.bf16.mxu0 %v10804_v38 }
 0x130   : > { %v11760_v43 = vpack.c.bf16 %v1312_v42, %v1311_v41 }
 0x131   : > { %v1076_v45 = vpop.f32.mrb[12].mxu0 }
 0x132   : > { %1840 = vmatpush1.bf16.msra.mxu1 %v11760_v43  ;;  %2811 = vmatpush1.bf16.msra.mxu0 %v11760_v43  ;;  %v1077_v46 = vadd.f32 %v11731_v9, %v1076_v45  ;;  %v1078_v47 = vpop.f32.mrb[13].mxu0 }
 0x133   : > { %v1079_v48 = vpop.f32.mrb[14].mxu0  ;;  %1841 = vmatprep.subr.bf16.mxu1 %v11508_v1  ;;  %2812 = vmatprep.subr.bf16.mxu0 %v11508_v1 }
 0x134   : > { %v1080_v50 = vadd.f32 %v11731_v9, %v1079_v48  ;;  %v1081_v51 = vpop.f32.mrb[15].mxu0  ;;  %v1313_v52 = vmax.f32 %v1077_v46, 0.0 }
 0x136   : > { %1291 = vmatmul.mubr.bf16.gmra.mrb[120].mxu0 %v10806_v44  ;;  %v1314_v53 = vmax.f32 %v1080_v50, 0.0 }
 0x137   : > { %1298 = vmatprep.mubr.bf16.mxu0 %v10807_v49 }
 0x138   : > { %v11771_v55 = vpack.c.bf16 %v1314_v53, %v1313_v52 }
 0x139   : > { %v1084_v56 = vpop.f32.mrb[16].mxu0 }
 0x13a   : > { %1842 = vmatpush1.bf16.msra.mxu1 %v11771_v55  ;;  %2813 = vmatpush1.bf16.msra.mxu0 %v11771_v55  ;;  %v1085_v57 = vadd.f32 %v11731_v9, %v1084_v56  ;;  %v1086_v58 = vpop.f32.mrb[17].mxu0 }
 0x13b   : > { %v1087_v59 = vpop.f32.mrb[18].mxu0  ;;  %1843 = vmatprep.subr.bf16.mxu1 %v11508_v1  ;;  %2814 = vmatprep.subr.bf16.mxu0 %v11508_v1 }
 0x13c   : > { %v1088_v61 = vadd.f32 %v11731_v9, %v1087_v59  ;;  %v1089_v62 = vpop.f32.mrb[19].mxu0  ;;  %v1315_v63 = vmax.f32 %v1085_v57, 0.0 }
 0x13e   : > { %1299 = vmatmul.mubr.bf16.gmra.mrb[124].mxu0 %v10809_v54  ;;  %v1316_v0 = vmax.f32 %v1088_v61, 0.0 }
 0x13f   : > { %2838 = vmatprep.mubr.bf16.mxu0 %v10815_v60 }
 0x140   : > { %v11782_v2 = vpack.c.bf16 %v1316_v0, %v1315_v63 }
 0x141   : > { %v1092_v3 = vpop.f32.mrb[20].mxu0 }
 0x142   : > { %1844 = vmatpush1.bf16.msra.mxu1 %v11782_v2  ;;  %2815 = vmatpush1.bf16.msra.mxu0 %v11782_v2  ;;  %v1093_v4 = vadd.f32 %v11731_v9, %v1092_v3  ;;  %v1094_v5 = vpop.f32.mrb[21].mxu0 }
 0x143   : > { %v1095_v6 = vpop.f32.mrb[22].mxu0  ;;  %1845 = vmatprep.subr.bf16.mxu1 %v11508_v1  ;;  %2816 = vmatprep.subr.bf16.mxu0 %v11508_v1 }
 0x144   : > { %v1096_v7 = vadd.f32 %v11731_v9, %v1095_v6  ;;  %v1097_v8 = vpop.f32.mrb[23].mxu0  ;;  %v1317_v10 = vmax.f32 %v1093_v4, 0.0 }
 0x146   : > { %v1318_v11 = vmax.f32 %v1096_v7, 0.0 }
 0x148   : > { %v11790_v12 = vpack.c.bf16 %v1318_v11, %v1317_v10 }
 0x149   : > { %v1100_v13 = vpop.f32.mrb[24].mxu0 }
 0x14a   : > { %v1101_v14 = vadd.f32 %v11731_v9, %v1100_v13  ;;  %v1102_v15 = vpop.f32.mrb[25].mxu0  ;;  %1846 = vmatpush1.bf16.msra.mxu1 %v11790_v12  ;;  %2817 = vmatpush1.bf16.msra.mxu0 %v11790_v12 }
 0x14b   : > { %v1103_v16 = vpop.f32.mrb[26].mxu0  ;;  %1847 = vmatprep.subr.bf16.mxu1 %v11508_v1  ;;  %2818 = vmatprep.subr.bf16.mxu0 %v11508_v1 }
 0x14c   : > { %v1104_v17 = vadd.f32 %v11731_v9, %v1103_v16  ;;  %v1105_v18 = vpop.f32.mrb[27].mxu0  ;;  %v1319_v19 = vmax.f32 %v1101_v14, 0.0 }
 0x14e   : > { %v1320_v20 = vmax.f32 %v1104_v17, 0.0 }
 0x150   : > { %v11798_v22 = vpack.c.bf16 %v1320_v20, %v1319_v19 }
 0x151   : > { %v1108_v23 = vpop.f32.mrb[28].mxu0 }
 0x152   : > { %v1109_v24 = vadd.f32 %v11731_v9, %v1108_v23  ;;  %v1110_v25 = vpop.f32.mrb[29].mxu0  ;;  %1848 = vmatpush1.bf16.msra.mxu1 %v11798_v22  ;;  %2819 = vmatpush1.bf16.msra.mxu0 %v11798_v22 }
 0x153   : > { %v1111_v26 = vpop.f32.mrb[30].mxu0  ;;  %1849 = vmatprep.subr.bf16.mxu1 %v11508_v1  ;;  %2820 = vmatprep.subr.bf16.mxu0 %v11508_v1 }
 0x154   : > { %v1112_v27 = vadd.f32 %v11731_v9, %v1111_v26  ;;  %v1113_v28 = vpop.f32.mrb[31].mxu0  ;;  %v1321_v29 = vmax.f32 %v1109_v24, 0.0 }
 0x156   : > { %v1322_v30 = vmax.f32 %v1112_v27, 0.0 }
 0x158   : > { %v11806_v31 = vpack.c.bf16 %v1322_v30, %v1321_v29 }
 0x159   : > { %v1116_v33 = vpop.f32.mrb[32].mxu0 }
 0x15a   : > { %v1117_v34 = vadd.f32 %v11731_v9, %v1116_v33  ;;  %v1118_v35 = vpop.f32.mrb[33].mxu0  ;;  %1850 = vmatpush1.bf16.msra.mxu1 %v11806_v31  ;;  %2821 = vmatpush1.bf16.msra.mxu0 %v11806_v31 }
 0x15b   : > { %v1119_v36 = vpop.f32.mrb[34].mxu0  ;;  %1851 = vmatprep.subr.bf16.mxu1 %v11508_v1  ;;  %2822 = vmatprep.subr.bf16.mxu0 %v11508_v1 }
 0x15c   : > { %v1120_v37 = vadd.f32 %v11731_v9, %v1119_v36  ;;  %v1121_v38 = vpop.f32.mrb[35].mxu0  ;;  %v1323_v39 = vmax.f32 %v1117_v34, 0.0 }
 0x15e   : > { %v1324_v40 = vmax.f32 %v1120_v37, 0.0 }
 0x160   : > { %v11814_v41 = vpack.c.bf16 %v1324_v40, %v1323_v39 }
 0x161   : > { %v1124_v42 = vpop.f32.mrb[36].mxu0 }
 0x162   : > { %v1125_v44 = vadd.f32 %v11731_v9, %v1124_v42  ;;  %v1126_v45 = vpop.f32.mrb[37].mxu0  ;;  %1852 = vmatpush1.bf16.msra.mxu1 %v11814_v41  ;;  %2823 = vmatpush1.bf16.msra.mxu0 %v11814_v41 }
 0x163   : > { %v1127_v46 = vpop.f32.mrb[38].mxu0  ;;  %1853 = vmatprep.subr.bf16.mxu1 %v11508_v1  ;;  %2824 = vmatprep.subr.bf16.mxu0 %v11508_v1 }
 0x164   : > { %v1128_v47 = vadd.f32 %v11731_v9, %v1127_v46  ;;  %v1129_v48 = vpop.f32.mrb[39].mxu0  ;;  %v1325_v49 = vmax.f32 %v1125_v44, 0.0 }
 0x166   : > { %v1326_v50 = vmax.f32 %v1128_v47, 0.0 }
 0x168   : > { %v11822_v51 = vpack.c.bf16 %v1326_v50, %v1325_v49 }
 0x169   : > { %v1132_v52 = vpop.f32.mrb[40].mxu0 }
 0x16a   : > { %v1133_v53 = vadd.f32 %v11731_v9, %v1132_v52  ;;  %v1134_v54 = vpop.f32.mrb[41].mxu0  ;;  %1854 = vmatpush1.bf16.msra.mxu1 %v11822_v51  ;;  %2825 = vmatpush1.bf16.msra.mxu0 %v11822_v51 }
 0x16b   : > { %v1135_v56 = vpop.f32.mrb[42].mxu0  ;;  %1855 = vmatprep.subr.bf16.mxu1 %v11508_v1  ;;  %2826 = vmatprep.subr.bf16.mxu0 %v11508_v1  ;;  %v10810_v54 = vld [vmem:[%s13846_s1] ss:$16 sps:$4 sm:$0xff]  }
 0x16c   : > { %v1136_v57 = vadd.f32 %v11731_v9, %v1135_v56  ;;  %v1137_v58 = vpop.f32.mrb[43].mxu0  ;;  %v1327_v59 = vmax.f32 %v1133_v53, 0.0  ;;  %v10813_v56 = vld [vmem:[%s13846_s1 + $0x240] ss:$16 sps:$4 sm:$0xff]  }
 0x16d   : > { %v10816_v58 = vld [vmem:[%s13846_s1 + $0x24] ss:$16 sps:$4 sm:$0xff]  }
 0x16e   : > { %v1328_v60 = vmax.f32 %v1136_v57, 0.0 }
 0x170   : > { %v11830_v61 = vpack.c.bf16 %v1328_v60, %v1327_v59  ;;  %v10818_v59 = vld [vmem:[%s13846_s1 + $0x264] ss:$16 sps:$4 sm:$0xff]  }
 0x171   : > { %v1140_v62 = vpop.f32.mrb[44].mxu0 }
 0x172   : > { %v1141_v63 = vadd.f32 %v11731_v9, %v1140_v62  ;;  %v1142_v0 = vpop.f32.mrb[45].mxu0  ;;  %1856 = vmatpush1.bf16.msra.mxu1 %v11830_v61  ;;  %2827 = vmatpush1.bf16.msra.mxu0 %v11830_v61 }
 0x173   : > { %v1143_v3 = vpop.f32.mrb[46].mxu0  ;;  %1857 = vmatprep.subr.bf16.mxu1 %v11508_v1  ;;  %2828 = vmatprep.subr.bf16.mxu0 %v11508_v1 }
 0x174   : > { %v1144_v4 = vadd.f32 %v11731_v9, %v1143_v3  ;;  %v1145_v5 = vpop.f32.mrb[47].mxu0  ;;  %v1329_v6 = vmax.f32 %v1141_v63, 0.0 }
 0x176   : > { %v1330_v7 = vmax.f32 %v1144_v4, 0.0 }
 0x178   : > { %v11838_v8 = vpack.c.bf16 %v1330_v7, %v1329_v6  ;;  %v10820_v7 = vld [vmem:[%s13846_s1 + $0x20] ss:$16 sps:$4 sm:$0xff]  }
 0x179   : > { %v1148_v10 = vpop.f32.mrb[48].mxu0 }
 0x17a   : > { %v1149_v11 = vadd.f32 %v11731_v9, %v1148_v10  ;;  %v1150_v13 = vpop.f32.mrb[49].mxu0  ;;  %1858 = vmatpush1.bf16.msra.mxu1 %v11838_v8  ;;  %2829 = vmatpush1.bf16.msra.mxu0 %v11838_v8  ;;  %v10821_v10 = vld [vmem:[%s13846_s1 + $0x260] ss:$16 sps:$4 sm:$0xff]  }
 0x17b   : > { %v1151_v14 = vpop.f32.mrb[50].mxu0  ;;  %1859 = vmatprep.subr.bf16.mxu1 %v11508_v1  ;;  %2830 = vmatprep.subr.bf16.mxu0 %v11508_v1  ;;  %v10822_v13 = vld [vmem:[%s13846_s1 + $0x44] ss:$16 sps:$4 sm:$0xff]  }
 0x17c   : > { %v1152_v15 = vadd.f32 %v11731_v9, %v1151_v14  ;;  %v1153_v16 = vpop.f32.mrb[51].mxu0  ;;  %v1331_v17 = vmax.f32 %v1149_v11, 0.0  ;;  %v10824_v14 = vld [vmem:[%s13846_s1 + $0x284] ss:$16 sps:$4 sm:$0xff]  }
 0x17e   : > { %v1332_v18 = vmax.f32 %v1152_v15, 0.0 }
 0x180   : > { %v11846_v19 = vpack.c.bf16 %v1332_v18, %v1331_v17 }
 0x181   : > { %v1156_v20 = vpop.f32.mrb[52].mxu0 }
 0x182   : > { %v1157_v23 = vadd.f32 %v11731_v9, %v1156_v20  ;;  %v1158_v24 = vpop.f32.mrb[53].mxu0  ;;  %1860 = vmatpush1.bf16.msra.mxu1 %v11846_v19  ;;  %2831 = vmatpush1.bf16.msra.mxu0 %v11846_v19 }
 0x183   : > { %v1159_v25 = vpop.f32.mrb[54].mxu0  ;;  %1861 = vmatprep.subr.bf16.mxu1 %v11508_v1  ;;  %2832 = vmatprep.subr.bf16.mxu0 %v11508_v1 }
 0x184   : > { %v1160_v26 = vadd.f32 %v11731_v9, %v1159_v25  ;;  %v1161_v27 = vpop.f32.mrb[55].mxu0  ;;  %v1333_v28 = vmax.f32 %v1157_v23, 0.0 }
 0x185   : > { %v10827_v27 = vld [vmem:[%s13846_s1 + $0x280] ss:$16 sps:$4 sm:$0xff]  }
 0x186   : > { %v1334_v29 = vmax.f32 %v1160_v26, 0.0  ;;  %v10826_v26 = vld [vmem:[%s13846_s1 + $0x40] ss:$16 sps:$4 sm:$0xff]  }
 0x188   : > { %v11854_v30 = vpack.c.bf16 %v1334_v29, %v1333_v28  ;;  %v10828_v29 = vld [vmem:[%s13846_s1 + $0x64] ss:$16 sps:$4 sm:$0xff]  }
 0x189   : > { %v1164_v33 = vpop.f32.mrb[56].mxu0 }
 0x18a   : > { %v1165_v34 = vadd.f32 %v11731_v9, %v1164_v33  ;;  %v1166_v35 = vpop.f32.mrb[57].mxu0  ;;  %1862 = vmatpush1.bf16.msra.mxu1 %v11854_v30  ;;  %2833 = vmatpush1.bf16.msra.mxu0 %v11854_v30  ;;  %v10830_v33 = vld [vmem:[%s13846_s1 + $0x2a4] ss:$16 sps:$4 sm:$0xff]  }
 0x18b   : > { %v1167_v36 = vpop.f32.mrb[58].mxu0  ;;  %1863 = vmatprep.subr.bf16.mxu1 %v11508_v1  ;;  %2834 = vmatprep.subr.bf16.mxu0 %v11508_v1 }
 0x18c   : > { %v1168_v37 = vadd.f32 %v11731_v9, %v1167_v36  ;;  %v1169_v38 = vpop.f32.mrb[59].mxu0  ;;  %v1335_v39 = vmax.f32 %v1165_v34, 0.0 }
 0x18e   : > { %v1336_v40 = vmax.f32 %v1168_v37, 0.0 }
 0x190   : > { %v11862_v42 = vpack.c.bf16 %v1336_v40, %v1335_v39 }
 0x191   : > { %v1172_v44 = vpop.f32.mrb[60].mxu0 }
 0x192   : > { %v1173_v45 = vadd.f32 %v11731_v9, %v1172_v44  ;;  %v1174_v46 = vpop.f32.mrb[61].mxu0  ;;  %1864 = vmatpush1.bf16.msra.mxu1 %v11862_v42  ;;  %2835 = vmatpush1.bf16.msra.mxu0 %v11862_v42 }
 0x193   : > { %v1175_v47 = vpop.f32.mrb[62].mxu0  ;;  %1865 = vmatprep.subr.bf16.mxu1 %v11508_v1  ;;  %2836 = vmatprep.subr.bf16.mxu0 %v11508_v1  ;;  %v10833_v46 = vld [vmem:[%s13846_s1 + $0x2a0] ss:$16 sps:$4 sm:$0xff]  }
 0x194   : > { %v1176_v48 = vadd.f32 %v11731_v9, %v1175_v47  ;;  %v1177_v49 = vpop.f32.mrb[63].mxu0  ;;  %v1337_v50 = vmax.f32 %v1173_v45, 0.0  ;;  %v10832_v45 = vld [vmem:[%s13846_s1 + $0x60] ss:$16 sps:$4 sm:$0xff]  }
 0x195   : > { %v10836_v49 = vld [vmem:[%s13846_s1 + $0x2c4] ss:$16 sps:$4 sm:$0xff]  }
 0x196   : > { %v1338_v52 = vmax.f32 %v1176_v48, 0.0  ;;  %v10834_v48 = vld [vmem:[%s13846_s1 + $0x84] ss:$16 sps:$4 sm:$0xff]  }
 0x198   : > { %v11870_v53 = vpack.c.bf16 %v1338_v52, %v1337_v50 }
 0x199   : > { %v1180_v57 = vpop.f32.mrb[64].mxu0 }
 0x19a   : > { %1866 = vmatpush1.bf16.msra.mxu1 %v11870_v53  ;;  %2837 = vmatpush1.bf16.msra.mxu0 %v11870_v53  ;;  %v1181_v60 = vadd.f32 %v11731_v9, %v1180_v57  ;;  %v1182_v62 = vpop.f32.mrb[65].mxu0 }
 0x19b   : > { %v1183_v63 = vpop.f32.mrb[66].mxu0  ;;  %2012 = vmatprep.subr.bf16.mxu1 %v11508_v1  ;;  %2983 = vmatprep.subr.bf16.mxu0 %v11508_v1  ;;  %v10838_v62 = vld [vmem:[%s13846_s1 + $0x80] ss:$16 sps:$4 sm:$0xff]  }
 0x19c   : > { %v1339_v0 = vmax.f32 %v1181_v60, 0.0  ;;  %v1184_v3 = vadd.f32 %v11731_v9, %v1183_v63  ;;  %v1185_v4 = vpop.f32.mrb[67].mxu0  ;;  %v10839_v63 = vld [vmem:[%s13846_s1 + $0x2c0] ss:$16 sps:$4 sm:$0xff]  }
 0x19d   : > { %1868 = vmatmul.mubr.bf16.vlgmr.msra.gmra.mrb[0].mxu1 %v10810_v54  ;;  %2839 = vmatmul.mubr.bf16.vlgmr.msra.gmra.mrb[128].mxu0 %v10813_v56  ;;  %v10842_v4 = vld [vmem:[%s13846_s1 + $0x2e4] ss:$16 sps:$4 sm:$0xff]  }
 0x19e   : > { %1875 = vmatprep.mubr.bf16.mxu1 %v10816_v58  ;;  %2846 = vmatprep.mubr.bf16.mxu0 %v10818_v59  ;;  %v1340_v5 = vmax.f32 %v1184_v3, 0.0  ;;  %v10840_v3 = vld [vmem:[%s13846_s1 + $0xa4] ss:$16 sps:$4 sm:$0xff]  }
 0x1a0   : > { %v11890_v6 = vpack.c.bf16 %v1340_v5, %v1339_v0 }
 0x1a1   : > { %v1188_v11 = vpop.f32.mrb[68].mxu0 }
 0x1a2   : > { %v1189_v15 = vadd.f32 %v11731_v9, %v1188_v11  ;;  %v1190_v16 = vpop.f32.mrb[69].mxu0  ;;  %2013 = vmatpush1.bf16.msra.mxu1 %v11890_v6  ;;  %2984 = vmatpush1.bf16.msra.mxu0 %v11890_v6 }
 0x1a3   : > { %v1191_v17 = vpop.f32.mrb[70].mxu0  ;;  %2014 = vmatprep.subr.bf16.mxu1 %v11508_v1  ;;  %2985 = vmatprep.subr.bf16.mxu0 %v11508_v1 }
 0x1a4   : > { %v1341_v18 = vmax.f32 %v1189_v15, 0.0  ;;  %v1192_v20 = vadd.f32 %v11731_v9, %v1191_v17  ;;  %v1193_v23 = vpop.f32.mrb[71].mxu0  ;;  %v10844_v17 = vld [vmem:[%s13846_s1 + $0xa0] ss:$16 sps:$4 sm:$0xff]  }
 0x1a5   : > { %1876 = vmatmul.mubr.bf16.gmra.mrb[4].mxu1 %v10820_v7  ;;  %2847 = vmatmul.mubr.bf16.gmra.mrb[132].mxu0 %v10821_v10  ;;  %v10846_v23 = vld [vmem:[%s13846_s1 + $0xc4] ss:$16 sps:$4 sm:$0xff]  }
 0x1a6   : > { %1883 = vmatprep.mubr.bf16.mxu1 %v10822_v13  ;;  %2854 = vmatprep.mubr.bf16.mxu0 %v10824_v14  ;;  %v1342_v24 = vmax.f32 %v1192_v20, 0.0 }
 0x1a8   : > { %v11910_v25 = vpack.c.bf16 %v1342_v24, %v1341_v18  ;;  %v10845_v18 = vld [vmem:[%s13846_s1 + $0x2e0] ss:$16 sps:$4 sm:$0xff]   ;;  %v10848_v24 = vld [vmem:[%s13846_s1 + $0x304] ss:$16 sps:$4 sm:$0xff]  }
 0x1a9   : > { %v1196_v28 = vpop.f32.mrb[72].mxu0 }
 0x1aa   : > { %v1197_v34 = vadd.f32 %v11731_v9, %v1196_v28  ;;  %v1198_v35 = vpop.f32.mrb[73].mxu0  ;;  %2015 = vmatpush1.bf16.msra.mxu1 %v11910_v25  ;;  %2986 = vmatpush1.bf16.msra.mxu0 %v11910_v25 }
 0x1ab   : > { %v1199_v36 = vpop.f32.mrb[74].mxu0  ;;  %2016 = vmatprep.subr.bf16.mxu1 %v11508_v1  ;;  %2987 = vmatprep.subr.bf16.mxu0 %v11508_v1 }
 0x1ac   : > { %v1343_v37 = vmax.f32 %v1197_v34, 0.0  ;;  %v1200_v38 = vadd.f32 %v11731_v9, %v1199_v36  ;;  %v1201_v39 = vpop.f32.mrb[75].mxu0 }
 0x1ad   : > { %1884 = vmatmul.mubr.bf16.gmra.mrb[8].mxu1 %v10826_v26  ;;  %2855 = vmatmul.mubr.bf16.gmra.mrb[136].mxu0 %v10827_v27 }
 0x1ae   : > { %1891 = vmatprep.mubr.bf16.mxu1 %v10828_v29  ;;  %2862 = vmatprep.mubr.bf16.mxu0 %v10830_v33  ;;  %v1344_v40 = vmax.f32 %v1200_v38, 0.0  ;;  %v10851_v38 = vld [vmem:[%s13846_s1 + $0x300] ss:$16 sps:$4 sm:$0xff]  }
 0x1b0   : > { %v11930_v44 = vpack.c.bf16 %v1344_v40, %v1343_v37  ;;  %v10850_v37 = vld [vmem:[%s13846_s1 + $0xc0] ss:$16 sps:$4 sm:$0xff]   ;;  %v10852_v40 = vld [vmem:[%s13846_s1 + $0xe4] ss:$16 sps:$4 sm:$0xff]  }
 0x1b1   : > { %v1204_v47 = vpop.f32.mrb[76].mxu0 }
 0x1b2   : > { %v1205_v50 = vadd.f32 %v11731_v9, %v1204_v47  ;;  %v1206_v52 = vpop.f32.mrb[77].mxu0  ;;  %2017 = vmatpush1.bf16.msra.mxu1 %v11930_v44  ;;  %2988 = vmatpush1.bf16.msra.mxu0 %v11930_v44 }
 0x1b3   : > { %v1207_v54 = vpop.f32.mrb[78].mxu0  ;;  %2018 = vmatprep.subr.bf16.mxu1 %v11508_v1  ;;  %2989 = vmatprep.subr.bf16.mxu0 %v11508_v1 }
 0x1b4   : > { %v1345_v56 = vmax.f32 %v1205_v50, 0.0  ;;  %v1208_v57 = vadd.f32 %v11731_v9, %v1207_v54  ;;  %v1209_v58 = vpop.f32.mrb[79].mxu0 }
 0x1b5   : > { %1892 = vmatmul.mubr.bf16.gmra.mrb[12].mxu1 %v10832_v45  ;;  %2863 = vmatmul.mubr.bf16.gmra.mrb[140].mxu0 %v10833_v46  ;;  %v10854_v45 = vld [vmem:[%s13846_s1 + $0x324] ss:$16 sps:$4 sm:$0xff]   ;;  %v10857_v58 = vld [vmem:[%s13846_s1 + $0x320] ss:$16 sps:$4 sm:$0xff]  }
 0x1b6   : > { %1899 = vmatprep.mubr.bf16.mxu1 %v10834_v48  ;;  %2870 = vmatprep.mubr.bf16.mxu0 %v10836_v49  ;;  %v1346_v59 = vmax.f32 %v1208_v57, 0.0  ;;  %v10856_v57 = vld [vmem:[%s13846_s1 + $0xe0] ss:$16 sps:$4 sm:$0xff]  }
 0x1b8   : > { %v11950_v60 = vpack.c.bf16 %v1346_v59, %v1345_v56 }
 0x1b9   : > { %v1212_v0 = vpop.f32.mrb[80].mxu0 }
 0x1ba   : > { %v1213_v5 = vadd.f32 %v11731_v9, %v1212_v0  ;;  %v1214_v7 = vpop.f32.mrb[81].mxu0  ;;  %2019 = vmatpush1.bf16.msra.mxu1 %v11950_v60  ;;  %2990 = vmatpush1.bf16.msra.mxu0 %v11950_v60 }
 0x1bb   : > { %v1215_v10 = vpop.f32.mrb[82].mxu0  ;;  %2020 = vmatprep.subr.bf16.mxu1 %v11508_v1  ;;  %2991 = vmatprep.subr.bf16.mxu0 %v11508_v1 }
 0x1bc   : > { %v1347_v11 = vmax.f32 %v1213_v5, 0.0  ;;  %v1216_v13 = vadd.f32 %v11731_v9, %v1215_v10  ;;  %v1217_v14 = vpop.f32.mrb[83].mxu0 }
 0x1bd   : > { %1900 = vmatmul.mubr.bf16.gmra.mrb[16].mxu1 %v10838_v62  ;;  %2871 = vmatmul.mubr.bf16.gmra.mrb[144].mxu0 %v10839_v63  ;;  %v10858_v62 = vld [vmem:[%s13846_s1 + $0x104] ss:$16 sps:$4 sm:$0xff]   ;;  %v10862_v14 = vld [vmem:[%s13846_s1 + $0x100] ss:$16 sps:$4 sm:$0xff]  }
 0x1be   : > { %1907 = vmatprep.mubr.bf16.mxu1 %v10840_v3  ;;  %2878 = vmatprep.mubr.bf16.mxu0 %v10842_v4  ;;  %v1348_v15 = vmax.f32 %v1216_v13, 0.0  ;;  %v10860_v63 = vld [vmem:[%s13846_s1 + $0x344] ss:$16 sps:$4 sm:$0xff]  }
 0x1c0   : > { %v11970_v16 = vpack.c.bf16 %v1348_v15, %v1347_v11  ;;  %v10863_v15 = vld [vmem:[%s13846_s1 + $0x340] ss:$16 sps:$4 sm:$0xff]  }
 0x1c1   : > { %v1220_v20 = vpop.f32.mrb[84].mxu0 }
 0x1c2   : > { %v1221_v26 = vadd.f32 %v11731_v9, %v1220_v20  ;;  %v1222_v27 = vpop.f32.mrb[85].mxu0  ;;  %2021 = vmatpush1.bf16.msra.mxu1 %v11970_v16  ;;  %2992 = vmatpush1.bf16.msra.mxu0 %v11970_v16  ;;  %v10866_v20 = vld [vmem:[%s13846_s1 + $0x364] ss:$16 sps:$4 sm:$0xff]  }
 0x1c3   : > { %v1223_v28 = vpop.f32.mrb[86].mxu0  ;;  %2022 = vmatprep.subr.bf16.mxu1 %v11508_v1  ;;  %2993 = vmatprep.subr.bf16.mxu0 %v11508_v1 }
 0x1c4   : > { %v1349_v29 = vmax.f32 %v1221_v26, 0.0  ;;  %v1224_v33 = vadd.f32 %v11731_v9, %v1223_v28  ;;  %v1225_v34 = vpop.f32.mrb[87].mxu0 }
 0x1c5   : > { %1908 = vmatmul.mubr.bf16.gmra.mrb[20].mxu1 %v10844_v17  ;;  %2879 = vmatmul.mubr.bf16.gmra.mrb[148].mxu0 %v10845_v18  ;;  %v10864_v18 = vld [vmem:[%s13846_s1 + $0x124] ss:$16 sps:$4 sm:$0xff]  }
 0x1c6   : > { %1915 = vmatprep.mubr.bf16.mxu1 %v10846_v23  ;;  %2886 = vmatprep.mubr.bf16.mxu0 %v10848_v24  ;;  %v1350_v35 = vmax.f32 %v1224_v33, 0.0 }
 0x1c8   : > { %v11990_v36 = vpack.c.bf16 %v1350_v35, %v1349_v29  ;;  %v10868_v35 = vld [vmem:[%s13846_s1 + $0x120] ss:$16 sps:$4 sm:$0xff]  }
 0x1c9   : > { %v1228_v39 = vpop.f32.mrb[88].mxu0 }
 0x1ca   : > { %v1229_v46 = vadd.f32 %v11731_v9, %v1228_v39  ;;  %v1230_v47 = vpop.f32.mrb[89].mxu0  ;;  %2023 = vmatpush1.bf16.msra.mxu1 %v11990_v36  ;;  %2994 = vmatpush1.bf16.msra.mxu0 %v11990_v36  ;;  %v10872_v39 = vld [vmem:[%s13846_s1 + $0x384] ss:$16 sps:$4 sm:$0xff]  }
 0x1cb   : > { %v1231_v48 = vpop.f32.mrb[90].mxu0  ;;  %2024 = vmatprep.subr.bf16.mxu1 %v11508_v1  ;;  %2995 = vmatprep.subr.bf16.mxu0 %v11508_v1 }
 0x1cc   : > { %v1351_v49 = vmax.f32 %v1229_v46, 0.0  ;;  %v1232_v50 = vadd.f32 %v11731_v9, %v1231_v48  ;;  %v1233_v52 = vpop.f32.mrb[91].mxu0 }
 0x1cd   : > { %1916 = vmatmul.mubr.bf16.gmra.mrb[24].mxu1 %v10850_v37  ;;  %2887 = vmatmul.mubr.bf16.gmra.mrb[152].mxu0 %v10851_v38  ;;  %v10869_v37 = vld [vmem:[%s13846_s1 + $0x360] ss:$16 sps:$4 sm:$0xff]  }
 0x1ce   : > { %1923 = vmatprep.mubr.bf16.mxu1 %v10852_v40  ;;  %2894 = vmatprep.mubr.bf16.mxu0 %v10854_v45  ;;  %v1352_v54 = vmax.f32 %v1232_v50, 0.0  ;;  %v12067_v40 = vld [vmem:[%s13848_s3] ss:$0 sm:$0xff] }
 0x1d0   : > { %v12010_v56 = vpack.c.bf16 %v1352_v54, %v1351_v49 }
 0x1d1   : > { %v1236_v59 = vpop.f32.mrb[92].mxu0 }
 0x1d2   : > { %v1237_v0 = vadd.f32 %v11731_v9, %v1236_v59  ;;  %v1238_v3 = vpop.f32.mrb[93].mxu0  ;;  %2025 = vmatpush1.bf16.msra.mxu1 %v12010_v56  ;;  %2996 = vmatpush1.bf16.msra.mxu0 %v12010_v56 }
 0x1d3   : > { %v1239_v4 = vpop.f32.mrb[94].mxu0  ;;  %2026 = vmatprep.subr.bf16.mxu1 %v11508_v1  ;;  %2997 = vmatprep.subr.bf16.mxu0 %v11508_v1 }
 0x1d4   : > { %v1353_v5 = vmax.f32 %v1237_v0, 0.0  ;;  %v1240_v7 = vadd.f32 %v11731_v9, %v1239_v4  ;;  %v1241_v10 = vpop.f32.mrb[95].mxu0 }
 0x1d5   : > { %1924 = vmatmul.mubr.bf16.gmra.mrb[28].mxu1 %v10856_v57  ;;  %2895 = vmatmul.mubr.bf16.gmra.mrb[156].mxu0 %v10857_v58  ;;  %v10874_v57 = vld [vmem:[%s13846_s1 + $0x140] ss:$16 sps:$4 sm:$0xff]  }
 0x1d6   : > { %1931 = vmatprep.mubr.bf16.mxu1 %v10858_v62  ;;  %2902 = vmatprep.mubr.bf16.mxu0 %v10860_v63  ;;  %v1354_v11 = vmax.f32 %v1240_v7, 0.0  ;;  %v10875_v58 = vld [vmem:[%s13846_s1 + $0x380] ss:$16 sps:$4 sm:$0xff]   ;;  %v10876_v62 = vld [vmem:[%s13846_s1 + $0x164] ss:$16 sps:$4 sm:$0xff]  }
 0x1d7   : > { %v10878_v63 = vld [vmem:[%s13846_s1 + $0x3a4] ss:$16 sps:$4 sm:$0xff]  }
 0x1d8   : > { %v12030_v13 = vpack.c.bf16 %v1354_v11, %v1353_v5 }
 0x1d9   : > { %v1244_v17 = vpop.f32.mrb[96].mxu0 }
 0x1da   : > { %v1245_v23 = vadd.f32 %v11731_v9, %v1244_v17  ;;  %v1246_v24 = vpop.f32.mrb[97].mxu0  ;;  %2027 = vmatpush1.bf16.msra.mxu1 %v12030_v13  ;;  %2998 = vmatpush1.bf16.msra.mxu0 %v12030_v13  ;;  %v10881_v17 = vld [vmem:[%s13846_s1 + $0x3a0] ss:$16 sps:$4 sm:$0xff]  }
 0x1db   : > { %v1247_v26 = vpop.f32.mrb[98].mxu0  ;;  %2028 = vmatprep.subr.bf16.mxu1 %v11508_v1  ;;  %2999 = vmatprep.subr.bf16.mxu0 %v11508_v1 }
 0x1dc   : > { %v1355_v27 = vmax.f32 %v1245_v23, 0.0  ;;  %v1248_v28 = vadd.f32 %v11731_v9, %v1247_v26  ;;  %v1249_v29 = vpop.f32.mrb[99].mxu0  ;;  %v10870_v9 = vld [vmem:[%s13846_s1 + $0x144] ss:$16 sps:$4 sm:$0xff]  }
 0x1dd   : > { %1932 = vmatmul.mubr.bf16.gmra.mrb[32].mxu1 %v10862_v14  ;;  %2903 = vmatmul.mubr.bf16.gmra.mrb[160].mxu0 %v10863_v15  ;;  %v10880_v15 = vld [vmem:[%s13846_s1 + $0x160] ss:$16 sps:$4 sm:$0xff]   ;;  %v10884_v23 = vld [vmem:[%s13846_s1 + $0x3c4] ss:$16 sps:$4 sm:$0xff]  }
 0x1de   : > { %1939 = vmatprep.mubr.bf16.mxu1 %v10864_v18  ;;  %2910 = vmatprep.mubr.bf16.mxu0 %v10866_v20  ;;  %v1356_v33 = vmax.f32 %v1248_v28, 0.0  ;;  %v10882_v20 = vld [vmem:[%s13846_s1 + $0x184] ss:$16 sps:$4 sm:$0xff]  }
 0x1e0   : > { %v12050_v34 = vpack.c.bf16 %v1356_v33, %v1355_v27 }
 0x1e1   : > { %v1252_v38 = vpop.f32.mrb[100].mxu0 }
 0x1e2   : > { %v1253_v45 = vadd.f32 %v12067_v40, %v1252_v38  ;;  %v1254_v46 = vpop.f32.mrb[101].mxu0  ;;  %2029 = vmatpush1.bf16.msra.mxu1 %v12050_v34  ;;  %3000 = vmatpush1.bf16.msra.mxu0 %v12050_v34  ;;  %v10886_v38 = vld [vmem:[%s13846_s1 + $0x180] ss:$16 sps:$4 sm:$0xff]  }
 0x1e3   : > { %v1255_v47 = vpop.f32.mrb[102].mxu0  ;;  %2030 = vmatprep.subr.bf16.mxu1 %v11508_v1  ;;  %3001 = vmatprep.subr.bf16.mxu0 %v11508_v1  ;;  %v10890_v46 = vld [vmem:[%s13846_s1 + $0x3e4] ss:$16 sps:$4 sm:$0xff]  }
 0x1e4   : > { %v1357_v48 = vmax.f32 %v1253_v45, 0.0  ;;  %v1256_v49 = vadd.f32 %v12067_v40, %v1255_v47  ;;  %v1257_v50 = vpop.f32.mrb[103].mxu0  ;;  %v10888_v45 = vld [vmem:[%s13846_s1 + $0x1a4] ss:$16 sps:$4 sm:$0xff]  }
 0x1e5   : > { %1940 = vmatmul.mubr.bf16.gmra.mrb[36].mxu1 %v10868_v35  ;;  %2911 = vmatmul.mubr.bf16.gmra.mrb[164].mxu0 %v10869_v37 }
 0x1e6   : > { %1947 = vmatprep.mubr.bf16.mxu1 %v10870_v9  ;;  %2918 = vmatprep.mubr.bf16.mxu0 %v10872_v39  ;;  %v1358_v52 = vmax.f32 %v1256_v49, 0.0  ;;  %v10887_v9 = vld [vmem:[%s13846_s1 + $0x3c0] ss:$16 sps:$4 sm:$0xff]  }
 0x1e8   : > { %v12075_v54 = vpack.c.bf16 %v1358_v52, %v1357_v48 }
 0x1e9   : > { %v1260_v59 = vpop.f32.mrb[104].mxu0 }
 0x1ea   : > { %v1261_v0 = vadd.f32 %v12067_v40, %v1260_v59  ;;  %v1262_v3 = vpop.f32.mrb[105].mxu0  ;;  %2031 = vmatpush1.bf16.msra.mxu1 %v12075_v54  ;;  %3002 = vmatpush1.bf16.msra.mxu0 %v12075_v54 }
 0x1eb   : > { %v1263_v4 = vpop.f32.mrb[106].mxu0  ;;  %2032 = vmatprep.subr.bf16.mxu1 %v11508_v1  ;;  %3003 = vmatprep.subr.bf16.mxu0 %v11508_v1  ;;  %v10894_v3 = vld [vmem:[%s13846_s1 + $0x1c4] ss:$16 sps:$4 sm:$0xff]  }
 0x1ec   : > { %v1359_v5 = vmax.f32 %v1261_v0, 0.0  ;;  %v1264_v7 = vadd.f32 %v12067_v40, %v1263_v4  ;;  %v1265_v10 = vpop.f32.mrb[107].mxu0  ;;  %v10896_v4 = vld [vmem:[%s13846_s1 + $0x404] ss:$16 sps:$4 sm:$0xff]  }
 0x1ed   : > { %1948 = vmatmul.mubr.bf16.gmra.mrb[40].mxu1 %v10874_v57  ;;  %2919 = vmatmul.mubr.bf16.gmra.mrb[168].mxu0 %v10875_v58 }
 0x1ee   : > { %1955 = vmatprep.mubr.bf16.mxu1 %v10876_v62  ;;  %2926 = vmatprep.mubr.bf16.mxu0 %v10878_v63  ;;  %v1360_v11 = vmax.f32 %v1264_v7, 0.0  ;;  %v10892_v62 = vld [vmem:[%s13846_s1 + $0x1a0] ss:$16 sps:$4 sm:$0xff]  }
 0x1ef   : > { %v10893_v63 = vld [vmem:[%s13846_s1 + $0x3e0] ss:$16 sps:$4 sm:$0xff]  }
 0x1f0   : > { %v12095_v14 = vpack.c.bf16 %v1360_v11, %v1359_v5 }
 0x1f1   : > { %v1268_v18 = vpop.f32.mrb[108].mxu0 }
 0x1f2   : > { %v1269_v24 = vadd.f32 %v12067_v40, %v1268_v18  ;;  %v1270_v26 = vpop.f32.mrb[109].mxu0  ;;  %2033 = vmatpush1.bf16.msra.mxu1 %v12095_v14  ;;  %3004 = vmatpush1.bf16.msra.mxu0 %v12095_v14 }
 0x1f3   : > { %v1271_v27 = vpop.f32.mrb[110].mxu0  ;;  %2034 = vmatprep.subr.bf16.mxu1 %v11508_v1  ;;  %3005 = vmatprep.subr.bf16.mxu0 %v11508_v1 }
 0x1f4   : > { %v1361_v28 = vmax.f32 %v1269_v24, 0.0  ;;  %v1272_v29 = vadd.f32 %v12067_v40, %v1271_v27  ;;  %v1273_v33 = vpop.f32.mrb[111].mxu0  ;;  %v10899_v24 = vld [vmem:[%s13846_s1 + $0x400] ss:$16 sps:$4 sm:$0xff]   ;;  %v10900_v27 = vld [vmem:[%s13846_s1 + $0x1e4] ss:$16 sps:$4 sm:$0xff]  }
 0x1f5   : > { %1956 = vmatmul.mubr.bf16.gmra.mrb[44].mxu1 %v10880_v15  ;;  %2927 = vmatmul.mubr.bf16.gmra.mrb[172].mxu0 %v10881_v17 }
 0x1f6   : > { %1963 = vmatprep.mubr.bf16.mxu1 %v10882_v20  ;;  %2934 = vmatprep.mubr.bf16.mxu0 %v10884_v23  ;;  %v1362_v35 = vmax.f32 %v1272_v29, 0.0  ;;  %v10898_v23 = vld [vmem:[%s13846_s1 + $0x1c0] ss:$16 sps:$4 sm:$0xff]  }
 0x1f8   : > { %v12115_v37 = vpack.c.bf16 %v1362_v35, %v1361_v28  ;;  %v10902_v28 = vld [vmem:[%s13846_s1 + $0x424] ss:$16 sps:$4 sm:$0xff]  }
 0x1f9   : > { %v1276_v39 = vpop.f32.mrb[112].mxu0 }
 0x1fa   : > { %v1277_v47 = vadd.f32 %v12067_v40, %v1276_v39  ;;  %v1278_v48 = vpop.f32.mrb[113].mxu0  ;;  %2035 = vmatpush1.bf16.msra.mxu1 %v12115_v37  ;;  %3006 = vmatpush1.bf16.msra.mxu0 %v12115_v37 }
 0x1fb   : > { %v1279_v49 = vpop.f32.mrb[114].mxu0  ;;  %2036 = vmatprep.subr.bf16.mxu1 %v11508_v1  ;;  %3007 = vmatprep.subr.bf16.mxu0 %v11508_v1  ;;  %v10905_v48 = vld [vmem:[%s13846_s1 + $0x420] ss:$16 sps:$4 sm:$0xff]  }
 0x1fc   : > { %v1363_v50 = vmax.f32 %v1277_v47, 0.0  ;;  %v1280_v52 = vadd.f32 %v12067_v40, %v1279_v49  ;;  %v1281_v57 = vpop.f32.mrb[115].mxu0  ;;  %v10904_v47 = vld [vmem:[%s13846_s1 + $0x1e0] ss:$16 sps:$4 sm:$0xff]  }
 0x1fd   : > { %1964 = vmatmul.mubr.bf16.gmra.mrb[48].mxu1 %v10886_v38  ;;  %2935 = vmatmul.mubr.bf16.gmra.mrb[176].mxu0 %v10887_v9 }
 0x1fe   : > { %1971 = vmatprep.mubr.bf16.mxu1 %v10888_v45  ;;  %2942 = vmatprep.mubr.bf16.mxu0 %v10890_v46  ;;  %v1364_v58 = vmax.f32 %v1280_v52, 0.0  ;;  %v10908_v52 = vld [vmem:[%s13846_s1 + $0x444] ss:$16 sps:$4 sm:$0xff]  }
 0x200   : > { %v12135_v59 = vpack.c.bf16 %v1364_v58, %v1363_v50  ;;  %v10906_v50 = vld [vmem:[%s13846_s1 + $0x204] ss:$16 sps:$4 sm:$0xff]  }
 0x201   : > { %v1284_v0 = vpop.f32.mrb[116].mxu0 }
 0x202   : > { %v1285_v5 = vadd.f32 %v12067_v40, %v1284_v0  ;;  %v1286_v7 = vpop.f32.mrb[117].mxu0  ;;  %2037 = vmatpush1.bf16.msra.mxu1 %v12135_v59  ;;  %3008 = vmatpush1.bf16.msra.mxu0 %v12135_v59 }
 0x203   : > { %v1287_v10 = vpop.f32.mrb[118].mxu0  ;;  %2038 = vmatprep.subr.bf16.mxu1 %v11508_v1  ;;  %3009 = vmatprep.subr.bf16.mxu0 %v11508_v1  ;;  %v10910_v7 = vld [vmem:[%s13846_s1 + $0x200] ss:$16 sps:$4 sm:$0xff]  }
 0x204   : > { %v1365_v11 = vmax.f32 %v1285_v5, 0.0  ;;  %v1288_v15 = vadd.f32 %v12067_v40, %v1287_v10  ;;  %v1289_v17 = vpop.f32.mrb[119].mxu0  ;;  %v10911_v10 = vld [vmem:[%s13846_s1 + $0x440] ss:$16 sps:$4 sm:$0xff]  }
 0x205   : > { %1972 = vmatmul.mubr.bf16.gmra.mrb[52].mxu1 %v10892_v62  ;;  %2943 = vmatmul.mubr.bf16.gmra.mrb[180].mxu0 %v10893_v63  ;;  %v10917_v17 = vld [vmem:[%s13846_s1 + $0x460] ss:$16 sps:$4 sm:$0xff]  }
 0x206   : > { %1979 = vmatprep.mubr.bf16.mxu1 %v10894_v3  ;;  %2950 = vmatprep.mubr.bf16.mxu0 %v10896_v4  ;;  %v1366_v18 = vmax.f32 %v1288_v15, 0.0  ;;  %v10916_v15 = vld [vmem:[%s13846_s1 + $0x220] ss:$16 sps:$4 sm:$0xff]  }
 0x208   : > { %v12155_v20 = vpack.c.bf16 %v1366_v18, %v1365_v11  ;;  %v10914_v11 = vld [vmem:[%s13846_s1 + $0x464] ss:$16 sps:$4 sm:$0xff]   ;;  %v10920_v18 = vld [vmem:[%s13846_s1 + $0xc] ss:$16 sps:$4 sm:$0xff]  }
 0x209   : > { %v1292_v26 = vpop.f32.mrb[120].mxu0 }
 0x20a   : > { %v1293_v29 = vadd.f32 %v12067_v40, %v1292_v26  ;;  %v1294_v33 = vpop.f32.mrb[121].mxu0  ;;  %2039 = vmatpush1.bf16.msra.mxu1 %v12155_v20  ;;  %3010 = vmatpush1.bf16.msra.mxu0 %v12155_v20  ;;  %v10921_v26 = vld [vmem:[%s13846_s1 + $0x248] ss:$16 sps:$4 sm:$0xff]  }
 0x20b   : > { %v1295_v35 = vpop.f32.mrb[122].mxu0  ;;  %2040 = vmatprep.subr.bf16.mxu1 %v11508_v1  ;;  %3011 = vmatprep.subr.bf16.mxu0 %v11508_v1  ;;  %v10929_v33 = vld [vmem:[%s13846_s1 + $0x268] ss:$16 sps:$4 sm:$0xff]  }
 0x20c   : > { %v1367_v38 = vmax.f32 %v1293_v29, 0.0  ;;  %v1296_v9 = vadd.f32 %v12067_v40, %v1295_v35  ;;  %v1297_v39 = vpop.f32.mrb[123].mxu0  ;;  %v10928_v29 = vld [vmem:[%s13846_s1 + $0x28] ss:$16 sps:$4 sm:$0xff]   ;;  %v10932_v35 = vld [vmem:[%s13846_s1 + $0x28c] ss:$16 sps:$4 sm:$0xff]  }
 0x20d   : > { %1980 = vmatmul.mubr.bf16.gmra.mrb[56].mxu1 %v10898_v23  ;;  %2951 = vmatmul.mubr.bf16.gmra.mrb[184].mxu0 %v10899_v24  ;;  %v10923_v23 = vld [vmem:[%s13846_s1 + $0x24c] ss:$16 sps:$4 sm:$0xff]   ;;  %v10918_v24 = vld [vmem:[%s13846_s1 + $0x8] ss:$16 sps:$4 sm:$0xff]  }
 0x20e   : > { %1987 = vmatprep.mubr.bf16.mxu1 %v10900_v27  ;;  %2958 = vmatprep.mubr.bf16.mxu0 %v10902_v28  ;;  %v1368_v45 = vmax.f32 %v1296_v9, 0.0  ;;  %v10924_v27 = vld [vmem:[%s13846_s1 + $0x2c] ss:$16 sps:$4 sm:$0xff]   ;;  %v10941_v39 = vld [vmem:[%s13846_s1 + $0x2a8] ss:$16 sps:$4 sm:$0xff]  }
 0x20f   : > { %v10926_v28 = vld [vmem:[%s13846_s1 + $0x26c] ss:$16 sps:$4 sm:$0xff]  }
 0x210   : > { %v12175_v46 = vpack.c.bf16 %v1368_v45, %v1367_v38  ;;  %v10935_v38 = vld [vmem:[%s13846_s1 + $0x288] ss:$16 sps:$4 sm:$0xff]   ;;  %v10938_v9 = vld [vmem:[%s13846_s1 + $0x2ac] ss:$16 sps:$4 sm:$0xff]  }
 0x211   : > { %v1300_v49 = vpop.f32.mrb[124].mxu0  ;;  %v10944_v45 = vld [vmem:[%s13846_s1 + $0x2cc] ss:$16 sps:$4 sm:$0xff]  }
 0x212   : > { %v1301_v57 = vadd.f32 %v12067_v40, %v1300_v49  ;;  %v1302_v58 = vpop.f32.mrb[125].mxu0  ;;  %2041 = vmatpush1.bf16.msra.mxu1 %v12175_v46  ;;  %3012 = vmatpush1.bf16.msra.mxu0 %v12175_v46  ;;  %v10953_v49 = vld [vmem:[%s13846_s1 + $0x2e8] ss:$16 sps:$4 sm:$0xff]  }
 0x213   : > { %v1303_v62 = vpop.f32.mrb[126].mxu0  ;;  %2042 = vmatprep.subr.bf16.mxu1 %v11508_v1  ;;  %3013 = vmatprep.subr.bf16.mxu0 %v11508_v1  ;;  %v10965_v58 = vld [vmem:[%s13846_s1 + $0x328] ss:$16 sps:$4 sm:$0xff]  }
 0x214   : > { %v1369_v63 = vmax.f32 %v1301_v57, 0.0  ;;  %v1304_v0 = vadd.f32 %v12067_v40, %v1303_v62  ;;  %v1305_v3 = vpop.f32.mrb[127].mxu0  ;;  %v10912_v40 = vld [vmem:[%s13846_s1 + $0x224] ss:$16 sps:$4 sm:$0xff]   ;;  %v10962_v57 = vld [vmem:[%s13846_s1 + $0x32c] ss:$16 sps:$4 sm:$0xff]  }
 0x215   : > { %1988 = vmatmul.mubr.bf16.gmra.mrb[60].mxu1 %v10904_v47  ;;  %2959 = vmatmul.mubr.bf16.gmra.mrb[188].mxu0 %v10905_v48  ;;  %v10947_v47 = vld [vmem:[%s13846_s1 + $0x2c8] ss:$16 sps:$4 sm:$0xff]   ;;  %v10950_v48 = vld [vmem:[%s13846_s1 + $0x2ec] ss:$16 sps:$4 sm:$0xff]  }
 0x216   : > { %1995 = vmatprep.mubr.bf16.mxu1 %v10906_v50  ;;  %2966 = vmatprep.mubr.bf16.mxu0 %v10908_v52  ;;  %v1370_v4 = vmax.f32 %v1304_v0, 0.0  ;;  %v10956_v50 = vld [vmem:[%s13846_s1 + $0x30c] ss:$16 sps:$4 sm:$0xff]   ;;  %v10959_v52 = vld [vmem:[%s13846_s1 + $0x308] ss:$16 sps:$4 sm:$0xff]  }
 0x217   : > { %v10968_v62 = vld [vmem:[%s13846_s1 + $0x34c] ss:$16 sps:$4 sm:$0xff]   ;;  %v10977_v3 = vld [vmem:[%s13846_s1 + $0x368] ss:$16 sps:$4 sm:$0xff]  }
 0x218   : > { %v12195_v5 = vpack.c.bf16 %v1370_v4, %v1369_v63  ;;  %v10971_v63 = vld [vmem:[%s13846_s1 + $0x348] ss:$16 sps:$4 sm:$0xff]   ;;  %v10974_v0 = vld [vmem:[%s13846_s1 + $0x36c] ss:$16 sps:$4 sm:$0xff]  }
 0x219   : > { %v10978_v4 = vld [vmem:[%s13846_s1 + $0x14c] ss:$16 sps:$4 sm:$0xff]  }
 0x21a   : > { %2043 = vmatpush1.bf16.msra.mxu1 %v12195_v5  ;;  %3014 = vmatpush1.bf16.msra.mxu0 %v12195_v5 }
 0x21b   : > { %3777 = vmatprep.subr.bf16.mxu1 %v11508_v1  ;;  %4748 = vmatprep.subr.bf16.mxu0 %v11508_v1 }
 0x21d   : > { %1996 = vmatmul.mubr.bf16.gmra.mrb[64].mxu1 %v10910_v7  ;;  %2967 = vmatmul.mubr.bf16.gmra.mrb[192].mxu0 %v10911_v10  ;;  %v10980_v7 = vld [vmem:[%s13846_s1 + $0x38c] ss:$16 sps:$4 sm:$0xff]   ;;  %v10982_v10 = vld [vmem:[%s13846_s1 + $0x148] ss:$16 sps:$4 sm:$0xff]  }
 0x21e   : > { %2003 = vmatprep.mubr.bf16.mxu1 %v10912_v40  ;;  %2974 = vmatprep.mubr.bf16.mxu0 %v10914_v11  ;;  %v10983_v40 = vld [vmem:[%s13846_s1 + $0x388] ss:$16 sps:$4 sm:$0xff]   ;;  %v10984_v11 = vld [vmem:[%s13846_s1 + $0x16c] ss:$16 sps:$4 sm:$0xff]  }
 0x225   : > { %2004 = vmatmul.mubr.bf16.gmra.mrb[68].mxu1 %v10916_v15  ;;  %2975 = vmatmul.mubr.bf16.gmra.mrb[196].mxu0 %v10917_v17  ;;  %v10986_v15 = vld [vmem:[%s13846_s1 + $0x3ac] ss:$16 sps:$4 sm:$0xff]   ;;  %v10988_v17 = vld [vmem:[%s13846_s1 + $0x168] ss:$16 sps:$4 sm:$0xff]  }
 0x226   : > { %2044 = vmatprep.mubr.bf16.mxu1 %v10920_v18  ;;  %3015 = vmatprep.mubr.bf16.mxu0 %v10923_v23  ;;  %v10989_v18 = vld [vmem:[%s13846_s1 + $0x3a8] ss:$16 sps:$4 sm:$0xff]   ;;  %v10990_v23 = vld [vmem:[%s13846_s1 + $0x18c] ss:$16 sps:$4 sm:$0xff]  }
 0x22d   : > { %2045 = vmatmul.mubr.bf16.vlgmr.msra.gmra.mrb[0].mxu1 %v10918_v24  ;;  %3016 = vmatmul.mubr.bf16.vlgmr.msra.gmra.mrb[128].mxu0 %v10921_v26  ;;  %v10992_v24 = vld [vmem:[%s13846_s1 + $0x3cc] ss:$16 sps:$4 sm:$0xff]   ;;  %v10994_v26 = vld [vmem:[%s13846_s1 + $0x188] ss:$16 sps:$4 sm:$0xff]  }
 0x22e   : > { %3778 = vmatpush1.bf16.msra.mxu1 %v11740_v21  ;;  %4749 = vmatpush1.bf16.msra.mxu0 %v11740_v21  ;;  %v10930_v21 = vld [vmem:[%s13846_s1 + $0x4c] ss:$16 sps:$4 sm:$0xff]  }
 0x22f   : > { %3779 = vmatprep.subr.bf16.mxu1 %v11508_v1  ;;  %4750 = vmatprep.subr.bf16.mxu0 %v11508_v1 }
 0x230   : > { %2052 = vmatprep.mubr.bf16.mxu1 %v10924_v27  ;;  %3023 = vmatprep.mubr.bf16.mxu0 %v10926_v28  ;;  %v10995_v27 = vld [vmem:[%s13846_s1 + $0x3c8] ss:$16 sps:$4 sm:$0xff]   ;;  %v10996_v28 = vld [vmem:[%s13846_s1 + $0x1ac] ss:$16 sps:$4 sm:$0xff]  }
 0x232   : > { %3780 = vmatpush1.bf16.msra.mxu1 %v11750_v32  ;;  %4751 = vmatpush1.bf16.msra.mxu0 %v11750_v32  ;;  %v10934_v32 = vld [vmem:[%s13846_s1 + $0x48] ss:$16 sps:$4 sm:$0xff]  }
 0x233   : > { %3781 = vmatprep.subr.bf16.mxu1 %v11508_v1  ;;  %4752 = vmatprep.subr.bf16.mxu0 %v11508_v1 }
 0x235   : > { %2053 = vmatmul.mubr.bf16.gmra.mrb[4].mxu1 %v10928_v29  ;;  %3024 = vmatmul.mubr.bf16.gmra.mrb[132].mxu0 %v10929_v33  ;;  %v10998_v29 = vld [vmem:[%s13846_s1 + $0x3ec] ss:$16 sps:$4 sm:$0xff]   ;;  %v11000_v33 = vld [vmem:[%s13846_s1 + $0x1a8] ss:$16 sps:$4 sm:$0xff]  }
 0x236   : > { %3782 = vmatpush1.bf16.msra.mxu1 %v11760_v43  ;;  %4753 = vmatpush1.bf16.msra.mxu0 %v11760_v43  ;;  %v10936_v43 = vld [vmem:[%s13846_s1 + $0x6c] ss:$16 sps:$4 sm:$0xff]  }
 0x237   : > { %3783 = vmatprep.subr.bf16.mxu1 %v11508_v1  ;;  %4754 = vmatprep.subr.bf16.mxu0 %v11508_v1 }
 0x238   : > { %2060 = vmatprep.mubr.bf16.mxu1 %v10930_v21  ;;  %3031 = vmatprep.mubr.bf16.mxu0 %v10932_v35  ;;  %v11001_v21 = vld [vmem:[%s13846_s1 + $0x3e8] ss:$16 sps:$4 sm:$0xff]   ;;  %v11002_v35 = vld [vmem:[%s13846_s1 + $0x1cc] ss:$16 sps:$4 sm:$0xff]  }
 0x23a   : > { %3784 = vmatpush1.bf16.msra.mxu1 %v11771_v55  ;;  %4755 = vmatpush1.bf16.msra.mxu0 %v11771_v55  ;;  %v10940_v55 = vld [vmem:[%s13846_s1 + $0x68] ss:$16 sps:$4 sm:$0xff]  }
 0x23b   : > { %3785 = vmatprep.subr.bf16.mxu1 %v11508_v1  ;;  %4756 = vmatprep.subr.bf16.mxu0 %v11508_v1 }
 0x23d   : > { %2061 = vmatmul.mubr.bf16.gmra.mrb[8].mxu1 %v10934_v32  ;;  %3032 = vmatmul.mubr.bf16.gmra.mrb[136].mxu0 %v10935_v38  ;;  %v11004_v32 = vld [vmem:[%s13846_s1 + $0x40c] ss:$16 sps:$4 sm:$0xff]   ;;  %v11006_v38 = vld [vmem:[%s13846_s1 + $0x1c8] ss:$16 sps:$4 sm:$0xff]  }
 0x23e   : > { %3786 = vmatpush1.bf16.msra.mxu1 %v11782_v2  ;;  %4757 = vmatpush1.bf16.msra.mxu0 %v11782_v2  ;;  %v10942_v2 = vld [vmem:[%s13846_s1 + $0x8c] ss:$16 sps:$4 sm:$0xff]  }
 0x23f   : > { %3787 = vmatprep.subr.bf16.mxu1 %v11508_v1  ;;  %4758 = vmatprep.subr.bf16.mxu0 %v11508_v1 }
 0x240   : > { %2068 = vmatprep.mubr.bf16.mxu1 %v10936_v43  ;;  %3039 = vmatprep.mubr.bf16.mxu0 %v10938_v9  ;;  %v11007_v43 = vld [vmem:[%s13846_s1 + $0x408] ss:$16 sps:$4 sm:$0xff]   ;;  %v11008_v9 = vld [vmem:[%s13846_s1 + $0x1ec] ss:$16 sps:$4 sm:$0xff]  }
 0x242   : > { %3788 = vmatpush1.bf16.msra.mxu1 %v11790_v12  ;;  %4759 = vmatpush1.bf16.msra.mxu0 %v11790_v12  ;;  %v10946_v12 = vld [vmem:[%s13846_s1 + $0x88] ss:$16 sps:$4 sm:$0xff]  }
 0x243   : > { %3789 = vmatprep.subr.bf16.mxu1 %v11508_v1  ;;  %4760 = vmatprep.subr.bf16.mxu0 %v11508_v1 }
 0x245   : > { %2069 = vmatmul.mubr.bf16.gmra.mrb[12].mxu1 %v10940_v55  ;;  %3040 = vmatmul.mubr.bf16.gmra.mrb[140].mxu0 %v10941_v39  ;;  %v11010_v55 = vld [vmem:[%s13846_s1 + $0x42c] ss:$16 sps:$4 sm:$0xff]   ;;  %v11012_v39 = vld [vmem:[%s13846_s1 + $0x1e8] ss:$16 sps:$4 sm:$0xff]  }
 0x246   : > { %3790 = vmatpush1.bf16.msra.mxu1 %v11798_v22  ;;  %4761 = vmatpush1.bf16.msra.mxu0 %v11798_v22  ;;  %v10948_v22 = vld [vmem:[%s13846_s1 + $0xac] ss:$16 sps:$4 sm:$0xff]  }
 0x247   : > { %3791 = vmatprep.subr.bf16.mxu1 %v11508_v1  ;;  %4762 = vmatprep.subr.bf16.mxu0 %v11508_v1 }
 0x248   : > { %2076 = vmatprep.mubr.bf16.mxu1 %v10942_v2  ;;  %3047 = vmatprep.mubr.bf16.mxu0 %v10944_v45  ;;  %v11013_v2 = vld [vmem:[%s13846_s1 + $0x428] ss:$16 sps:$4 sm:$0xff]   ;;  %v11014_v45 = vld [vmem:[%s13846_s1 + $0x20c] ss:$16 sps:$4 sm:$0xff]  }
 0x24a   : > { %3792 = vmatpush1.bf16.msra.mxu1 %v11806_v31  ;;  %4763 = vmatpush1.bf16.msra.mxu0 %v11806_v31  ;;  %v10952_v31 = vld [vmem:[%s13846_s1 + $0xa8] ss:$16 sps:$4 sm:$0xff]  }
 0x24b   : > { %3793 = vmatprep.subr.bf16.mxu1 %v11508_v1  ;;  %4764 = vmatprep.subr.bf16.mxu0 %v11508_v1 }
 0x24d   : > { %2077 = vmatmul.mubr.bf16.gmra.mrb[16].mxu1 %v10946_v12  ;;  %3048 = vmatmul.mubr.bf16.gmra.mrb[144].mxu0 %v10947_v47  ;;  %v11016_v12 = vld [vmem:[%s13846_s1 + $0x44c] ss:$16 sps:$4 sm:$0xff]   ;;  %v11018_v47 = vld [vmem:[%s13846_s1 + $0x208] ss:$16 sps:$4 sm:$0xff]  }
 0x24e   : > { %3794 = vmatpush1.bf16.msra.mxu1 %v11814_v41  ;;  %4765 = vmatpush1.bf16.msra.mxu0 %v11814_v41  ;;  %v10954_v41 = vld [vmem:[%s13846_s1 + $0xcc] ss:$16 sps:$4 sm:$0xff]  }
 0x24f   : > { %3795 = vmatprep.subr.bf16.mxu1 %v11508_v1  ;;  %4766 = vmatprep.subr.bf16.mxu0 %v11508_v1 }
 0x250   : > { %2084 = vmatprep.mubr.bf16.mxu1 %v10948_v22  ;;  %3055 = vmatprep.mubr.bf16.mxu0 %v10950_v48  ;;  %v11019_v22 = vld [vmem:[%s13846_s1 + $0x448] ss:$16 sps:$4 sm:$0xff]   ;;  %v11020_v48 = vld [vmem:[%s13846_s1 + $0x22c] ss:$16 sps:$4 sm:$0xff]  }
 0x252   : > { %3796 = vmatpush1.bf16.msra.mxu1 %v11822_v51  ;;  %4767 = vmatpush1.bf16.msra.mxu0 %v11822_v51  ;;  %v10958_v51 = vld [vmem:[%s13846_s1 + $0xc8] ss:$16 sps:$4 sm:$0xff]  }
 0x253   : > { %3797 = vmatprep.subr.bf16.mxu1 %v11508_v1  ;;  %4768 = vmatprep.subr.bf16.mxu0 %v11508_v1 }
 0x255   : > { %2085 = vmatmul.mubr.bf16.gmra.mrb[20].mxu1 %v10952_v31  ;;  %3056 = vmatmul.mubr.bf16.gmra.mrb[148].mxu0 %v10953_v49  ;;  %v11022_v31 = vld [vmem:[%s13846_s1 + $0x46c] ss:$16 sps:$4 sm:$0xff]   ;;  %v11024_v49 = vld [vmem:[%s13846_s1 + $0x228] ss:$16 sps:$4 sm:$0xff]  }
 0x256   : > { %3798 = vmatpush1.bf16.msra.mxu1 %v11830_v61  ;;  %4769 = vmatpush1.bf16.msra.mxu0 %v11830_v61  ;;  %v10960_v61 = vld [vmem:[%s13846_s1 + $0xec] ss:$16 sps:$4 sm:$0xff]  }
 0x257   : > { %3799 = vmatprep.subr.bf16.mxu1 %v11508_v1  ;;  %4770 = vmatprep.subr.bf16.mxu0 %v11508_v1 }
 0x258   : > { %2092 = vmatprep.mubr.bf16.mxu1 %v10954_v41  ;;  %3063 = vmatprep.mubr.bf16.mxu0 %v10956_v50  ;;  %v11025_v41 = vld [vmem:[%s13846_s1 + $0x468] ss:$16 sps:$4 sm:$0xff]   ;;  %v11028_v50 = vld [vmem:[%s13846_s1 + $0x484] ss:$16 sps:$4 sm:$0xff]  }
 0x25a   : > { %3800 = vmatpush1.bf16.msra.mxu1 %v11838_v8  ;;  %4771 = vmatpush1.bf16.msra.mxu0 %v11838_v8  ;;  %v10964_v8 = vld [vmem:[%s13846_s1 + $0xe8] ss:$16 sps:$4 sm:$0xff]  }
 0x25b   : > { %3801 = vmatprep.subr.bf16.mxu1 %v11508_v1  ;;  %4772 = vmatprep.subr.bf16.mxu0 %v11508_v1 }
 0x25d   : > { %2093 = vmatmul.mubr.bf16.gmra.mrb[24].mxu1 %v10958_v51  ;;  %3064 = vmatmul.mubr.bf16.gmra.mrb[152].mxu0 %v10959_v52  ;;  %v11031_v51 = vld [vmem:[%s13846_s1 + $0x6c4] ss:$16 sps:$4 sm:$0xff]   ;;  %v11026_v52 = vld [vmem:[%s13846_s1 + $0x480] ss:$16 sps:$4 sm:$0xff]  }
 0x25e   : > { %3802 = vmatpush1.bf16.msra.mxu1 %v11846_v19  ;;  %4773 = vmatpush1.bf16.msra.mxu0 %v11846_v19  ;;  %v10966_v19 = vld [vmem:[%s13846_s1 + $0x10c] ss:$16 sps:$4 sm:$0xff]  }
 0x25f   : > { %3803 = vmatprep.subr.bf16.mxu1 %v11508_v1  ;;  %4774 = vmatprep.subr.bf16.mxu0 %v11508_v1 }
 0x260   : > { %2100 = vmatprep.mubr.bf16.mxu1 %v10960_v61  ;;  %3071 = vmatprep.mubr.bf16.mxu0 %v10962_v57  ;;  %v11029_v61 = vld [vmem:[%s13846_s1 + $0x6c0] ss:$16 sps:$4 sm:$0xff]   ;;  %v11032_v57 = vld [vmem:[%s13846_s1 + $0x4a4] ss:$16 sps:$4 sm:$0xff]  }
 0x262   : > { %3804 = vmatpush1.bf16.msra.mxu1 %v11854_v30  ;;  %4775 = vmatpush1.bf16.msra.mxu0 %v11854_v30  ;;  %v10970_v30 = vld [vmem:[%s13846_s1 + $0x108] ss:$16 sps:$4 sm:$0xff]  }
 0x263   : > { %3805 = vmatprep.subr.bf16.mxu1 %v11508_v1  ;;  %4776 = vmatprep.subr.bf16.mxu0 %v11508_v1 }
 0x265   : > { %2101 = vmatmul.mubr.bf16.gmra.mrb[28].mxu1 %v10964_v8  ;;  %3072 = vmatmul.mubr.bf16.gmra.mrb[156].mxu0 %v10965_v58  ;;  %v11034_v8 = vld [vmem:[%s13846_s1 + $0x6e4] ss:$16 sps:$4 sm:$0xff]   ;;  %v11036_v58 = vld [vmem:[%s13846_s1 + $0x4a0] ss:$16 sps:$4 sm:$0xff]  }
 0x266   : > { %3806 = vmatpush1.bf16.msra.mxu1 %v11862_v42  ;;  %4777 = vmatpush1.bf16.msra.mxu0 %v11862_v42  ;;  %v10972_v42 = vld [vmem:[%s13846_s1 + $0x12c] ss:$16 sps:$4 sm:$0xff]  }
 0x267   : > { %3807 = vmatprep.subr.bf16.mxu1 %v11508_v1  ;;  %4778 = vmatprep.subr.bf16.mxu0 %v11508_v1 }
 0x268   : > { %2108 = vmatprep.mubr.bf16.mxu1 %v10966_v19  ;;  %3079 = vmatprep.mubr.bf16.mxu0 %v10968_v62  ;;  %v11037_v19 = vld [vmem:[%s13846_s1 + $0x6e0] ss:$16 sps:$4 sm:$0xff]   ;;  %v11040_v62 = vld [vmem:[%s13846_s1 + $0x704] ss:$16 sps:$4 sm:$0xff]  }
 0x26a   : > { %3808 = vmatpush1.bf16.msra.mxu1 %v11870_v53  ;;  %4779 = vmatpush1.bf16.msra.mxu0 %v11870_v53  ;;  %v10976_v53 = vld [vmem:[%s13846_s1 + $0x128] ss:$16 sps:$4 sm:$0xff]  }
 0x26b   : > { %3954 = vmatprep.subr.bf16.mxu1 %v11508_v1  ;;  %4925 = vmatprep.subr.bf16.mxu0 %v11508_v1 }
 0x26d   : > { %2109 = vmatmul.mubr.bf16.gmra.mrb[32].mxu1 %v10970_v30  ;;  %3080 = vmatmul.mubr.bf16.gmra.mrb[160].mxu0 %v10971_v63  ;;  %v11043_v30 = vld [vmem:[%s13846_s1 + $0x700] ss:$16 sps:$4 sm:$0xff]   ;;  %v11046_v63 = vld [vmem:[%s13846_s1 + $0x724] ss:$16 sps:$4 sm:$0xff]  }
 0x26e   : > { %2116 = vmatprep.mubr.bf16.mxu1 %v10972_v42  ;;  %3087 = vmatprep.mubr.bf16.mxu0 %v10974_v0  ;;  %v11049_v42 = vld [vmem:[%s13846_s1 + $0x720] ss:$16 sps:$4 sm:$0xff]   ;;  %v11052_v0 = vld [vmem:[%s13846_s1 + $0x744] ss:$16 sps:$4 sm:$0xff]  }
 0x275   : > { %2117 = vmatmul.mubr.bf16.gmra.mrb[36].mxu1 %v10976_v53  ;;  %3088 = vmatmul.mubr.bf16.gmra.mrb[164].mxu0 %v10977_v3  ;;  %v11055_v53 = vld [vmem:[%s13846_s1 + $0x740] ss:$16 sps:$4 sm:$0xff]   ;;  %v11058_v3 = vld [vmem:[%s13846_s1 + $0x764] ss:$16 sps:$4 sm:$0xff]  }
 0x276   : > { %2124 = vmatprep.mubr.bf16.mxu1 %v10978_v4  ;;  %3095 = vmatprep.mubr.bf16.mxu0 %v10980_v7  ;;  %v11061_v4 = vld [vmem:[%s13846_s1 + $0x760] ss:$16 sps:$4 sm:$0xff]   ;;  %v11064_v7 = vld [vmem:[%s13846_s1 + $0x784] ss:$16 sps:$4 sm:$0xff]  }
 0x27d   : > { %2125 = vmatmul.mubr.bf16.gmra.mrb[40].mxu1 %v10982_v10  ;;  %3096 = vmatmul.mubr.bf16.gmra.mrb[168].mxu0 %v10983_v40  ;;  %v11067_v10 = vld [vmem:[%s13846_s1 + $0x780] ss:$16 sps:$4 sm:$0xff]   ;;  %v11070_v40 = vld [vmem:[%s13846_s1 + $0x7a4] ss:$16 sps:$4 sm:$0xff]  }
 0x27e   : > { %2132 = vmatprep.mubr.bf16.mxu1 %v10984_v11  ;;  %3103 = vmatprep.mubr.bf16.mxu0 %v10986_v15  ;;  %v11073_v11 = vld [vmem:[%s13846_s1 + $0x7a0] ss:$16 sps:$4 sm:$0xff]   ;;  %v11076_v15 = vld [vmem:[%s13846_s1 + $0x7c4] ss:$16 sps:$4 sm:$0xff]  }
 0x285   : > { %2133 = vmatmul.mubr.bf16.gmra.mrb[44].mxu1 %v10988_v17  ;;  %3104 = vmatmul.mubr.bf16.gmra.mrb[172].mxu0 %v10989_v18  ;;  %v11079_v17 = vld [vmem:[%s13846_s1 + $0x7c0] ss:$16 sps:$4 sm:$0xff]  }
 0x286   : > { %2140 = vmatprep.mubr.bf16.mxu1 %v10990_v23  ;;  %3111 = vmatprep.mubr.bf16.mxu0 %v10992_v24 }
 0x28d   : > { %2141 = vmatmul.mubr.bf16.gmra.mrb[48].mxu1 %v10994_v26  ;;  %3112 = vmatmul.mubr.bf16.gmra.mrb[176].mxu0 %v10995_v27 }
 0x28e   : > { %2148 = vmatprep.mubr.bf16.mxu1 %v10996_v28  ;;  %3119 = vmatprep.mubr.bf16.mxu0 %v10998_v29  ;;  %v11085_v29 = vld [vmem:[%s13846_s1 + $0x7e0] ss:$16 sps:$4 sm:$0xff]  }
 0x295   : > { %2149 = vmatmul.mubr.bf16.gmra.mrb[52].mxu1 %v11000_v33  ;;  %3120 = vmatmul.mubr.bf16.gmra.mrb[180].mxu0 %v11001_v21 }
 0x296   : > { %2156 = vmatprep.mubr.bf16.mxu1 %v11002_v35  ;;  %3127 = vmatprep.mubr.bf16.mxu0 %v11004_v32  ;;  %v11086_v35 = vld [vmem:[%s13846_s1 + $0x5c4] ss:$16 sps:$4 sm:$0xff]  }
 0x297   : > { %v11088_v32 = vld [vmem:[%s13846_s1 + $0x804] ss:$16 sps:$4 sm:$0xff]  }
 0x29d   : > { %2157 = vmatmul.mubr.bf16.gmra.mrb[56].mxu1 %v11006_v38  ;;  %3128 = vmatmul.mubr.bf16.gmra.mrb[184].mxu0 %v11007_v43 }
 0x29e   : > { %2164 = vmatprep.mubr.bf16.mxu1 %v11008_v9  ;;  %3135 = vmatprep.mubr.bf16.mxu0 %v11010_v55 }
 0x2a5   : > { %2165 = vmatmul.mubr.bf16.gmra.mrb[60].mxu1 %v11012_v39  ;;  %3136 = vmatmul.mubr.bf16.gmra.mrb[188].mxu0 %v11013_v2 }
 0x2a6   : > { %2172 = vmatprep.mubr.bf16.mxu1 %v11014_v45  ;;  %3143 = vmatprep.mubr.bf16.mxu0 %v11016_v12 }
 0x2ad   : > { %2173 = vmatmul.mubr.bf16.gmra.mrb[64].mxu1 %v11018_v47  ;;  %3144 = vmatmul.mubr.bf16.gmra.mrb[192].mxu0 %v11019_v22 }
 0x2ae   : > { %2180 = vmatprep.mubr.bf16.mxu1 %v11020_v48  ;;  %3151 = vmatprep.mubr.bf16.mxu0 %v11022_v31  ;;  %v11090_v48 = vld [vmem:[%s13846_s1 + $0x5c0] ss:$16 sps:$4 sm:$0xff]  }
 0x2af   : > { %v11091_v31 = vld [vmem:[%s13846_s1 + $0x800] ss:$16 sps:$4 sm:$0xff]  }
 0x2b5   : > { %2181 = vmatmul.mubr.bf16.gmra.mrb[68].mxu1 %v11024_v49  ;;  %3152 = vmatmul.mubr.bf16.gmra.mrb[196].mxu0 %v11025_v41 }
 0x2b6   : > { %3809 = vmatprep.mubr.bf16.mxu1 %v11028_v50  ;;  %4780 = vmatprep.mubr.bf16.mxu0 %v11031_v51  ;;  %v11092_v50 = vld [vmem:[%s13846_s1 + $0x5e4] ss:$16 sps:$4 sm:$0xff]  }
 0x2b7   : > { %v11094_v51 = vld [vmem:[%s13846_s1 + $0x824] ss:$16 sps:$4 sm:$0xff]  }
 0x2bd   : > { %3810 = vmatmul.mubr.bf16.vlgmr.msra.gmra.mrb[72].mxu1 %v11026_v52  ;;  %4781 = vmatmul.mubr.bf16.vlgmr.msra.gmra.mrb[200].mxu0 %v11029_v61 }
 0x2be   : > { %3955 = vmatpush1.bf16.msra.mxu1 %v11890_v6  ;;  %4926 = vmatpush1.bf16.msra.mxu0 %v11890_v6  ;;  %v11038_v6 = vld [vmem:[%s13846_s1 + $0x4c4] ss:$16 sps:$4 sm:$0xff]  }
 0x2bf   : > { %3956 = vmatprep.subr.bf16.mxu1 %v11508_v1  ;;  %4927 = vmatprep.subr.bf16.mxu0 %v11508_v1 }
 0x2c0   : > { %3817 = vmatprep.mubr.bf16.mxu1 %v11032_v57  ;;  %4788 = vmatprep.mubr.bf16.mxu0 %v11034_v8 }
 0x2c2   : > { %3957 = vmatpush1.bf16.msra.mxu1 %v11910_v25  ;;  %4928 = vmatpush1.bf16.msra.mxu0 %v11910_v25  ;;  %v11042_v25 = vld [vmem:[%s13846_s1 + $0x4c0] ss:$16 sps:$4 sm:$0xff]  }
 0x2c3   : > { %3958 = vmatprep.subr.bf16.mxu1 %v11508_v1  ;;  %4929 = vmatprep.subr.bf16.mxu0 %v11508_v1 }
 0x2c5   : > { %3818 = vmatmul.mubr.bf16.gmra.mrb[76].mxu1 %v11036_v58  ;;  %4789 = vmatmul.mubr.bf16.gmra.mrb[204].mxu0 %v11037_v19 }
 0x2c6   : > { %3959 = vmatpush1.bf16.msra.mxu1 %v11930_v44  ;;  %4930 = vmatpush1.bf16.msra.mxu0 %v11930_v44  ;;  %v11044_v44 = vld [vmem:[%s13846_s1 + $0x4e4] ss:$16 sps:$4 sm:$0xff]  }
 0x2c7   : > { %3960 = vmatprep.subr.bf16.mxu1 %v11508_v1  ;;  %4931 = vmatprep.subr.bf16.mxu0 %v11508_v1 }
 0x2c8   : > { %3825 = vmatprep.mubr.bf16.mxu1 %v11038_v6  ;;  %4796 = vmatprep.mubr.bf16.mxu0 %v11040_v62 }
 0x2ca   : > { %3961 = vmatpush1.bf16.msra.mxu1 %v11950_v60  ;;  %4932 = vmatpush1.bf16.msra.mxu0 %v11950_v60  ;;  %v11048_v60 = vld [vmem:[%s13846_s1 + $0x4e0] ss:$16 sps:$4 sm:$0xff]  }
 0x2cb   : > { %3962 = vmatprep.subr.bf16.mxu1 %v11508_v1  ;;  %4933 = vmatprep.subr.bf16.mxu0 %v11508_v1 }
 0x2cd   : > { %3826 = vmatmul.mubr.bf16.gmra.mrb[80].mxu1 %v11042_v25  ;;  %4797 = vmatmul.mubr.bf16.gmra.mrb[208].mxu0 %v11043_v30 }
 0x2ce   : > { %3963 = vmatpush1.bf16.msra.mxu1 %v11970_v16  ;;  %4934 = vmatpush1.bf16.msra.mxu0 %v11970_v16  ;;  %v11050_v16 = vld [vmem:[%s13846_s1 + $0x504] ss:$16 sps:$4 sm:$0xff]  }
 0x2cf   : > { %3964 = vmatprep.subr.bf16.mxu1 %v11508_v1  ;;  %4935 = vmatprep.subr.bf16.mxu0 %v11508_v1 }
 0x2d0   : > { %3833 = vmatprep.mubr.bf16.mxu1 %v11044_v44  ;;  %4804 = vmatprep.mubr.bf16.mxu0 %v11046_v63  ;;  %v11096_v44 = vld [vmem:[%s13846_s1 + $0x5e0] ss:$16 sps:$4 sm:$0xff]  }
 0x2d1   : > { %v11097_v63 = vld [vmem:[%s13846_s1 + $0x820] ss:$16 sps:$4 sm:$0xff]  }
 0x2d2   : > { %3965 = vmatpush1.bf16.msra.mxu1 %v11990_v36  ;;  %4936 = vmatpush1.bf16.msra.mxu0 %v11990_v36  ;;  %v11054_v36 = vld [vmem:[%s13846_s1 + $0x500] ss:$16 sps:$4 sm:$0xff]  }
 0x2d3   : > { %3966 = vmatprep.subr.bf16.mxu1 %v11508_v1  ;;  %4937 = vmatprep.subr.bf16.mxu0 %v11508_v1 }
 0x2d5   : > { %3834 = vmatmul.mubr.bf16.gmra.mrb[84].mxu1 %v11048_v60  ;;  %4805 = vmatmul.mubr.bf16.gmra.mrb[212].mxu0 %v11049_v42 }
 0x2d6   : > { %3967 = vmatpush1.bf16.msra.mxu1 %v12010_v56  ;;  %4938 = vmatpush1.bf16.msra.mxu0 %v12010_v56  ;;  %v11056_v56 = vld [vmem:[%s13846_s1 + $0x524] ss:$16 sps:$4 sm:$0xff]  }
 0x2d7   : > { %3968 = vmatprep.subr.bf16.mxu1 %v11508_v1  ;;  %4939 = vmatprep.subr.bf16.mxu0 %v11508_v1 }
 0x2d8   : > { %3841 = vmatprep.mubr.bf16.mxu1 %v11050_v16  ;;  %4812 = vmatprep.mubr.bf16.mxu0 %v11052_v0  ;;  %v11098_v16 = vld [vmem:[%s13846_s1 + $0x604] ss:$16 sps:$4 sm:$0xff]  }
 0x2d9   : > { %v11100_v0 = vld [vmem:[%s13846_s1 + $0x844] ss:$16 sps:$4 sm:$0xff]  }
 0x2da   : > { %3969 = vmatpush1.bf16.msra.mxu1 %v12030_v13  ;;  %4940 = vmatpush1.bf16.msra.mxu0 %v12030_v13  ;;  %v11060_v13 = vld [vmem:[%s13846_s1 + $0x520] ss:$16 sps:$4 sm:$0xff]  }
 0x2db   : > { %3970 = vmatprep.subr.bf16.mxu1 %v11508_v1  ;;  %4941 = vmatprep.subr.bf16.mxu0 %v11508_v1 }
 0x2dd   : > { %3842 = vmatmul.mubr.bf16.gmra.mrb[88].mxu1 %v11054_v36  ;;  %4813 = vmatmul.mubr.bf16.gmra.mrb[216].mxu0 %v11055_v53 }
 0x2de   : > { %3971 = vmatpush1.bf16.msra.mxu1 %v12050_v34  ;;  %4942 = vmatpush1.bf16.msra.mxu0 %v12050_v34  ;;  %v11062_v34 = vld [vmem:[%s13846_s1 + $0x544] ss:$16 sps:$4 sm:$0xff]  }
 0x2df   : > { %3972 = vmatprep.subr.bf16.mxu1 %v11508_v1  ;;  %4943 = vmatprep.subr.bf16.mxu0 %v11508_v1 }
 0x2e0   : > { %3849 = vmatprep.mubr.bf16.mxu1 %v11056_v56  ;;  %4820 = vmatprep.mubr.bf16.mxu0 %v11058_v3 }
 0x2e2   : > { %3973 = vmatpush1.bf16.msra.mxu1 %v12075_v54  ;;  %4944 = vmatpush1.bf16.msra.mxu0 %v12075_v54  ;;  %v11066_v54 = vld [vmem:[%s13846_s1 + $0x540] ss:$16 sps:$4 sm:$0xff]  }
 0x2e3   : > { %3974 = vmatprep.subr.bf16.mxu1 %v11508_v1  ;;  %4945 = vmatprep.subr.bf16.mxu0 %v11508_v1 }
 0x2e5   : > { %3850 = vmatmul.mubr.bf16.gmra.mrb[92].mxu1 %v11060_v13  ;;  %4821 = vmatmul.mubr.bf16.gmra.mrb[220].mxu0 %v11061_v4 }
 0x2e6   : > { %3975 = vmatpush1.bf16.msra.mxu1 %v12095_v14  ;;  %4946 = vmatpush1.bf16.msra.mxu0 %v12095_v14  ;;  %v11068_v14 = vld [vmem:[%s13846_s1 + $0x564] ss:$16 sps:$4 sm:$0xff]  }
 0x2e7   : > { %3976 = vmatprep.subr.bf16.mxu1 %v11508_v1  ;;  %4947 = vmatprep.subr.bf16.mxu0 %v11508_v1 }
 0x2e8   : > { %3857 = vmatprep.mubr.bf16.mxu1 %v11062_v34  ;;  %4828 = vmatprep.mubr.bf16.mxu0 %v11064_v7 }
 0x2ea   : > { %3977 = vmatpush1.bf16.msra.mxu1 %v12115_v37  ;;  %4948 = vmatpush1.bf16.msra.mxu0 %v12115_v37  ;;  %v11072_v37 = vld [vmem:[%s13846_s1 + $0x560] ss:$16 sps:$4 sm:$0xff]  }
 0x2eb   : > { %3978 = vmatprep.subr.bf16.mxu1 %v11508_v1  ;;  %4949 = vmatprep.subr.bf16.mxu0 %v11508_v1 }
 0x2ed   : > { %3858 = vmatmul.mubr.bf16.gmra.mrb[96].mxu1 %v11066_v54  ;;  %4829 = vmatmul.mubr.bf16.gmra.mrb[224].mxu0 %v11067_v10 }
 0x2ee   : > { %3979 = vmatpush1.bf16.msra.mxu1 %v12135_v59  ;;  %4950 = vmatpush1.bf16.msra.mxu0 %v12135_v59  ;;  %v11074_v59 = vld [vmem:[%s13846_s1 + $0x584] ss:$16 sps:$4 sm:$0xff]  }
 0x2ef   : > { %3980 = vmatprep.subr.bf16.mxu1 %v11508_v1  ;;  %4951 = vmatprep.subr.bf16.mxu0 %v11508_v1 }
 0x2f0   : > { %3865 = vmatprep.mubr.bf16.mxu1 %v11068_v14  ;;  %4836 = vmatprep.mubr.bf16.mxu0 %v11070_v40  ;;  %v11102_v14 = vld [vmem:[%s13846_s1 + $0x600] ss:$16 sps:$4 sm:$0xff]  }
 0x2f1   : > { %v11103_v40 = vld [vmem:[%s13846_s1 + $0x840] ss:$16 sps:$4 sm:$0xff]  }
 0x2f2   : > { %3981 = vmatpush1.bf16.msra.mxu1 %v12155_v20  ;;  %4952 = vmatpush1.bf16.msra.mxu0 %v12155_v20  ;;  %v11078_v20 = vld [vmem:[%s13846_s1 + $0x580] ss:$16 sps:$4 sm:$0xff]  }
 0x2f3   : > { %3982 = vmatprep.subr.bf16.mxu1 %v11508_v1  ;;  %4953 = vmatprep.subr.bf16.mxu0 %v11508_v1 }
 0x2f5   : > { %3866 = vmatmul.mubr.bf16.gmra.mrb[100].mxu1 %v11072_v37  ;;  %4837 = vmatmul.mubr.bf16.gmra.mrb[228].mxu0 %v11073_v11 }
 0x2f6   : > { %3983 = vmatpush1.bf16.msra.mxu1 %v12175_v46  ;;  %4954 = vmatpush1.bf16.msra.mxu0 %v12175_v46  ;;  %v11080_v46 = vld [vmem:[%s13846_s1 + $0x5a4] ss:$16 sps:$4 sm:$0xff]  }
 0x2f7   : > { %3984 = vmatprep.subr.bf16.mxu1 %v11508_v1  ;;  %4955 = vmatprep.subr.bf16.mxu0 %v11508_v1  ;;  %v11082_v1 = vld [vmem:[%s13846_s1 + $0x7e4] ss:$16 sps:$4 sm:$0xff]  }
 0x2f8   : > { %3873 = vmatprep.mubr.bf16.mxu1 %v11074_v59  ;;  %4844 = vmatprep.mubr.bf16.mxu0 %v11076_v15  ;;  %v11104_v59 = vld [vmem:[%s13846_s1 + $0x624] ss:$16 sps:$4 sm:$0xff]  }
 0x2f9   : > { %v11106_v15 = vld [vmem:[%s13846_s1 + $0x864] ss:$16 sps:$4 sm:$0xff]  }
 0x2fa   : > { %3985 = vmatpush1.bf16.msra.mxu1 %v12195_v5  ;;  %4956 = vmatpush1.bf16.msra.mxu0 %v12195_v5  ;;  %v11084_v5 = vld [vmem:[%s13846_s1 + $0x5a0] ss:$16 sps:$4 sm:$0xff]  }
 0x2fd   : > { %3874 = vmatmul.mubr.bf16.gmra.mrb[104].mxu1 %v11078_v20  ;;  %4845 = vmatmul.mubr.bf16.gmra.mrb[232].mxu0 %v11079_v17 }
 0x2fe   : > { %3881 = vmatprep.mubr.bf16.mxu1 %v11080_v46  ;;  %4852 = vmatprep.mubr.bf16.mxu0 %v11082_v1 }
 0x300   : > { %v2046_v18 = vpop.f32.mrb[0].mxu1  ;;  %v3017_v23 = vpop.f32.mrb[128].mxu0 }
 0x301   : > { %v9660_v24 = vpack.c.bf16 %v2046_v18, %v2046_v18  ;;  %v9696_v26 = vpack.c.bf16 %v3017_v23, %v3017_v23  ;;  %v2048_v27 = vpop.f32.mrb[1].mxu1  ;;  %v3019_v28 = vpop.f32.mrb[129].mxu0  ;;  %v11200_v18 = vld [vmem:[%s13849_s4 + $0x40] sm:$0xff]  }
 0x302   : > { %v2049_v33 = vpop.f32.mrb[2].mxu1  ;;  %v3020_v21 = vpop.f32.mrb[130].mxu0  ;;  %9827 = vmatprep.subr.bf16.mxu1 %v11200_v18 }
 0x303   : > { %2226 = vst [vmem:[#allocation2] sm:$0xf] %v9660_v24  ;;  %3197 = vst [vmem:[#allocation2 + $0x10] sm:$0xf] %v9696_v26  ;;  %v9661_v38 = vpack.c.bf16 %v2049_v33, %v2049_v33  ;;  %v9697_v43 = vpack.c.bf16 %v3020_v21, %v3020_v21  ;;  %v2051_v9 = vpop.f32.mrb[3].mxu1  ;;  %v3022_v55 = vpop.f32.mrb[131].mxu0 }
 0x304   : > { %v11109_v33 = vld [vmem:[%s13846_s1 + $0x860] ss:$16 sps:$4 sm:$0xff]  }
 0x305   : > { %2227 = vst [vmem:[#allocation2 + $0x40] sm:$0xf] %v9661_v38  ;;  %3198 = vst [vmem:[#allocation2 + $0x50] sm:$0xf] %v9697_v43  ;;  %3882 = vmatmul.mubr.bf16.gmra.mrb[108].mxu1 %v11084_v5  ;;  %4853 = vmatmul.mubr.bf16.gmra.mrb[236].mxu0 %v11085_v29  ;;  %v11108_v29 = vld [vmem:[%s13846_s1 + $0x620] ss:$16 sps:$4 sm:$0xff]  }
 0x306   : > { %3889 = vmatprep.mubr.bf16.mxu1 %v11086_v35  ;;  %4860 = vmatprep.mubr.bf16.mxu0 %v11088_v32  ;;  %v11110_v32 = vld [vmem:[%s13846_s1 + $0x644] ss:$16 sps:$4 sm:$0xff]  }
 0x307   : > { %v11114_v38 = vld [vmem:[%s13846_s1 + $0x884] ss:$16 sps:$4 sm:$0xff]  }
 0x308   : > { %v2054_v39 = vpop.f32.mrb[4].mxu1  ;;  %v3025_v2 = vpop.f32.mrb[132].mxu0 }
 0x309   : > { %v9662_v45 = vpack.c.bf16 %v2054_v39, %v2054_v39  ;;  %v9698_v12 = vpack.c.bf16 %v3025_v2, %v3025_v2  ;;  %v2056_v47 = vpop.f32.mrb[5].mxu1  ;;  %v3027_v22 = vpop.f32.mrb[133].mxu0 }
 0x30a   : > { %v2057_v49 = vpop.f32.mrb[6].mxu1  ;;  %v3028_v41 = vpop.f32.mrb[134].mxu0 }
 0x30b   : > { %2228 = vst [vmem:[#allocation2 + $0x80] sm:$0xf] %v9662_v45  ;;  %3199 = vst [vmem:[#allocation2 + $0x90] sm:$0xf] %v9698_v12  ;;  %v9663_v52 = vpack.c.bf16 %v2057_v49, %v2057_v49  ;;  %v9699_v61 = vpack.c.bf16 %v3028_v41, %v3028_v41  ;;  %v2059_v57 = vpop.f32.mrb[7].mxu1  ;;  %v3030_v8 = vpop.f32.mrb[135].mxu0 }
 0x30c   : > { %v11115_v49 = vld [vmem:[%s13846_s1 + $0x640] ss:$16 sps:$4 sm:$0xff]  }
 0x30d   : > { %2229 = vst [vmem:[#allocation2 + $0xc0] sm:$0xf] %v9663_v52  ;;  %3200 = vst [vmem:[#allocation2 + $0xd0] sm:$0xf] %v9699_v61  ;;  %3890 = vmatmul.mubr.bf16.gmra.mrb[112].mxu1 %v11090_v48  ;;  %4861 = vmatmul.mubr.bf16.gmra.mrb[240].mxu0 %v11091_v31  ;;  %v11112_v31 = vld [vmem:[%s13846_s1 + $0x880] ss:$16 sps:$4 sm:$0xff]  }
 0x30e   : > { %3897 = vmatprep.mubr.bf16.mxu1 %v11092_v50  ;;  %4868 = vmatprep.mubr.bf16.mxu0 %v11094_v51  ;;  %v11116_v51 = vld [vmem:[%s13846_s1 + $0x664] ss:$16 sps:$4 sm:$0xff]  }
 0x30f   : > { %v11120_v52 = vld [vmem:[%s13846_s1 + $0x8a4] ss:$16 sps:$4 sm:$0xff]  }
 0x310   : > { %v2062_v58 = vpop.f32.mrb[8].mxu1  ;;  %v3033_v19 = vpop.f32.mrb[136].mxu0 }
 0x311   : > { %v9664_v6 = vpack.c.bf16 %v2062_v58, %v2062_v58  ;;  %v9700_v62 = vpack.c.bf16 %v3033_v19, %v3033_v19  ;;  %v2064_v25 = vpop.f32.mrb[9].mxu1  ;;  %v3035_v30 = vpop.f32.mrb[137].mxu0 }
 0x312   : > { %v2065_v60 = vpop.f32.mrb[10].mxu1  ;;  %v3036_v42 = vpop.f32.mrb[138].mxu0 }
 0x313   : > { %2230 = vst [vmem:[#allocation2 + $0x100] sm:$0xf] %v9664_v6  ;;  %3201 = vst [vmem:[#allocation2 + $0x110] sm:$0xf] %v9700_v62  ;;  %v9665_v36 = vpack.c.bf16 %v2065_v60, %v2065_v60  ;;  %v9701_v53 = vpack.c.bf16 %v3036_v42, %v3036_v42  ;;  %v2067_v56 = vpop.f32.mrb[11].mxu1  ;;  %v3038_v3 = vpop.f32.mrb[139].mxu0 }
 0x314   : > { %v11121_v60 = vld [vmem:[%s13846_s1 + $0x660] ss:$16 sps:$4 sm:$0xff]  }
 0x315   : > { %2231 = vst [vmem:[#allocation2 + $0x140] sm:$0xf] %v9665_v36  ;;  %3202 = vst [vmem:[#allocation2 + $0x150] sm:$0xf] %v9701_v53  ;;  %3898 = vmatmul.mubr.bf16.gmra.mrb[116].mxu1 %v11096_v44  ;;  %4869 = vmatmul.mubr.bf16.gmra.mrb[244].mxu0 %v11097_v63  ;;  %v11118_v63 = vld [vmem:[%s13846_s1 + $0x8a0] ss:$16 sps:$4 sm:$0xff]  }
 0x316   : > { %3905 = vmatprep.mubr.bf16.mxu1 %v11098_v16  ;;  %4876 = vmatprep.mubr.bf16.mxu0 %v11100_v0  ;;  %v11122_v0 = vld [vmem:[%s13846_s1 + $0x684] ss:$16 sps:$4 sm:$0xff]  }
 0x317   : > { %v11126_v36 = vld [vmem:[%s13846_s1 + $0x8c4] ss:$16 sps:$4 sm:$0xff]  }
 0x318   : > { %v2070_v13 = vpop.f32.mrb[12].mxu1  ;;  %v3041_v4 = vpop.f32.mrb[140].mxu0 }
 0x319   : > { %v9666_v34 = vpack.c.bf16 %v2070_v13, %v2070_v13  ;;  %v9702_v7 = vpack.c.bf16 %v3041_v4, %v3041_v4  ;;  %v2072_v54 = vpop.f32.mrb[13].mxu1  ;;  %v3043_v10 = vpop.f32.mrb[141].mxu0 }
 0x31a   : > { %v2073_v37 = vpop.f32.mrb[14].mxu1  ;;  %v3044_v11 = vpop.f32.mrb[142].mxu0 }
 0x31b   : > { %2232 = vst [vmem:[#allocation2 + $0x180] sm:$0xf] %v9666_v34  ;;  %3203 = vst [vmem:[#allocation2 + $0x190] sm:$0xf] %v9702_v7  ;;  %v9667_v20 = vpack.c.bf16 %v2073_v37, %v2073_v37  ;;  %v9703_v17 = vpack.c.bf16 %v3044_v11, %v3044_v11  ;;  %v2075_v46 = vpop.f32.mrb[15].mxu1  ;;  %v3046_v1 = vpop.f32.mrb[143].mxu0 }
 0x31c   : > { %v11127_v37 = vld [vmem:[%s13846_s1 + $0x680] ss:$16 sps:$4 sm:$0xff]  }
 0x31d   : > { %2233 = vst [vmem:[#allocation2 + $0x1c0] sm:$0xf] %v9667_v20  ;;  %3204 = vst [vmem:[#allocation2 + $0x1d0] sm:$0xf] %v9703_v17  ;;  %3906 = vmatmul.mubr.bf16.gmra.mrb[120].mxu1 %v11102_v14  ;;  %4877 = vmatmul.mubr.bf16.gmra.mrb[248].mxu0 %v11103_v40  ;;  %v11124_v40 = vld [vmem:[%s13846_s1 + $0x8c0] ss:$16 sps:$4 sm:$0xff]  }
 0x31e   : > { %3913 = vmatprep.mubr.bf16.mxu1 %v11104_v59  ;;  %4884 = vmatprep.mubr.bf16.mxu0 %v11106_v15  ;;  %v11128_v15 = vld [vmem:[%s13846_s1 + $0x6a4] ss:$16 sps:$4 sm:$0xff]  }
 0x31f   : > { %v11132_v20 = vld [vmem:[%s13846_s1 + $0x8e4] ss:$16 sps:$4 sm:$0xff]  }
 0x320   : > { %v2078_v23 = vpop.f32.mrb[16].mxu1  ;;  %v3049_v24 = vpop.f32.mrb[144].mxu0 }
 0x321   : > { %v9668_v26 = vpack.c.bf16 %v2078_v23, %v2078_v23  ;;  %v9704_v27 = vpack.c.bf16 %v3049_v24, %v3049_v24  ;;  %v2080_v28 = vpop.f32.mrb[17].mxu1  ;;  %v3051_v5 = vpop.f32.mrb[145].mxu0 }
 0x322   : > { %v2081_v21 = vpop.f32.mrb[18].mxu1  ;;  %v3052_v35 = vpop.f32.mrb[146].mxu0 }
 0x323   : > { %2234 = vst [vmem:[#allocation2 + $0x200] sm:$0xf] %v9668_v26  ;;  %3205 = vst [vmem:[#allocation2 + $0x210] sm:$0xf] %v9704_v27  ;;  %v9669_v43 = vpack.c.bf16 %v2081_v21, %v2081_v21  ;;  %v9705_v9 = vpack.c.bf16 %v3052_v35, %v3052_v35  ;;  %v2083_v55 = vpop.f32.mrb[19].mxu1  ;;  %v3054_v39 = vpop.f32.mrb[147].mxu0 }
 0x325   : > { %2272 = vst [vmem:[#allocation2 + $0x4] sm:$0xf] %v9669_v43  ;;  %3243 = vst [vmem:[#allocation2 + $0x14] sm:$0xf] %v9705_v9  ;;  %3914 = vmatmul.mubr.bf16.gmra.mrb[124].mxu1 %v11108_v29  ;;  %4885 = vmatmul.mubr.bf16.gmra.mrb[252].mxu0 %v11109_v33  ;;  %v11130_v29 = vld [vmem:[%s13846_s1 + $0x8e0] ss:$16 sps:$4 sm:$0xff]  }
 0x326   : > { %3921 = vmatprep.mubr.bf16.mxu1 %v11110_v32  ;;  %4892 = vmatprep.mubr.bf16.mxu0 %v11114_v38  ;;  %v11133_v33 = vld [vmem:[%s13846_s1 + $0x6a0] ss:$16 sps:$4 sm:$0xff]   ;;  %v11136_v32 = vld [vmem:[%s13846_s1 + $0x48c] ss:$16 sps:$4 sm:$0xff]  }
 0x327   : > { %v11139_v38 = vld [vmem:[%s13846_s1 + $0x6cc] ss:$16 sps:$4 sm:$0xff]  }
 0x328   : > { %v2086_v2 = vpop.f32.mrb[20].mxu1  ;;  %v3057_v45 = vpop.f32.mrb[148].mxu0 }
 0x329   : > { %v9670_v12 = vpack.c.bf16 %v2086_v2, %v2086_v2  ;;  %v9706_v47 = vpack.c.bf16 %v3057_v45, %v3057_v45  ;;  %v2088_v22 = vpop.f32.mrb[21].mxu1  ;;  %v3059_v48 = vpop.f32.mrb[149].mxu0 }
 0x32a   : > { %v2089_v41 = vpop.f32.mrb[22].mxu1  ;;  %v3060_v50 = vpop.f32.mrb[150].mxu0 }
 0x32b   : > { %2273 = vst [vmem:[#allocation2 + $0x44] sm:$0xf] %v9670_v12  ;;  %3244 = vst [vmem:[#allocation2 + $0x54] sm:$0xf] %v9706_v47  ;;  %v9671_v61 = vpack.c.bf16 %v2089_v41, %v2089_v41  ;;  %v9707_v57 = vpack.c.bf16 %v3060_v50, %v3060_v50  ;;  %v2091_v8 = vpop.f32.mrb[23].mxu1  ;;  %v3062_v58 = vpop.f32.mrb[151].mxu0 }
 0x32d   : > { %2274 = vst [vmem:[#allocation2 + $0x84] sm:$0xf] %v9671_v61  ;;  %3245 = vst [vmem:[#allocation2 + $0x94] sm:$0xf] %v9707_v57  ;;  %3922 = vmatmul.mubr.bf16.gmra.mrb[128].mxu1 %v11115_v49  ;;  %4893 = vmatmul.mubr.bf16.gmra.mrb[0].mxu0 %v11112_v31  ;;  %v11134_v31 = vld [vmem:[%s13846_s1 + $0x488] ss:$16 sps:$4 sm:$0xff]  }
 0x32e   : > { %3929 = vmatprep.mubr.bf16.mxu1 %v11116_v51  ;;  %4900 = vmatprep.mubr.bf16.mxu0 %v11120_v52  ;;  %v11137_v49 = vld [vmem:[%s13846_s1 + $0x6c8] ss:$16 sps:$4 sm:$0xff]   ;;  %v11140_v51 = vld [vmem:[%s13846_s1 + $0x4ac] ss:$16 sps:$4 sm:$0xff]  }
 0x32f   : > { %v11142_v52 = vld [vmem:[%s13846_s1 + $0x6ec] ss:$16 sps:$4 sm:$0xff]  }
 0x330   : > { %v2094_v19 = vpop.f32.mrb[24].mxu1  ;;  %v3065_v6 = vpop.f32.mrb[152].mxu0 }
 0x331   : > { %v9672_v62 = vpack.c.bf16 %v2094_v19, %v2094_v19  ;;  %v9708_v25 = vpack.c.bf16 %v3065_v6, %v3065_v6  ;;  %v2096_v30 = vpop.f32.mrb[25].mxu1  ;;  %v3067_v44 = vpop.f32.mrb[153].mxu0  ;;  %v11201_v19 = vld [vmem:[%s13849_s4] sm:$0xff]   ;;  %v11214_v6 = vld [vmem:[%s13849_s4 + $0x48] sm:$0xff]  }
 0x332   : > { %v2097_v42 = vpop.f32.mrb[26].mxu1  ;;  %v3068_v16 = vpop.f32.mrb[154].mxu0  ;;  %v11233_v44 = vld [vmem:[%s13849_s4 + $0x50] sm:$0xff]  }
 0x333   : > { %2275 = vst [vmem:[#allocation2 + $0xc4] sm:$0xf] %v9672_v62  ;;  %3246 = vst [vmem:[#allocation2 + $0xd4] sm:$0xf] %v9708_v25  ;;  %v9673_v53 = vpack.c.bf16 %v2097_v42, %v2097_v42  ;;  %v9709_v56 = vpack.c.bf16 %v3068_v16, %v3068_v16  ;;  %v2099_v3 = vpop.f32.mrb[27].mxu1  ;;  %v3070_v13 = vpop.f32.mrb[155].mxu0 }
 0x334   : > { %v11215_v62 = vld [vmem:[%s13849_s4 + $0x8] sm:$0xff]  }
 0x335   : > { %2276 = vst [vmem:[#allocation2 + $0x104] sm:$0xf] %v9673_v53  ;;  %3247 = vst [vmem:[#allocation2 + $0x114] sm:$0xf] %v9709_v56  ;;  %3930 = vmatmul.mubr.bf16.gmra.mrb[132].mxu1 %v11121_v60  ;;  %4901 = vmatmul.mubr.bf16.gmra.mrb[4].mxu0 %v11118_v63  ;;  %v11146_v3 = vld [vmem:[%s13846_s1 + $0x4cc] ss:$16 sps:$4 sm:$0xff]  }
 0x336   : > { %3937 = vmatprep.mubr.bf16.mxu1 %v11122_v0  ;;  %4908 = vmatprep.mubr.bf16.mxu0 %v11126_v36  ;;  %v11144_v0 = vld [vmem:[%s13846_s1 + $0x4a8] ss:$16 sps:$4 sm:$0xff]   ;;  %v11148_v13 = vld [vmem:[%s13846_s1 + $0x70c] ss:$16 sps:$4 sm:$0xff]  }
 0x337   : > { %v11145_v36 = vld [vmem:[%s13846_s1 + $0x6e8] ss:$16 sps:$4 sm:$0xff]  }
 0x338   : > { %v2102_v4 = vpop.f32.mrb[28].mxu1  ;;  %v3073_v34 = vpop.f32.mrb[156].mxu0 }
 0x339   : > { %v9674_v7 = vpack.c.bf16 %v2102_v4, %v2102_v4  ;;  %v9710_v54 = vpack.c.bf16 %v3073_v34, %v3073_v34  ;;  %v2104_v10 = vpop.f32.mrb[29].mxu1  ;;  %v3075_v14 = vpop.f32.mrb[157].mxu0 }
 0x33a   : > { %v2105_v11 = vpop.f32.mrb[30].mxu1  ;;  %v3076_v59 = vpop.f32.mrb[158].mxu0  ;;  %v11235_v10 = vld [vmem:[%s13849_s4 + $0x10] sm:$0xff]   ;;  %v11236_v14 = vld [vmem:[%s13849_s4 + $0x58] sm:$0xff]  }
 0x33b   : > { %2277 = vst [vmem:[#allocation2 + $0x144] sm:$0xf] %v9674_v7  ;;  %3248 = vst [vmem:[#allocation2 + $0x154] sm:$0xf] %v9710_v54  ;;  %v9675_v17 = vpack.c.bf16 %v2105_v11, %v2105_v11  ;;  %v9711_v46 = vpack.c.bf16 %v3076_v59, %v3076_v59  ;;  %v2107_v1 = vpop.f32.mrb[31].mxu1  ;;  %v3078_v18 = vpop.f32.mrb[159].mxu0 }
 0x33c   : > { %v11244_v59 = vld [vmem:[%s13849_s4 + $0x60] sm:$0xff]   ;;  %v11150_v1 = vld [vmem:[%s13846_s1 + $0x4c8] ss:$16 sps:$4 sm:$0xff]  }
 0x33d   : > { %2278 = vst [vmem:[#allocation2 + $0x184] sm:$0xf] %v9675_v17  ;;  %3249 = vst [vmem:[#allocation2 + $0x194] sm:$0xf] %v9711_v46  ;;  %3938 = vmatmul.mubr.bf16.gmra.mrb[136].mxu1 %v11127_v37  ;;  %4909 = vmatmul.mubr.bf16.gmra.mrb[8].mxu0 %v11124_v40  ;;  %v11237_v40 = vld [vmem:[%s13849_s4 + $0x18] sm:$0xff]  }
 0x33e   : > { %3945 = vmatprep.mubr.bf16.mxu1 %v11128_v15  ;;  %4916 = vmatprep.mubr.bf16.mxu0 %v11132_v20  ;;  %v11151_v18 = vld [vmem:[%s13846_s1 + $0x708] ss:$16 sps:$4 sm:$0xff]  }
 0x340   : > { %v2110_v23 = vpop.f32.mrb[32].mxu1  ;;  %v3081_v24 = vpop.f32.mrb[160].mxu0 }
 0x341   : > { %v9676_v26 = vpack.c.bf16 %v2110_v23, %v2110_v23  ;;  %v9712_v27 = vpack.c.bf16 %v3081_v24, %v3081_v24  ;;  %v2112_v28 = vpop.f32.mrb[33].mxu1  ;;  %v3083_v5 = vpop.f32.mrb[161].mxu0 }
 0x342   : > { %v2113_v21 = vpop.f32.mrb[34].mxu1  ;;  %v3084_v35 = vpop.f32.mrb[162].mxu0 }
 0x343   : > { %2279 = vst [vmem:[#allocation2 + $0x1c4] sm:$0xf] %v9676_v26  ;;  %3250 = vst [vmem:[#allocation2 + $0x1d4] sm:$0xf] %v9712_v27  ;;  %v9677_v43 = vpack.c.bf16 %v2113_v21, %v2113_v21  ;;  %v9713_v9 = vpack.c.bf16 %v3084_v35, %v3084_v35  ;;  %v2115_v55 = vpop.f32.mrb[35].mxu1  ;;  %v3086_v39 = vpop.f32.mrb[163].mxu0 }
 0x344   : > { %v11152_v26 = vld [vmem:[%s13846_s1 + $0x4ec] ss:$16 sps:$4 sm:$0xff]   ;;  %v11245_v21 = vld [vmem:[%s13849_s4 + $0x20] sm:$0xff]  }
 0x345   : > { %2280 = vst [vmem:[#allocation2 + $0x204] sm:$0xf] %v9677_v43  ;;  %3251 = vst [vmem:[#allocation2 + $0x214] sm:$0xf] %v9713_v9  ;;  %3946 = vmatmul.mubr.bf16.gmra.mrb[140].mxu1 %v11133_v33  ;;  %4917 = vmatmul.mubr.bf16.gmra.mrb[12].mxu0 %v11130_v29  ;;  %v11154_v27 = vld [vmem:[%s13846_s1 + $0x72c] ss:$16 sps:$4 sm:$0xff]  }
 0x346   : > { %3986 = vmatprep.mubr.bf16.mxu1 %v11136_v32  ;;  %4957 = vmatprep.mubr.bf16.mxu0 %v11139_v38  ;;  %v11246_v35 = vld [vmem:[%s13849_s4 + $0x68] sm:$0xff]   ;;  %v11254_v9 = vld [vmem:[%s13849_s4 + $0x70] sm:$0xff]  }
 0x347   : > { %v11247_v32 = vld [vmem:[%s13849_s4 + $0x28] sm:$0xff]  }
 0x348   : > { %v2118_v2 = vpop.f32.mrb[36].mxu1  ;;  %v3089_v45 = vpop.f32.mrb[164].mxu0 }
 0x349   : > { %v9678_v12 = vpack.c.bf16 %v2118_v2, %v2118_v2  ;;  %v9714_v47 = vpack.c.bf16 %v3089_v45, %v3089_v45  ;;  %v2120_v22 = vpop.f32.mrb[37].mxu1  ;;  %v3091_v48 = vpop.f32.mrb[165].mxu0 }
 0x34a   : > { %v2121_v41 = vpop.f32.mrb[38].mxu1  ;;  %v3092_v50 = vpop.f32.mrb[166].mxu0 }
 0x34b   : > { %2318 = vst [vmem:[#allocation2 + $0x8] sm:$0xf] %v9678_v12  ;;  %3289 = vst [vmem:[#allocation2 + $0x18] sm:$0xf] %v9714_v47  ;;  %v9679_v61 = vpack.c.bf16 %v2121_v41, %v2121_v41  ;;  %v9715_v57 = vpack.c.bf16 %v3092_v50, %v3092_v50  ;;  %v2123_v8 = vpop.f32.mrb[39].mxu1  ;;  %v3094_v58 = vpop.f32.mrb[167].mxu0 }
 0x34c   : > { %v11156_v12 = vld [vmem:[%s13846_s1 + $0x4e8] ss:$16 sps:$4 sm:$0xff]  }
 0x34d   : > { %2319 = vst [vmem:[#allocation2 + $0x48] sm:$0xf] %v9679_v61  ;;  %3290 = vst [vmem:[#allocation2 + $0x58] sm:$0xf] %v9715_v57  ;;  %3987 = vmatmul.mubr.bf16.vlgmr.msra.gmra.mrb[72].mxu1 %v11134_v31  ;;  %4958 = vmatmul.mubr.bf16.vlgmr.msra.gmra.mrb[200].mxu0 %v11137_v49  ;;  %v11157_v47 = vld [vmem:[%s13846_s1 + $0x728] ss:$16 sps:$4 sm:$0xff]  }
 0x34e   : > { %3994 = vmatprep.mubr.bf16.mxu1 %v11140_v51  ;;  %4965 = vmatprep.mubr.bf16.mxu0 %v11142_v52  ;;  %v11158_v31 = vld [vmem:[%s13846_s1 + $0x50c] ss:$16 sps:$4 sm:$0xff]   ;;  %v11255_v61 = vld [vmem:[%s13849_s4 + $0x30] sm:$0xff]  }
 0x34f   : > { %9828 = vmatpush3.bf16.msra.mxu1 %v11201_v19  ;;  %v11160_v49 = vld [vmem:[%s13846_s1 + $0x74c] ss:$16 sps:$4 sm:$0xff]  }
 0x350   : > { %v2126_v25 = vpop.f32.mrb[40].mxu1  ;;  %v3097_v30 = vpop.f32.mrb[168].mxu0  ;;  %9829 = vmatprep.subr.bf16.mxu1 %v11214_v6  ;;  %v11256_v57 = vld [vmem:[%s13849_s4 + $0x78] sm:$0xff]   ;;  %v11258_v6 = vld [vmem:[%s13849_s4 + $0xc0] sm:$0xff]  }
 0x351   : > { %v9680_v63 = vpack.c.bf16 %v2126_v25, %v2126_v25  ;;  %v9716_v60 = vpack.c.bf16 %v3097_v30, %v3097_v30  ;;  %v2128_v42 = vpop.f32.mrb[41].mxu1  ;;  %v3099_v16 = vpop.f32.mrb[169].mxu0  ;;  %v11257_v8 = vld [vmem:[%s13849_s4 + $0x38] sm:$0xff]  }
 0x352   : > { %v2129_v53 = vpop.f32.mrb[42].mxu1  ;;  %v3100_v56 = vpop.f32.mrb[170].mxu0 }
 0x353   : > { %2320 = vst [vmem:[#allocation2 + $0x88] sm:$0xf] %v9680_v63  ;;  %3291 = vst [vmem:[#allocation2 + $0x98] sm:$0xf] %v9716_v60  ;;  %v9681_v4 = vpack.c.bf16 %v2129_v53, %v2129_v53  ;;  %v9717_v34 = vpack.c.bf16 %v3100_v56, %v3100_v56  ;;  %v2131_v7 = vpop.f32.mrb[43].mxu1  ;;  %v3102_v54 = vpop.f32.mrb[171].mxu0  ;;  %9830 = vmatpush3.bf16.msra.mxu1 %v11215_v62 }
 0x354   : > { %9831 = vmatprep.subr.bf16.mxu1 %v11233_v44  ;;  %v11162_v63 = vld [vmem:[%s13846_s1 + $0x508] ss:$16 sps:$4 sm:$0xff]  }
 0x355   : > { %2321 = vst [vmem:[#allocation2 + $0xc8] sm:$0xf] %v9681_v4  ;;  %3292 = vst [vmem:[#allocation2 + $0xd8] sm:$0xf] %v9717_v34  ;;  %3995 = vmatmul.mubr.bf16.gmra.mrb[76].mxu1 %v11144_v0  ;;  %4966 = vmatmul.mubr.bf16.gmra.mrb[204].mxu0 %v11145_v36  ;;  %v11163_v60 = vld [vmem:[%s13846_s1 + $0x748] ss:$16 sps:$4 sm:$0xff]  }
 0x356   : > { %4002 = vmatprep.mubr.bf16.mxu1 %v11146_v3  ;;  %4973 = vmatprep.mubr.bf16.mxu0 %v11148_v13  ;;  %v11164_v0 = vld [vmem:[%s13846_s1 + $0x52c] ss:$16 sps:$4 sm:$0xff]  }
 0x357   : > { %9832 = vmatpush3.bf16.msra.mxu1 %v11235_v10  ;;  %v11166_v36 = vld [vmem:[%s13846_s1 + $0x76c] ss:$16 sps:$4 sm:$0xff]  }
 0x358   : > { %v2134_v37 = vpop.f32.mrb[44].mxu1  ;;  %v3105_v11 = vpop.f32.mrb[172].mxu0  ;;  %9833 = vmatprep.subr.bf16.mxu1 %v11236_v14 }
 0x359   : > { %v9682_v15 = vpack.c.bf16 %v2134_v37, %v2134_v37  ;;  %v9718_v20 = vpack.c.bf16 %v3105_v11, %v3105_v11  ;;  %v2136_v17 = vpop.f32.mrb[45].mxu1  ;;  %v3107_v46 = vpop.f32.mrb[173].mxu0  ;;  %v11169_v37 = vld [vmem:[%s13846_s1 + $0x768] ss:$16 sps:$4 sm:$0xff]  }
 0x35a   : > { %v2137_v23 = vpop.f32.mrb[46].mxu1  ;;  %v3108_v24 = vpop.f32.mrb[174].mxu0 }
 0x35b   : > { %2322 = vst [vmem:[#allocation2 + $0x108] sm:$0xf] %v9682_v15  ;;  %3293 = vst [vmem:[#allocation2 + $0x118] sm:$0xf] %v9718_v20  ;;  %v9683_v28 = vpack.c.bf16 %v2137_v23, %v2137_v23  ;;  %v9719_v5 = vpack.c.bf16 %v3108_v24, %v3108_v24  ;;  %v2139_v29 = vpop.f32.mrb[47].mxu1  ;;  %v3110_v33 = vpop.f32.mrb[175].mxu0  ;;  %9834 = vmatpush3.bf16.msra.mxu1 %v11237_v40 }
 0x35c   : > { %9835 = vmatprep.subr.bf16.mxu1 %v11244_v59  ;;  %v11168_v40 = vld [vmem:[%s13846_s1 + $0x528] ss:$16 sps:$4 sm:$0xff]   ;;  %v11170_v15 = vld [vmem:[%s13846_s1 + $0x54c] ss:$16 sps:$4 sm:$0xff]  }
 0x35d   : > { %2323 = vst [vmem:[#allocation2 + $0x148] sm:$0xf] %v9683_v28  ;;  %3294 = vst [vmem:[#allocation2 + $0x158] sm:$0xf] %v9719_v5  ;;  %4003 = vmatmul.mubr.bf16.gmra.mrb[80].mxu1 %v11150_v1  ;;  %4974 = vmatmul.mubr.bf16.gmra.mrb[208].mxu0 %v11151_v18  ;;  %v11172_v20 = vld [vmem:[%s13846_s1 + $0x78c] ss:$16 sps:$4 sm:$0xff]  }
 0x35e   : > { %4010 = vmatprep.mubr.bf16.mxu1 %v11152_v26  ;;  %4981 = vmatprep.mubr.bf16.mxu0 %v11154_v27  ;;  %v11174_v29 = vld [vmem:[%s13846_s1 + $0x548] ss:$16 sps:$4 sm:$0xff]  }
 0x35f   : > { %9836 = vmatpush3.bf16.msra.mxu1 %v11245_v21  ;;  %v11175_v33 = vld [vmem:[%s13846_s1 + $0x788] ss:$16 sps:$4 sm:$0xff]  }
 0x360   : > { %v2142_v38 = vpop.f32.mrb[48].mxu1  ;;  %v3113_v43 = vpop.f32.mrb[176].mxu0  ;;  %9837 = vmatprep.subr.bf16.mxu1 %v11246_v35 }
 0x361   : > { %v9684_v55 = vpack.c.bf16 %v2142_v38, %v2142_v38  ;;  %v9720_v39 = vpack.c.bf16 %v3113_v43, %v3113_v43  ;;  %v2144_v2 = vpop.f32.mrb[49].mxu1  ;;  %v3115_v45 = vpop.f32.mrb[177].mxu0  ;;  %v11178_v38 = vld [vmem:[%s13846_s1 + $0x7ac] ss:$16 sps:$4 sm:$0xff]  }
 0x362   : > { %v2145_v22 = vpop.f32.mrb[50].mxu1  ;;  %v3116_v48 = vpop.f32.mrb[178].mxu0 }
 0x363   : > { %2324 = vst [vmem:[#allocation2 + $0x188] sm:$0xf] %v9684_v55  ;;  %3295 = vst [vmem:[#allocation2 + $0x198] sm:$0xf] %v9720_v39  ;;  %v9685_v41 = vpack.c.bf16 %v2145_v22, %v2145_v22  ;;  %v9721_v50 = vpack.c.bf16 %v3116_v48, %v3116_v48  ;;  %v2147_v51 = vpop.f32.mrb[51].mxu1  ;;  %v3118_v52 = vpop.f32.mrb[179].mxu0  ;;  %9838 = vmatpush3.bf16.msra.mxu1 %v11247_v32 }
 0x364   : > { %9839 = vmatprep.subr.bf16.mxu1 %v11254_v9  ;;  %v11176_v32 = vld [vmem:[%s13846_s1 + $0x56c] ss:$16 sps:$4 sm:$0xff]  }
 0x365   : > { %2325 = vst [vmem:[#allocation2 + $0x1c8] sm:$0xf] %v9685_v41  ;;  %3296 = vst [vmem:[#allocation2 + $0x1d8] sm:$0xf] %v9721_v50  ;;  %4011 = vmatmul.mubr.bf16.gmra.mrb[84].mxu1 %v11156_v12  ;;  %4982 = vmatmul.mubr.bf16.gmra.mrb[212].mxu0 %v11157_v47  ;;  %v11182_v51 = vld [vmem:[%s13846_s1 + $0x58c] ss:$16 sps:$4 sm:$0xff]  }
 0x366   : > { %4018 = vmatprep.mubr.bf16.mxu1 %v11158_v31  ;;  %4989 = vmatprep.mubr.bf16.mxu0 %v11160_v49  ;;  %v11180_v31 = vld [vmem:[%s13846_s1 + $0x568] ss:$16 sps:$4 sm:$0xff]   ;;  %v11184_v52 = vld [vmem:[%s13846_s1 + $0x7cc] ss:$16 sps:$4 sm:$0xff]  }
 0x367   : > { %9840 = vmatpush3.bf16.msra.mxu1 %v11255_v61  ;;  %v11181_v49 = vld [vmem:[%s13846_s1 + $0x7a8] ss:$16 sps:$4 sm:$0xff]  }
 0x368   : > { %v2150_v58 = vpop.f32.mrb[52].mxu1  ;;  %v3121_v19 = vpop.f32.mrb[180].mxu0  ;;  %9841 = vmatprep.subr.bf16.mxu1 %v11256_v57 }
 0x369   : > { %v9686_v62 = vpack.c.bf16 %v2150_v58, %v2150_v58  ;;  %v9722_v25 = vpack.c.bf16 %v3121_v19, %v3121_v19  ;;  %v2152_v30 = vpop.f32.mrb[53].mxu1  ;;  %v3123_v44 = vpop.f32.mrb[181].mxu0 }
 0x36a   : > { %v2153_v42 = vpop.f32.mrb[54].mxu1  ;;  %v3124_v16 = vpop.f32.mrb[182].mxu0 }
 0x36b   : > { %2326 = vst [vmem:[#allocation2 + $0x208] sm:$0xf] %v9686_v62  ;;  %3297 = vst [vmem:[#allocation2 + $0x218] sm:$0xf] %v9722_v25  ;;  %v9687_v53 = vpack.c.bf16 %v2153_v42, %v2153_v42  ;;  %v9723_v56 = vpack.c.bf16 %v3124_v16, %v3124_v16  ;;  %v2155_v3 = vpop.f32.mrb[55].mxu1  ;;  %v3126_v13 = vpop.f32.mrb[183].mxu0  ;;  %9842 = vmatpush3.bf16.msra.mxu1 %v11257_v8 }
 0x36c   : > { %9873 = vmatprep.subr.bf16.mxu1 %v11258_v6 }
 0x36d   : > { %2364 = vst [vmem:[#allocation2 + $0xc] sm:$0xf] %v9687_v53  ;;  %3335 = vst [vmem:[#allocation2 + $0x1c] sm:$0xf] %v9723_v56  ;;  %4019 = vmatmul.mubr.bf16.gmra.mrb[88].mxu1 %v11162_v63  ;;  %4990 = vmatmul.mubr.bf16.gmra.mrb[216].mxu0 %v11163_v60  ;;  %v11186_v63 = vld [vmem:[%s13846_s1 + $0x588] ss:$16 sps:$4 sm:$0xff]  }
 0x36e   : > { %4026 = vmatprep.mubr.bf16.mxu1 %v11164_v0  ;;  %4997 = vmatprep.mubr.bf16.mxu0 %v11166_v36  ;;  %v11187_v60 = vld [vmem:[%s13846_s1 + $0x7c8] ss:$16 sps:$4 sm:$0xff]   ;;  %v11188_v0 = vld [vmem:[%s13846_s1 + $0x5ac] ss:$16 sps:$4 sm:$0xff]  }
 0x36f   : > { %v11190_v36 = vld [vmem:[%s13846_s1 + $0x7ec] ss:$16 sps:$4 sm:$0xff]  }
 0x370   : > { %v2158_v4 = vpop.f32.mrb[56].mxu1  ;;  %v3129_v34 = vpop.f32.mrb[184].mxu0 }
 0x371   : > { %v9688_v7 = vpack.c.bf16 %v2158_v4, %v2158_v4  ;;  %v9724_v54 = vpack.c.bf16 %v3129_v34, %v3129_v34  ;;  %v2160_v10 = vpop.f32.mrb[57].mxu1  ;;  %v3131_v14 = vpop.f32.mrb[185].mxu0  ;;  %v11192_v4 = vld [vmem:[%s13846_s1 + $0x5a8] ss:$16 sps:$4 sm:$0xff]  }
 0x372   : > { %v2161_v11 = vpop.f32.mrb[58].mxu1  ;;  %v3132_v59 = vpop.f32.mrb[186].mxu0  ;;  %v11193_v34 = vld [vmem:[%s13846_s1 + $0x7e8] ss:$16 sps:$4 sm:$0xff]  }
 0x373   : > { %2365 = vst [vmem:[#allocation2 + $0x4c] sm:$0xf] %v9688_v7  ;;  %3336 = vst [vmem:[#allocation2 + $0x5c] sm:$0xf] %v9724_v54  ;;  %v9689_v17 = vpack.c.bf16 %v2161_v11, %v2161_v11  ;;  %v9725_v46 = vpack.c.bf16 %v3132_v59, %v3132_v59  ;;  %v2163_v1 = vpop.f32.mrb[59].mxu1  ;;  %v3134_v18 = vpop.f32.mrb[187].mxu0 }
 0x374   : > { %v11194_v7 = vld [vmem:[%s13846_s1 + $0x5cc] ss:$16 sps:$4 sm:$0xff]   ;;  %v11198_v10 = vld [vmem:[%s13846_s1 + $0x5c8] ss:$16 sps:$4 sm:$0xff]  }
 0x375   : > { %2366 = vst [vmem:[#allocation2 + $0x8c] sm:$0xf] %v9689_v17  ;;  %3337 = vst [vmem:[#allocation2 + $0x9c] sm:$0xf] %v9725_v46  ;;  %4027 = vmatmul.mubr.bf16.gmra.mrb[92].mxu1 %v11168_v40  ;;  %4998 = vmatmul.mubr.bf16.gmra.mrb[220].mxu0 %v11169_v37  ;;  %v11196_v54 = vld [vmem:[%s13846_s1 + $0x80c] ss:$16 sps:$4 sm:$0xff]  }
 0x376   : > { %4034 = vmatprep.mubr.bf16.mxu1 %v11170_v15  ;;  %5005 = vmatprep.mubr.bf16.mxu0 %v11172_v20  ;;  %v11199_v14 = vld [vmem:[%s13846_s1 + $0x808] ss:$16 sps:$4 sm:$0xff]   ;;  %v11202_v40 = vld [vmem:[%s13846_s1 + $0x5ec] ss:$16 sps:$4 sm:$0xff]  }
 0x377   : > { %v11204_v37 = vld [vmem:[%s13846_s1 + $0x82c] ss:$16 sps:$4 sm:$0xff]   ;;  %v11206_v11 = vld [vmem:[%s13846_s1 + $0x5e8] ss:$16 sps:$4 sm:$0xff]  }
 0x378   : > { %v2166_v23 = vpop.f32.mrb[60].mxu1  ;;  %v3137_v24 = vpop.f32.mrb[188].mxu0  ;;  %v11207_v59 = vld [vmem:[%s13846_s1 + $0x828] ss:$16 sps:$4 sm:$0xff]   ;;  %v11208_v15 = vld [vmem:[%s13846_s1 + $0x60c] ss:$16 sps:$4 sm:$0xff]  }
 0x379   : > { %v9690_v26 = vpack.c.bf16 %v2166_v23, %v2166_v23  ;;  %v9726_v27 = vpack.c.bf16 %v3137_v24, %v3137_v24  ;;  %v2168_v28 = vpop.f32.mrb[61].mxu1  ;;  %v3139_v5 = vpop.f32.mrb[189].mxu0  ;;  %v11210_v20 = vld [vmem:[%s13846_s1 + $0x84c] ss:$16 sps:$4 sm:$0xff]   ;;  %v11212_v17 = vld [vmem:[%s13846_s1 + $0x608] ss:$16 sps:$4 sm:$0xff]  }
 0x37a   : > { %v2169_v21 = vpop.f32.mrb[62].mxu1  ;;  %v3140_v35 = vpop.f32.mrb[190].mxu0  ;;  %v11213_v46 = vld [vmem:[%s13846_s1 + $0x848] ss:$16 sps:$4 sm:$0xff]   ;;  %v11216_v1 = vld [vmem:[%s13846_s1 + $0x62c] ss:$16 sps:$4 sm:$0xff]  }
 0x37b   : > { %2367 = vst [vmem:[#allocation2 + $0xcc] sm:$0xf] %v9690_v26  ;;  %3338 = vst [vmem:[#allocation2 + $0xdc] sm:$0xf] %v9726_v27  ;;  %v9691_v43 = vpack.c.bf16 %v2169_v21, %v2169_v21  ;;  %v9727_v9 = vpack.c.bf16 %v3140_v35, %v3140_v35  ;;  %v2171_v55 = vpop.f32.mrb[63].mxu1  ;;  %v3142_v39 = vpop.f32.mrb[191].mxu0 }
 0x37c   : > { %v11218_v18 = vld [vmem:[%s13846_s1 + $0x86c] ss:$16 sps:$4 sm:$0xff]   ;;  %v11220_v23 = vld [vmem:[%s13846_s1 + $0x628] ss:$16 sps:$4 sm:$0xff]  }
 0x37d   : > { %2368 = vst [vmem:[#allocation2 + $0x10c] sm:$0xf] %v9691_v43  ;;  %3339 = vst [vmem:[#allocation2 + $0x11c] sm:$0xf] %v9727_v9  ;;  %4035 = vmatmul.mubr.bf16.gmra.mrb[96].mxu1 %v11174_v29  ;;  %5006 = vmatmul.mubr.bf16.gmra.mrb[224].mxu0 %v11175_v33  ;;  %v11221_v24 = vld [vmem:[%s13846_s1 + $0x868] ss:$16 sps:$4 sm:$0xff]  }
 0x37e   : > { %4042 = vmatprep.mubr.bf16.mxu1 %v11176_v32  ;;  %5013 = vmatprep.mubr.bf16.mxu0 %v11178_v38  ;;  %v11222_v26 = vld [vmem:[%s13846_s1 + $0x64c] ss:$16 sps:$4 sm:$0xff]   ;;  %v11224_v28 = vld [vmem:[%s13846_s1 + $0x888] ss:$16 sps:$4 sm:$0xff]  }
 0x37f   : > { %v11226_v27 = vld [vmem:[%s13846_s1 + $0x88c] ss:$16 sps:$4 sm:$0xff]   ;;  %v11227_v5 = vld [vmem:[%s13846_s1 + $0x648] ss:$16 sps:$4 sm:$0xff]  }
 0x380   : > { %v2174_v2 = vpop.f32.mrb[64].mxu1  ;;  %v3145_v45 = vpop.f32.mrb[192].mxu0  ;;  %v11228_v29 = vld [vmem:[%s13846_s1 + $0x66c] ss:$16 sps:$4 sm:$0xff]   ;;  %v11230_v21 = vld [vmem:[%s13846_s1 + $0x8a8] ss:$16 sps:$4 sm:$0xff]  }
 0x381   : > { %v9692_v12 = vpack.c.bf16 %v2174_v2, %v2174_v2  ;;  %v9728_v47 = vpack.c.bf16 %v3145_v45, %v3145_v45  ;;  %v2176_v22 = vpop.f32.mrb[65].mxu1  ;;  %v3147_v48 = vpop.f32.mrb[193].mxu0  ;;  %v11232_v33 = vld [vmem:[%s13846_s1 + $0x8ac] ss:$16 sps:$4 sm:$0xff]   ;;  %v11234_v35 = vld [vmem:[%s13846_s1 + $0x668] ss:$16 sps:$4 sm:$0xff]  }
 0x382   : > { %v2177_v41 = vpop.f32.mrb[66].mxu1  ;;  %v3148_v50 = vpop.f32.mrb[194].mxu0  ;;  %v11238_v32 = vld [vmem:[%s13846_s1 + $0x68c] ss:$16 sps:$4 sm:$0xff]   ;;  %v11240_v43 = vld [vmem:[%s13846_s1 + $0x8c8] ss:$16 sps:$4 sm:$0xff]  }
 0x383   : > { %2369 = vst [vmem:[#allocation2 + $0x14c] sm:$0xf] %v9692_v12  ;;  %3340 = vst [vmem:[#allocation2 + $0x15c] sm:$0xf] %v9728_v47  ;;  %v9693_v61 = vpack.c.bf16 %v2177_v41, %v2177_v41  ;;  %v9729_v57 = vpack.c.bf16 %v3148_v50, %v3148_v50  ;;  %v2179_v8 = vpop.f32.mrb[67].mxu1  ;;  %v3150_v58 = vpop.f32.mrb[195].mxu0 }
 0x384   : > { %v11242_v38 = vld [vmem:[%s13846_s1 + $0x8cc] ss:$16 sps:$4 sm:$0xff]   ;;  %v11243_v9 = vld [vmem:[%s13846_s1 + $0x688] ss:$16 sps:$4 sm:$0xff]   ;;  %v5294_v12 = vld [vmem:[#allocation2 + $0x40] sm:$0xff] }
 0x385   : > { %2370 = vst [vmem:[#allocation2 + $0x18c] sm:$0xf] %v9693_v61  ;;  %3341 = vst [vmem:[#allocation2 + $0x19c] sm:$0xf] %v9729_v57  ;;  %4043 = vmatmul.mubr.bf16.gmra.mrb[100].mxu1 %v11180_v31  ;;  %5014 = vmatmul.mubr.bf16.gmra.mrb[228].mxu0 %v11181_v49  ;;  %v11248_v55 = vld [vmem:[%s13846_s1 + $0x6ac] ss:$16 sps:$4 sm:$0xff]  }
 0x386   : > { %4050 = vmatprep.mubr.bf16.mxu1 %v11182_v51  ;;  %5021 = vmatprep.mubr.bf16.mxu0 %v11184_v52  ;;  %v11252_v39 = vld [vmem:[%s13846_s1 + $0x8ec] ss:$16 sps:$4 sm:$0xff]   ;;  %v11250_v2 = vld [vmem:[%s13846_s1 + $0x8e8] ss:$16 sps:$4 sm:$0xff]   ;;  %v5286_v47 = vld [vmem:[#allocation2] sm:$0xff] }
 0x387   : > { %v11253_v45 = vld [vmem:[%s13846_s1 + $0x6a8] ss:$16 sps:$4 sm:$0xff]   ;;  %v9340_v22 = vcombine.high %v5286_v47, %v5294_v12  ;;  %v5310_v48 = vld [vmem:[#allocation2 + $0xc0] sm:$0xff]  ;;  %v9339_v49 = vcombine.low %v5286_v47, %v5294_v12  ;;  %v11262_v61 = vld [vmem:[%s13849_s4 + $0xd0] sm:$0xff]  }
 0x388   : > { %v2182_v19 = vpop.f32.mrb[68].mxu1  ;;  %v3153_v6 = vpop.f32.mrb[196].mxu0  ;;  %v11259_v31 = vld [vmem:[%s13849_s4 + $0x80] sm:$0xff]   ;;  %v11260_v50 = vld [vmem:[%s13849_s4 + $0xc8] sm:$0xff]   ;;  %v11263_v8 = vld [vmem:[%s13849_s4 + $0x90] sm:$0xff]  }
 0x389   : > { %v9694_v62 = vpack.c.bf16 %v2182_v19, %v2182_v19  ;;  %v9730_v25 = vpack.c.bf16 %v3153_v6, %v3153_v6  ;;  %v2184_v30 = vpop.f32.mrb[69].mxu1  ;;  %v3155_v44 = vpop.f32.mrb[197].mxu0  ;;  %v5302_v41 = vld [vmem:[#allocation2 + $0x80] sm:$0xff]  ;;  %v11261_v52 = vld [vmem:[%s13849_s4 + $0x88] sm:$0xff]   ;;  %v11264_v6 = vld [vmem:[%s13849_s4 + $0xd8] sm:$0xff]  }
 0x38a   : > { %v2185_v42 = vpop.f32.mrb[70].mxu1  ;;  %v3156_v16 = vpop.f32.mrb[198].mxu0  ;;  %v9356_v51 = vcombine.high %v5302_v41, %v5310_v48  ;;  %v5326_v57 = vld [vmem:[#allocation2 + $0x140] sm:$0xff]  ;;  %v9355_v58 = vcombine.low %v5302_v41, %v5310_v48  ;;  %v11348_v47 = vld [vmem:[%s13849_s4 + $0x3e8] sm:$0xff]  }
 0x38b   : > { %2371 = vst [vmem:[#allocation2 + $0x1cc] sm:$0xf] %v9694_v62  ;;  %3342 = vst [vmem:[#allocation2 + $0x1dc] sm:$0xf] %v9730_v25  ;;  %v9695_v53 = vpack.c.bf16 %v2185_v42, %v2185_v42  ;;  %v9731_v56 = vpack.c.bf16 %v3156_v16, %v3156_v16  ;;  %v2187_v3 = vpop.f32.mrb[71].mxu1  ;;  %v3158_v13 = vpop.f32.mrb[199].mxu0 }
 0x38c   : > { %v5318_v19 = vld [vmem:[#allocation2 + $0x100] sm:$0xff]  ;;  %v11265_v25 = vld [vmem:[%s13849_s4 + $0x98] sm:$0xff]   ;;  %v11269_v16 = vld [vmem:[%s13849_s4 + $0xe8] sm:$0xff]  }
 0x38d   : > { %2372 = vst [vmem:[#allocation2 + $0x20c] sm:$0xf] %v9695_v53  ;;  %3343 = vst [vmem:[#allocation2 + $0x21c] sm:$0xf] %v9731_v56  ;;  %4051 = vmatmul.mubr.bf16.gmra.mrb[104].mxu1 %v11186_v63  ;;  %5022 = vmatmul.mubr.bf16.gmra.mrb[232].mxu0 %v11187_v60  ;;  %v9372_v62 = vcombine.high %v5318_v19, %v5326_v57  ;;  %v11266_v30 = vld [vmem:[%s13849_s4 + $0xe0] sm:$0xff]   ;;  %v9371_v60 = vcombine.low %v5318_v19, %v5326_v57  ;;  %v11272_v53 = vld [vmem:[%s13849_s4 + $0xf0] sm:$0xff]  }
 0x38e   : > { %4058 = vmatprep.mubr.bf16.mxu1 %v11188_v0  ;;  %5029 = vmatprep.mubr.bf16.mxu0 %v11190_v36  ;;  %v5342_v44 = vld [vmem:[#allocation2 + $0x1c0] sm:$0xff]  ;;  %v11270_v36 = vld [vmem:[%s13849_s4 + $0xa8] sm:$0xff]   ;;  %v11273_v3 = vld [vmem:[%s13849_s4 + $0xb0] sm:$0xff]  }
 0x38f   : > { %v11268_v63 = vld [vmem:[%s13849_s4 + $0xa0] sm:$0xff]   ;;  %v11349_v48 = vld [vmem:[%s13849_s4 + $0x3a8] sm:$0xff]   ;;  %v11290_v57 = vld [vmem:[%s13849_s4 + $0x170] sm:$0xff]  }
 0x390   : > { %v5334_v42 = vld [vmem:[#allocation2 + $0x180] sm:$0xff]  ;;  %v11287_v41 = vld [vmem:[%s13849_s4 + $0x168] sm:$0xff]   ;;  %v11291_v19 = vld [vmem:[%s13849_s4 + $0x130] sm:$0xff]  }
 0x391   : > { %v9388_v0 = vcombine.high %v5334_v42, %v5342_v44  ;;  %v5350_v56 = vld [vmem:[#allocation2 + $0x200] sm:$0xff]  ;;  %v9387_v13 = vcombine.low %v5334_v42, %v5342_v44  ;;  %v11293_v44 = vld [vmem:[%s13849_s4 + $0x138] sm:$0xff]  }
 0x392   : > { %v5343_v12 = vld [vmem:[#allocation2 + $0x1c8] sm:$0xff] }
 0x395   : > { %4059 = vmatmul.mubr.bf16.gmra.mrb[108].mxu1 %v11192_v4  ;;  %5030 = vmatmul.mubr.bf16.gmra.mrb[236].mxu0 %v11193_v34  ;;  %v11274_v4 = vld [vmem:[%s13849_s4 + $0xf8] sm:$0xff]   ;;  %v9404_v34 = vcombine.high %v5350_v56, %v5350_v56 }
 0x396   : > { %4066 = vmatprep.mubr.bf16.mxu1 %v11194_v7  ;;  %5037 = vmatprep.mubr.bf16.mxu0 %v11196_v54  ;;  %v11275_v7 = vld [vmem:[%s13849_s4 + $0xb8] sm:$0xff]   ;;  %v11276_v54 = vld [vmem:[%s13849_s4 + $0x140] sm:$0xff]  }
 0x39d   : > { %4067 = vmatmul.mubr.bf16.gmra.mrb[112].mxu1 %v11198_v10  ;;  %5038 = vmatmul.mubr.bf16.gmra.mrb[240].mxu0 %v11199_v14  ;;  %v5295_v10 = vld [vmem:[#allocation2 + $0x48] sm:$0xff]  ;;  %v9403_v14 = vcombine.low %v5350_v56, %v5350_v56  ;;  %v5296_v56 = vld [vmem:[#allocation2 + $0x50] sm:$0xff] }
 0x39e   : > { %4074 = vmatprep.mubr.bf16.mxu1 %v11202_v40  ;;  %5045 = vmatprep.mubr.bf16.mxu0 %v11204_v37  ;;  %v5287_v40 = vld [vmem:[#allocation2 + $0x8] sm:$0xff] }
 0x39f   : > { %v9342_v37 = vcombine.high %v5287_v40, %v5295_v10 }
 0x3a5   : > { %4075 = vmatmul.mubr.bf16.gmra.mrb[116].mxu1 %v11206_v11  ;;  %5046 = vmatmul.mubr.bf16.gmra.mrb[244].mxu0 %v11207_v59  ;;  %v11330_v11 = vld [vmem:[%s13849_s4 + $0x3c0] sm:$0xff]  }
 0x3a6   : > { %4082 = vmatprep.mubr.bf16.mxu1 %v11208_v15  ;;  %5053 = vmatprep.mubr.bf16.mxu0 %v11210_v20  ;;  %v11331_v59 = vld [vmem:[%s13849_s4 + $0x380] sm:$0xff]   ;;  %v5311_v15 = vld [vmem:[#allocation2 + $0xc8] sm:$0xff] }
 0x3a7   : > { %10149 = vmatprep.subr.bf16.mxu0 %v11330_v11  ;;  %v11332_v20 = vld [vmem:[%s13849_s4 + $0x3c8] sm:$0xff]  }
 0x3a8   : > { %10150 = vmatpush3.bf16.msra.mxu0 %v11331_v59 }
 0x3a9   : > { %10151 = vmatprep.subr.bf16.mxu0 %v11332_v20 }
 0x3ad   : > { %4083 = vmatmul.mubr.bf16.gmra.mrb[120].mxu1 %v11212_v17  ;;  %5054 = vmatmul.mubr.bf16.gmra.mrb[248].mxu0 %v11213_v46  ;;  %v11277_v17 = vld [vmem:[%s13849_s4 + $0x100] sm:$0xff]   ;;  %v11333_v46 = vld [vmem:[%s13849_s4 + $0x388] sm:$0xff]  }
 0x3ae   : > { %4090 = vmatprep.mubr.bf16.mxu1 %v11216_v1  ;;  %5061 = vmatprep.mubr.bf16.mxu0 %v11218_v18  ;;  %v9341_v1 = vcombine.low %v5287_v40, %v5295_v10  ;;  %v5303_v18 = vld [vmem:[#allocation2 + $0x88] sm:$0xff] }
 0x3af   : > { %10152 = vmatpush3.bf16.msra.mxu0 %v11333_v46  ;;  %v5312_v46 = vld [vmem:[#allocation2 + $0xd0] sm:$0xff] }
 0x3b5   : > { %4091 = vmatmul.mubr.bf16.gmra.mrb[124].mxu1 %v11220_v23  ;;  %5062 = vmatmul.mubr.bf16.gmra.mrb[252].mxu0 %v11221_v24  ;;  %v11278_v23 = vld [vmem:[%s13849_s4 + $0x148] sm:$0xff]   ;;  %v9358_v24 = vcombine.high %v5303_v18, %v5311_v15 }
 0x3b6   : > { %4098 = vmatprep.mubr.bf16.mxu1 %v11222_v26  ;;  %5069 = vmatprep.mubr.bf16.mxu0 %v11226_v27  ;;  %v11336_v26 = vld [vmem:[%s13849_s4 + $0x3d0] sm:$0xff]   ;;  %v11279_v27 = vld [vmem:[%s13849_s4 + $0x108] sm:$0xff]  }
 0x3b7   : > { %10153 = vmatprep.subr.bf16.mxu0 %v11336_v26 }
 0x3bd   : > { %4099 = vmatmul.mubr.bf16.gmra.mrb[128].mxu1 %v11227_v5  ;;  %5070 = vmatmul.mubr.bf16.gmra.mrb[0].mxu0 %v11224_v28  ;;  %v11337_v28 = vld [vmem:[%s13849_s4 + $0x390] sm:$0xff]  }
 0x3be   : > { %4106 = vmatprep.mubr.bf16.mxu1 %v11228_v29  ;;  %5077 = vmatprep.mubr.bf16.mxu0 %v11232_v33  ;;  %v11280_v5 = vld [vmem:[%s13849_s4 + $0x150] sm:$0xff]   ;;  %v5327_v29 = vld [vmem:[#allocation2 + $0x148] sm:$0xff]  ;;  %v11340_v33 = vld [vmem:[%s13849_s4 + $0x3d8] sm:$0xff]  }
 0x3bf   : > { %10154 = vmatpush3.bf16.msra.mxu0 %v11337_v28 }
 0x3c0   : > { %10155 = vmatprep.subr.bf16.mxu0 %v11340_v33  ;;  %v11296_v33 = vld [vmem:[%s13849_s4 + $0x1c8] sm:$0xff]  }
 0x3c5   : > { %4107 = vmatmul.mubr.bf16.gmra.mrb[132].mxu1 %v11234_v35  ;;  %5078 = vmatmul.mubr.bf16.gmra.mrb[4].mxu0 %v11230_v21  ;;  %v11281_v21 = vld [vmem:[%s13849_s4 + $0x110] sm:$0xff]   ;;  %v11341_v35 = vld [vmem:[%s13849_s4 + $0x398] sm:$0xff]  }
 0x3c6   : > { %4114 = vmatprep.mubr.bf16.mxu1 %v11238_v32  ;;  %5085 = vmatprep.mubr.bf16.mxu0 %v11242_v38  ;;  %v9357_v32 = vcombine.low %v5303_v18, %v5311_v15  ;;  %v5319_v38 = vld [vmem:[#allocation2 + $0x108] sm:$0xff] }
 0x3c7   : > { %10156 = vmatpush3.bf16.msra.mxu0 %v11341_v35  ;;  %v11297_v35 = vld [vmem:[%s13849_s4 + $0x188] sm:$0xff]  }
 0x3cd   : > { %4115 = vmatmul.mubr.bf16.gmra.mrb[136].mxu1 %v11243_v9  ;;  %5086 = vmatmul.mubr.bf16.gmra.mrb[8].mxu0 %v11240_v43  ;;  %v11282_v43 = vld [vmem:[%s13849_s4 + $0x158] sm:$0xff]   ;;  %v9374_v9 = vcombine.high %v5319_v38, %v5327_v29 }
 0x3ce   : > { %4122 = vmatprep.mubr.bf16.mxu1 %v11248_v55  ;;  %5093 = vmatprep.mubr.bf16.mxu0 %v11252_v39  ;;  %v11344_v55 = vld [vmem:[%s13849_s4 + $0x3e0] sm:$0xff]   ;;  %v11283_v39 = vld [vmem:[%s13849_s4 + $0x118] sm:$0xff]  }
 0x3cf   : > { %10157 = vmatprep.subr.bf16.mxu0 %v11344_v55 }
 0x3d5   : > { %4123 = vmatmul.mubr.bf16.gmra.mrb[140].mxu1 %v11253_v45  ;;  %5094 = vmatmul.mubr.bf16.gmra.mrb[12].mxu0 %v11250_v2  ;;  %v11345_v2 = vld [vmem:[%s13849_s4 + $0x3a0] sm:$0xff]  }
 0x3d6   : > { %6797 = vmatprep.mubr.bf16.mxu1 %v9340_v22  ;;  %v11284_v45 = vld [vmem:[%s13849_s4 + $0x160] sm:$0xff]   ;;  %10158 = vmatpush3.bf16.msra.mxu0 %v11345_v2 }
 0x3d7   : > { %v11286_v22 = vld [vmem:[%s13849_s4 + $0x120] sm:$0xff]   ;;  %10159 = vmatprep.subr.bf16.mxu0 %v11348_v47 }
 0x3da   : > { %10160 = vmatpush3.bf16.msra.mxu0 %v11349_v48 }
 0x3dd   : > { %6798 = vmatmul.mubr.bf16.vlgmr.msra.gmra.mrb[144].mxu1 %v9339_v49  ;;  %v5335_v49 = vld [vmem:[#allocation2 + $0x188] sm:$0xff] }
 0x3de   : > { %6805 = vmatprep.mubr.bf16.mxu1 %v9356_v51  ;;  %9874 = vmatpush3.bf16.msra.mxu1 %v11259_v31  ;;  %v9373_v31 = vcombine.low %v5319_v38, %v5327_v29  ;;  %v11353_v51 = vld [vmem:[%s13849_s4 + $0x3f0] sm:$0xff]  }
 0x3df   : > { %9875 = vmatprep.subr.bf16.mxu1 %v11260_v50  ;;  %v9390_v50 = vcombine.high %v5335_v49, %v5343_v12  ;;  %10161 = vmatprep.subr.bf16.mxu0 %v11353_v51  ;;  %v5304_v29 = vld [vmem:[#allocation2 + $0x90] sm:$0xff] }
 0x3e0   : > { %v5320_v51 = vld [vmem:[#allocation2 + $0x110] sm:$0xff] }
 0x3e2   : > { %9876 = vmatpush3.bf16.msra.mxu1 %v11261_v52  ;;  %v11288_v52 = vld [vmem:[%s13849_s4 + $0x128] sm:$0xff]  }
 0x3e3   : > { %9877 = vmatprep.subr.bf16.mxu1 %v11262_v61  ;;  %v11354_v61 = vld [vmem:[%s13849_s4 + $0x3b0] sm:$0xff]  }
 0x3e4   : > { %10162 = vmatpush3.bf16.msra.mxu0 %v11354_v61 }
 0x3e5   : > { %6806 = vmatmul.mubr.bf16.gmra.mrb[148].mxu1 %v9355_v58  ;;  %v11357_v58 = vld [vmem:[%s13849_s4 + $0x3f8] sm:$0xff]  }
 0x3e6   : > { %6813 = vmatprep.mubr.bf16.mxu1 %v9372_v62  ;;  %9878 = vmatpush3.bf16.msra.mxu1 %v11263_v8  ;;  %v5351_v8 = vld [vmem:[#allocation2 + $0x208] sm:$0xff]  ;;  %v9389_v62 = vcombine.low %v5335_v49, %v5343_v12 }
 0x3e7   : > { %9879 = vmatprep.subr.bf16.mxu1 %v11264_v6  ;;  %v11358_v6 = vld [vmem:[%s13849_s4 + $0x3b8] sm:$0xff]   ;;  %10163 = vmatprep.subr.bf16.mxu0 %v11357_v58  ;;  %v9405_v10 = vcombine.low %v5351_v8, %v5351_v8 }
 0x3e8   : > { %10164 = vmatpush3.bf16.msra.mxu0 %v11358_v6 }
 0x3ea   : > { %9880 = vmatpush3.bf16.msra.mxu1 %v11265_v25  ;;  %v11292_v25 = vld [vmem:[%s13849_s4 + $0x178] sm:$0xff]  }
 0x3eb   : > { %9881 = vmatprep.subr.bf16.mxu1 %v11266_v30  ;;  %v9406_v30 = vcombine.high %v5351_v8, %v5351_v8  ;;  %v11302_v8 = vld [vmem:[%s13849_s4 + $0x1e0] sm:$0xff]  }
 0x3ed   : > { %6814 = vmatmul.mubr.bf16.gmra.mrb[152].mxu1 %v9371_v60 }
 0x3ee   : > { %6821 = vmatprep.mubr.bf16.mxu1 %v9388_v0  ;;  %9882 = vmatpush3.bf16.msra.mxu1 %v11268_v63  ;;  %v11294_v63 = vld [vmem:[%s13849_s4 + $0x1c0] sm:$0xff]  }
 0x3ef   : > { %9883 = vmatprep.subr.bf16.mxu1 %v11269_v16 }
 0x3f2   : > { %9884 = vmatpush3.bf16.msra.mxu1 %v11270_v36 }
 0x3f3   : > { %9885 = vmatprep.subr.bf16.mxu1 %v11272_v53 }
 0x3f5   : > { %6822 = vmatmul.mubr.bf16.gmra.mrb[156].mxu1 %v9387_v13 }
 0x3f6   : > { %6829 = vmatprep.mubr.bf16.mxu1 %v9404_v34  ;;  %9886 = vmatpush3.bf16.msra.mxu1 %v11273_v3 }
 0x3f7   : > { %9887 = vmatprep.subr.bf16.mxu1 %v11274_v4 }
 0x3fa   : > { %9888 = vmatpush3.bf16.msra.mxu1 %v11275_v7 }
 0x3fb   : > { %9919 = vmatprep.subr.bf16.mxu1 %v11276_v54 }
 0x3fd   : > { %6830 = vmatmul.mubr.bf16.gmra.mrb[160].mxu1 %v9403_v14  ;;  %v5288_v14 = vld [vmem:[#allocation2 + $0x10] sm:$0xff] }
 0x3fe   : > { %6869 = vmatprep.mubr.bf16.mxu1 %v9342_v37  ;;  %v9344_v40 = vcombine.high %v5288_v14, %v5296_v56 }
 0x405   : > { %6870 = vmatmul.mubr.bf16.vlgmr.msra.gmra.mrb[164].mxu1 %v9341_v1 }
 0x406   : > { %6877 = vmatprep.mubr.bf16.mxu1 %v9358_v24  ;;  %9920 = vmatpush3.bf16.msra.mxu1 %v11277_v17  ;;  %v9343_v24 = vcombine.low %v5288_v14, %v5296_v56 }
 0x407   : > { %9921 = vmatprep.subr.bf16.mxu1 %v11278_v23  ;;  %v11295_v23 = vld [vmem:[%s13849_s4 + $0x180] sm:$0xff]  }
 0x40a   : > { %9922 = vmatpush3.bf16.msra.mxu1 %v11279_v27 }
 0x40b   : > { %9923 = vmatprep.subr.bf16.mxu1 %v11280_v5 }
 0x40d   : > { %6878 = vmatmul.mubr.bf16.gmra.mrb[168].mxu1 %v9357_v32  ;;  %v11298_v32 = vld [vmem:[%s13849_s4 + $0x1d0] sm:$0xff]  }
 0x40e   : > { %6885 = vmatprep.mubr.bf16.mxu1 %v9374_v9  ;;  %9924 = vmatpush3.bf16.msra.mxu1 %v11281_v21  ;;  %v9360_v21 = vcombine.high %v5304_v29, %v5312_v46 }
 0x40f   : > { %9925 = vmatprep.subr.bf16.mxu1 %v11282_v43 }
 0x412   : > { %9926 = vmatpush3.bf16.msra.mxu1 %v11283_v39 }
 0x413   : > { %9927 = vmatprep.subr.bf16.mxu1 %v11284_v45  ;;  %v5328_v45 = vld [vmem:[#allocation2 + $0x150] sm:$0xff] }
 0x414   : > { %v9376_v61 = vcombine.high %v5320_v51, %v5328_v45  ;;  %v9375_v56 = vcombine.low %v5320_v51, %v5328_v45 }
 0x415   : > { %6886 = vmatmul.mubr.bf16.gmra.mrb[172].mxu1 %v9373_v31 }
 0x416   : > { %6893 = vmatprep.mubr.bf16.mxu1 %v9390_v50  ;;  %9928 = vmatpush3.bf16.msra.mxu1 %v11286_v22  ;;  %v11299_v22 = vld [vmem:[%s13849_s4 + $0x190] sm:$0xff]   ;;  %v9359_v50 = vcombine.low %v5304_v29, %v5312_v46 }
 0x417   : > { %9929 = vmatprep.subr.bf16.mxu1 %v11287_v41 }
 0x41a   : > { %9930 = vmatpush3.bf16.msra.mxu1 %v11288_v52  ;;  %v11300_v52 = vld [vmem:[%s13849_s4 + $0x1d8] sm:$0xff]  }
 0x41b   : > { %9931 = vmatprep.subr.bf16.mxu1 %v11290_v57  ;;  %v11301_v57 = vld [vmem:[%s13849_s4 + $0x198] sm:$0xff]  }
 0x41d   : > { %6894 = vmatmul.mubr.bf16.gmra.mrb[176].mxu1 %v9389_v62 }
 0x41e   : > { %6901 = vmatprep.mubr.bf16.mxu1 %v9406_v30  ;;  %9932 = vmatpush3.bf16.msra.mxu1 %v11291_v19 }
 0x41f   : > { %9933 = vmatprep.subr.bf16.mxu1 %v11292_v25 }
 0x420   : > { %v3988_v60 = vpop.f32.mrb[72].mxu1  ;;  %v4959_v42 = vpop.f32.mrb[200].mxu0 }
 0x421   : > { %v9732_v16 = vpack.c.bf16 %v3988_v60, %v3988_v60  ;;  %v9768_v0 = vpack.c.bf16 %v4959_v42, %v4959_v42  ;;  %v3990_v36 = vpop.f32.mrb[73].mxu1  ;;  %v4961_v53 = vpop.f32.mrb[201].mxu0  ;;  %v11304_v42 = vld [vmem:[%s13849_s4 + $0x1a0] sm:$0xff]  }
 0x422   : > { %v3991_v3 = vpop.f32.mrb[74].mxu1  ;;  %v4962_v13 = vpop.f32.mrb[202].mxu0  ;;  %9934 = vmatpush3.bf16.msra.mxu1 %v11293_v44  ;;  %v5344_v44 = vld [vmem:[#allocation2 + $0x1d0] sm:$0xff] }
 0x423   : > { %4168 = vst [vmem:[#allocation2 + $0x20] sm:$0xf] %v9732_v16  ;;  %5139 = vst [vmem:[#allocation2 + $0x30] sm:$0xf] %v9768_v0  ;;  %v9733_v4 = vpack.c.bf16 %v3991_v3, %v3991_v3  ;;  %v9769_v34 = vpack.c.bf16 %v4962_v13, %v4962_v13  ;;  %v3993_v7 = vpop.f32.mrb[75].mxu1  ;;  %v4964_v54 = vpop.f32.mrb[203].mxu0  ;;  %9965 = vmatprep.subr.bf16.mxu1 %v11294_v63 }
 0x424   : > { %v5336_v3 = vld [vmem:[#allocation2 + $0x190] sm:$0xff]  ;;  %v11305_v13 = vld [vmem:[%s13849_s4 + $0x1e8] sm:$0xff]  }
 0x425   : > { %4169 = vst [vmem:[#allocation2 + $0x60] sm:$0xf] %v9733_v4  ;;  %5140 = vst [vmem:[#allocation2 + $0x70] sm:$0xf] %v9769_v34  ;;  %6902 = vmatmul.mubr.bf16.gmra.mrb[180].mxu1 %v9405_v10  ;;  %v9392_v4 = vcombine.high %v5336_v3, %v5344_v44  ;;  %v11306_v34 = vld [vmem:[%s13849_s4 + $0x1a8] sm:$0xff]   ;;  %v11308_v7 = vld [vmem:[%s13849_s4 + $0x1f0] sm:$0xff]  }
 0x426   : > { %6941 = vmatprep.mubr.bf16.mxu1 %v9344_v40 }
 0x428   : > { %v3996_v37 = vpop.f32.mrb[76].mxu1  ;;  %v4967_v11 = vpop.f32.mrb[204].mxu0 }
 0x429   : > { %v9734_v59 = vpack.c.bf16 %v3996_v37, %v3996_v37  ;;  %v9770_v15 = vpack.c.bf16 %v4967_v11, %v4967_v11  ;;  %v3998_v20 = vpop.f32.mrb[77].mxu1  ;;  %v4969_v17 = vpop.f32.mrb[205].mxu0 }
 0x42a   : > { %v3999_v1 = vpop.f32.mrb[78].mxu1  ;;  %v4970_v18 = vpop.f32.mrb[206].mxu0  ;;  %v11309_v17 = vld [vmem:[%s13849_s4 + $0x1b0] sm:$0xff]  }
 0x42b   : > { %4170 = vst [vmem:[#allocation2 + $0xa0] sm:$0xf] %v9734_v59  ;;  %5141 = vst [vmem:[#allocation2 + $0xb0] sm:$0xf] %v9770_v15  ;;  %v9735_v26 = vpack.c.bf16 %v3999_v1, %v3999_v1  ;;  %v9771_v27 = vpack.c.bf16 %v4970_v18, %v4970_v18  ;;  %v4001_v28 = vpop.f32.mrb[79].mxu1  ;;  %v4972_v5 = vpop.f32.mrb[207].mxu0 }
 0x42c   : > { %v5352_v59 = vld [vmem:[#allocation2 + $0x210] sm:$0xff]  ;;  %v11311_v28 = vld [vmem:[%s13849_s4 + $0x1b8] sm:$0xff]   ;;  %v11312_v5 = vld [vmem:[%s13849_s4 + $0x240] sm:$0xff]  }
 0x42d   : > { %4171 = vst [vmem:[#allocation2 + $0xe0] sm:$0xf] %v9735_v26  ;;  %5142 = vst [vmem:[#allocation2 + $0xf0] sm:$0xf] %v9771_v27  ;;  %6942 = vmatmul.mubr.bf16.vlgmr.msra.gmra.mrb[184].mxu1 %v9343_v24  ;;  %v9391_v24 = vcombine.low %v5336_v3, %v5344_v44  ;;  %v11310_v26 = vld [vmem:[%s13849_s4 + $0x1f8] sm:$0xff]   ;;  %v9408_v27 = vcombine.high %v5352_v59, %v5352_v59 }
 0x42e   : > { %6949 = vmatprep.mubr.bf16.mxu1 %v9360_v21  ;;  %9966 = vmatpush3.bf16.msra.mxu1 %v11295_v23  ;;  %v5305_v44 = vld [vmem:[#allocation2 + $0x98] sm:$0xff] }
 0x42f   : > { %9967 = vmatprep.subr.bf16.mxu1 %v11296_v33 }
 0x430   : > { %v4004_v38 = vpop.f32.mrb[80].mxu1  ;;  %v4975_v43 = vpop.f32.mrb[208].mxu0 }
 0x431   : > { %v9736_v9 = vpack.c.bf16 %v4004_v38, %v4004_v38  ;;  %v9772_v55 = vpack.c.bf16 %v4975_v43, %v4975_v43  ;;  %v4006_v39 = vpop.f32.mrb[81].mxu1  ;;  %v4977_v2 = vpop.f32.mrb[209].mxu0  ;;  %v5297_v43 = vld [vmem:[#allocation2 + $0x58] sm:$0xff] }
 0x432   : > { %v4007_v12 = vpop.f32.mrb[82].mxu1  ;;  %v4978_v47 = vpop.f32.mrb[210].mxu0  ;;  %9968 = vmatpush3.bf16.msra.mxu1 %v11297_v35 }
 0x433   : > { %4172 = vst [vmem:[#allocation2 + $0x120] sm:$0xf] %v9736_v9  ;;  %5143 = vst [vmem:[#allocation2 + $0x130] sm:$0xf] %v9772_v55  ;;  %v9737_v48 = vpack.c.bf16 %v4007_v12, %v4007_v12  ;;  %v9773_v31 = vpack.c.bf16 %v4978_v47, %v4978_v47  ;;  %v4009_v49 = vpop.f32.mrb[83].mxu1  ;;  %v4980_v41 = vpop.f32.mrb[211].mxu0  ;;  %9969 = vmatprep.subr.bf16.mxu1 %v11298_v32  ;;  %v9407_v47 = vcombine.low %v5352_v59, %v5352_v59 }
 0x434   : > { %v5321_v59 = vld [vmem:[#allocation2 + $0x118] sm:$0xff] }
 0x435   : > { %4173 = vst [vmem:[#allocation2 + $0x160] sm:$0xf] %v9737_v48  ;;  %5144 = vst [vmem:[#allocation2 + $0x170] sm:$0xf] %v9773_v31  ;;  %6950 = vmatmul.mubr.bf16.gmra.mrb[188].mxu1 %v9359_v50 }
 0x436   : > { %6957 = vmatprep.mubr.bf16.mxu1 %v9376_v61  ;;  %9970 = vmatpush3.bf16.msra.mxu1 %v11299_v22  ;;  %v5289_v22 = vld [vmem:[#allocation2 + $0x18] sm:$0xff] }
 0x437   : > { %9971 = vmatprep.subr.bf16.mxu1 %v11300_v52  ;;  %v9346_v48 = vcombine.high %v5289_v22, %v5297_v43  ;;  %v5313_v61 = vld [vmem:[#allocation2 + $0xd8] sm:$0xff] }
 0x438   : > { %v4012_v58 = vpop.f32.mrb[84].mxu1  ;;  %v4983_v19 = vpop.f32.mrb[212].mxu0 }
 0x439   : > { %v9738_v6 = vpack.c.bf16 %v4012_v58, %v4012_v58  ;;  %v9774_v62 = vpack.c.bf16 %v4983_v19, %v4983_v19  ;;  %v4014_v25 = vpop.f32.mrb[85].mxu1  ;;  %v4985_v30 = vpop.f32.mrb[213].mxu0  ;;  %v11313_v58 = vld [vmem:[%s13849_s4 + $0x200] sm:$0xff]   ;;  %v9345_v19 = vcombine.low %v5289_v22, %v5297_v43 }
 0x43a   : > { %v4015_v63 = vpop.f32.mrb[86].mxu1  ;;  %v4986_v60 = vpop.f32.mrb[214].mxu0  ;;  %9972 = vmatpush3.bf16.msra.mxu1 %v11301_v57 }
 0x43b   : > { %4174 = vst [vmem:[#allocation2 + $0x1a0] sm:$0xf] %v9738_v6  ;;  %5145 = vst [vmem:[#allocation2 + $0x1b0] sm:$0xf] %v9774_v62  ;;  %v9739_v16 = vpack.c.bf16 %v4015_v63, %v4015_v63  ;;  %v9775_v0 = vpack.c.bf16 %v4986_v60, %v4986_v60  ;;  %v4017_v36 = vpop.f32.mrb[87].mxu1  ;;  %v4988_v53 = vpop.f32.mrb[215].mxu0  ;;  %9973 = vmatprep.subr.bf16.mxu1 %v11302_v8  ;;  %v9362_v60 = vcombine.high %v5305_v44, %v5313_v61 }
 0x43c   : > { %v11314_v63 = vld [vmem:[%s13849_s4 + $0x248] sm:$0xff]  }
 0x43d   : > { %4175 = vst [vmem:[#allocation2 + $0x1e0] sm:$0xf] %v9739_v16  ;;  %5146 = vst [vmem:[#allocation2 + $0x1f0] sm:$0xf] %v9775_v0  ;;  %6958 = vmatmul.mubr.bf16.gmra.mrb[192].mxu1 %v9375_v56  ;;  %v11316_v16 = vld [vmem:[%s13849_s4 + $0x250] sm:$0xff]  }
 0x43e   : > { %6965 = vmatprep.mubr.bf16.mxu1 %v9392_v4  ;;  %9974 = vmatpush3.bf16.msra.mxu1 %v11304_v42  ;;  %v11315_v42 = vld [vmem:[%s13849_s4 + $0x208] sm:$0xff]   ;;  %v5329_v4 = vld [vmem:[#allocation2 + $0x158] sm:$0xff] }
 0x43f   : > { %9975 = vmatprep.subr.bf16.mxu1 %v11305_v13  ;;  %v9377_v43 = vcombine.low %v5321_v59, %v5329_v4 }
 0x440   : > { %v4020_v54 = vpop.f32.mrb[88].mxu1  ;;  %v4991_v10 = vpop.f32.mrb[216].mxu0 }
 0x441   : > { %v9740_v14 = vpack.c.bf16 %v4020_v54, %v4020_v54  ;;  %v9776_v40 = vpack.c.bf16 %v4991_v10, %v4991_v10  ;;  %v4022_v37 = vpop.f32.mrb[89].mxu1  ;;  %v4993_v11 = vpop.f32.mrb[217].mxu0  ;;  %v11317_v54 = vld [vmem:[%s13849_s4 + $0x210] sm:$0xff]  }
 0x442   : > { %v4023_v15 = vpop.f32.mrb[90].mxu1  ;;  %v4994_v20 = vpop.f32.mrb[218].mxu0  ;;  %9976 = vmatpush3.bf16.msra.mxu1 %v11306_v34  ;;  %v9361_v11 = vcombine.low %v5305_v44, %v5313_v61 }
 0x443   : > { %4176 = vst [vmem:[#allocation2 + $0x220] sm:$0xf] %v9740_v14  ;;  %5147 = vst [vmem:[#allocation2 + $0x230] sm:$0xf] %v9776_v40  ;;  %v9741_v46 = vpack.c.bf16 %v4023_v15, %v4023_v15  ;;  %v9777_v1 = vpack.c.bf16 %v4994_v20, %v4994_v20  ;;  %v4025_v18 = vpop.f32.mrb[91].mxu1  ;;  %v4996_v23 = vpop.f32.mrb[219].mxu0  ;;  %9977 = vmatprep.subr.bf16.mxu1 %v11308_v7  ;;  %v9378_v20 = vcombine.high %v5321_v59, %v5329_v4 }
 0x444   : > { %v11318_v15 = vld [vmem:[%s13849_s4 + $0x258] sm:$0xff]  }
 0x445   : > { %4214 = vst [vmem:[#allocation2 + $0x24] sm:$0xf] %v9741_v46  ;;  %5185 = vst [vmem:[#allocation2 + $0x34] sm:$0xf] %v9777_v1  ;;  %6966 = vmatmul.mubr.bf16.gmra.mrb[196].mxu1 %v9391_v24  ;;  %v11320_v46 = vld [vmem:[%s13849_s4 + $0x260] sm:$0xff]  }
 0x446   : > { %6973 = vmatprep.mubr.bf16.mxu1 %v9408_v27  ;;  %9978 = vmatpush3.bf16.msra.mxu1 %v11309_v17  ;;  %v11319_v17 = vld [vmem:[%s13849_s4 + $0x218] sm:$0xff]  }
 0x447   : > { %9979 = vmatprep.subr.bf16.mxu1 %v11310_v26 }
 0x448   : > { %v4028_v29 = vpop.f32.mrb[92].mxu1  ;;  %v4999_v33 = vpop.f32.mrb[220].mxu0 }
 0x449   : > { %v9742_v21 = vpack.c.bf16 %v4028_v29, %v4028_v29  ;;  %v9778_v35 = vpack.c.bf16 %v4999_v33, %v4999_v33  ;;  %v4030_v32 = vpop.f32.mrb[93].mxu1  ;;  %v5001_v38 = vpop.f32.mrb[221].mxu0  ;;  %v11322_v33 = vld [vmem:[%s13849_s4 + $0x220] sm:$0xff]  }
 0x44a   : > { %v4031_v9 = vpop.f32.mrb[94].mxu1  ;;  %v5002_v55 = vpop.f32.mrb[222].mxu0  ;;  %9980 = vmatpush3.bf16.msra.mxu1 %v11311_v28  ;;  %v5345_v28 = vld [vmem:[#allocation2 + $0x1d8] sm:$0xff] }
 0x44b   : > { %4215 = vst [vmem:[#allocation2 + $0x64] sm:$0xf] %v9742_v21  ;;  %5186 = vst [vmem:[#allocation2 + $0x74] sm:$0xf] %v9778_v35  ;;  %v9743_v39 = vpack.c.bf16 %v4031_v9, %v4031_v9  ;;  %v9779_v2 = vpack.c.bf16 %v5002_v55, %v5002_v55  ;;  %v4033_v45 = vpop.f32.mrb[95].mxu1  ;;  %v5004_v12 = vpop.f32.mrb[223].mxu0  ;;  %10011 = vmatprep.subr.bf16.mxu1 %v11312_v5 }
 0x44c   : > { %v5337_v9 = vld [vmem:[#allocation2 + $0x198] sm:$0xff]  ;;  %v11323_v55 = vld [vmem:[%s13849_s4 + $0x268] sm:$0xff]   ;;  %v11326_v45 = vld [vmem:[%s13849_s4 + $0x270] sm:$0xff]  }
 0x44d   : > { %4216 = vst [vmem:[#allocation2 + $0xa4] sm:$0xf] %v9743_v39  ;;  %5187 = vst [vmem:[#allocation2 + $0xb4] sm:$0xf] %v9779_v2  ;;  %6974 = vmatmul.mubr.bf16.gmra.mrb[200].mxu1 %v9407_v47  ;;  %v9394_v39 = vcombine.high %v5337_v9, %v5345_v28  ;;  %v11324_v2 = vld [vmem:[%s13849_s4 + $0x228] sm:$0xff]  }
 0x44e   : > { %7013 = vmatprep.mubr.bf16.mxu1 %v9346_v48 }
 0x450   : > { %v4036_v31 = vpop.f32.mrb[96].mxu1  ;;  %v5007_v49 = vpop.f32.mrb[224].mxu0 }
 0x451   : > { %v9744_v41 = vpack.c.bf16 %v4036_v31, %v4036_v31  ;;  %v9780_v50 = vpack.c.bf16 %v5007_v49, %v5007_v49  ;;  %v4038_v51 = vpop.f32.mrb[97].mxu1  ;;  %v5009_v52 = vpop.f32.mrb[225].mxu0 }
 0x452   : > { %v4039_v57 = vpop.f32.mrb[98].mxu1  ;;  %v5010_v8 = vpop.f32.mrb[226].mxu0  ;;  %v11327_v52 = vld [vmem:[%s13849_s4 + $0x230] sm:$0xff]  }
 0x453   : > { %4217 = vst [vmem:[#allocation2 + $0xe4] sm:$0xf] %v9744_v41  ;;  %5188 = vst [vmem:[#allocation2 + $0xf4] sm:$0xf] %v9780_v50  ;;  %v9745_v6 = vpack.c.bf16 %v4039_v57, %v4039_v57  ;;  %v9781_v62 = vpack.c.bf16 %v5010_v8, %v5010_v8  ;;  %v4041_v25 = vpop.f32.mrb[99].mxu1  ;;  %v5012_v30 = vpop.f32.mrb[227].mxu0 }
 0x454   : > { %v5353_v41 = vld [vmem:[#allocation2 + $0x218] sm:$0xff]  ;;  %v11334_v30 = vld [vmem:[%s13849_s4 + $0x2c0] sm:$0xff]  }
 0x455   : > { %4218 = vst [vmem:[#allocation2 + $0x124] sm:$0xf] %v9745_v6  ;;  %5189 = vst [vmem:[#allocation2 + $0x134] sm:$0xf] %v9781_v62  ;;  %7014 = vmatmul.mubr.bf16.vlgmr.msra.gmra.mrb[204].mxu1 %v9345_v19  ;;  %v9393_v19 = vcombine.low %v5337_v9, %v5345_v28  ;;  %v11328_v6 = vld [vmem:[%s13849_s4 + $0x278] sm:$0xff]   ;;  %v9410_v62 = vcombine.high %v5353_v41, %v5353_v41  ;;  %v5306_v28 = vld [vmem:[#allocation2 + $0xa0] sm:$0xff] }
 0x456   : > { %7021 = vmatprep.mubr.bf16.mxu1 %v9362_v60  ;;  %10012 = vmatpush3.bf16.msra.mxu1 %v11313_v58  ;;  %v11329_v25 = vld [vmem:[%s13849_s4 + $0x238] sm:$0xff]  }
 0x457   : > { %10013 = vmatprep.subr.bf16.mxu1 %v11314_v63 }
 0x458   : > { %v4044_v0 = vpop.f32.mrb[100].mxu1  ;;  %v5015_v36 = vpop.f32.mrb[228].mxu0 }
 0x459   : > { %v9746_v53 = vpack.c.bf16 %v4044_v0, %v4044_v0  ;;  %v9782_v56 = vpack.c.bf16 %v5015_v36, %v5015_v36  ;;  %v4046_v3 = vpop.f32.mrb[101].mxu1  ;;  %v5017_v13 = vpop.f32.mrb[229].mxu0  ;;  %v5298_v36 = vld [vmem:[#allocation2 + $0x60] sm:$0xff] }
 0x45a   : > { %v4047_v34 = vpop.f32.mrb[102].mxu1  ;;  %v5018_v7 = vpop.f32.mrb[230].mxu0  ;;  %10014 = vmatpush3.bf16.msra.mxu1 %v11315_v42 }
 0x45b   : > { %4219 = vst [vmem:[#allocation2 + $0x164] sm:$0xf] %v9746_v53  ;;  %5190 = vst [vmem:[#allocation2 + $0x174] sm:$0xf] %v9782_v56  ;;  %v9747_v10 = vpack.c.bf16 %v4047_v34, %v4047_v34  ;;  %v9783_v14 = vpack.c.bf16 %v5018_v7, %v5018_v7  ;;  %v4049_v40 = vpop.f32.mrb[103].mxu1  ;;  %v5020_v37 = vpop.f32.mrb[231].mxu0  ;;  %10015 = vmatprep.subr.bf16.mxu1 %v11316_v16  ;;  %v9409_v7 = vcombine.low %v5353_v41, %v5353_v41 }
 0x45c   : > { %v5322_v41 = vld [vmem:[#allocation2 + $0x120] sm:$0xff] }
 0x45d   : > { %4220 = vst [vmem:[#allocation2 + $0x1a4] sm:$0xf] %v9747_v10  ;;  %5191 = vst [vmem:[#allocation2 + $0x1b4] sm:$0xf] %v9783_v14  ;;  %7022 = vmatmul.mubr.bf16.gmra.mrb[208].mxu1 %v9361_v11 }
 0x45e   : > { %7029 = vmatprep.mubr.bf16.mxu1 %v9378_v20  ;;  %10016 = vmatpush3.bf16.msra.mxu1 %v11317_v54  ;;  %v5290_v54 = vld [vmem:[#allocation2 + $0x20] sm:$0xff] }
 0x45f   : > { %10017 = vmatprep.subr.bf16.mxu1 %v11318_v15  ;;  %v9348_v10 = vcombine.high %v5290_v54, %v5298_v36  ;;  %v5314_v20 = vld [vmem:[#allocation2 + $0xe0] sm:$0xff] }
 0x460   : > { %v4052_v1 = vpop.f32.mrb[104].mxu1  ;;  %v5023_v18 = vpop.f32.mrb[232].mxu0 }
 0x461   : > { %v9748_v23 = vpack.c.bf16 %v4052_v1, %v4052_v1  ;;  %v9784_v24 = vpack.c.bf16 %v5023_v18, %v5023_v18  ;;  %v4054_v26 = vpop.f32.mrb[105].mxu1  ;;  %v5025_v27 = vpop.f32.mrb[233].mxu0  ;;  %v11335_v1 = vld [vmem:[%s13849_s4 + $0x280] sm:$0xff]   ;;  %v9347_v18 = vcombine.low %v5290_v54, %v5298_v36 }
 0x462   : > { %v4055_v5 = vpop.f32.mrb[106].mxu1  ;;  %v5026_v29 = vpop.f32.mrb[234].mxu0  ;;  %10018 = vmatpush3.bf16.msra.mxu1 %v11319_v17 }
 0x463   : > { %4221 = vst [vmem:[#allocation2 + $0x1e4] sm:$0xf] %v9748_v23  ;;  %5192 = vst [vmem:[#allocation2 + $0x1f4] sm:$0xf] %v9784_v24  ;;  %v9749_v21 = vpack.c.bf16 %v4055_v5, %v4055_v5  ;;  %v9785_v35 = vpack.c.bf16 %v5026_v29, %v5026_v29  ;;  %v4057_v32 = vpop.f32.mrb[107].mxu1  ;;  %v5028_v38 = vpop.f32.mrb[235].mxu0  ;;  %10019 = vmatprep.subr.bf16.mxu1 %v11320_v46  ;;  %v9364_v29 = vcombine.high %v5306_v28, %v5314_v20 }
 0x464   : > { %v11338_v5 = vld [vmem:[%s13849_s4 + $0x2c8] sm:$0xff]  }
 0x465   : > { %4222 = vst [vmem:[#allocation2 + $0x224] sm:$0xf] %v9749_v21  ;;  %5193 = vst [vmem:[#allocation2 + $0x234] sm:$0xf] %v9785_v35  ;;  %7030 = vmatmul.mubr.bf16.gmra.mrb[212].mxu1 %v9377_v43  ;;  %v11342_v21 = vld [vmem:[%s13849_s4 + $0x2d0] sm:$0xff]  }
 0x466   : > { %7037 = vmatprep.mubr.bf16.mxu1 %v9394_v39  ;;  %10020 = vmatpush3.bf16.msra.mxu1 %v11322_v33  ;;  %v11339_v33 = vld [vmem:[%s13849_s4 + $0x288] sm:$0xff]   ;;  %v5330_v39 = vld [vmem:[#allocation2 + $0x160] sm:$0xff] }
 0x467   : > { %10021 = vmatprep.subr.bf16.mxu1 %v11323_v55  ;;  %v9379_v36 = vcombine.low %v5322_v41, %v5330_v39 }
 0x468   : > { %v4060_v12 = vpop.f32.mrb[108].mxu1  ;;  %v5031_v47 = vpop.f32.mrb[236].mxu0 }
 0x469   : > { %v9750_v22 = vpack.c.bf16 %v4060_v12, %v4060_v12  ;;  %v9786_v48 = vpack.c.bf16 %v5031_v47, %v5031_v47  ;;  %v4062_v31 = vpop.f32.mrb[109].mxu1  ;;  %v5033_v49 = vpop.f32.mrb[237].mxu0  ;;  %v11343_v12 = vld [vmem:[%s13849_s4 + $0x290] sm:$0xff]  }
 0x46a   : > { %v4063_v50 = vpop.f32.mrb[110].mxu1  ;;  %v5034_v51 = vpop.f32.mrb[238].mxu0  ;;  %10022 = vmatpush3.bf16.msra.mxu1 %v11324_v2  ;;  %v9363_v49 = vcombine.low %v5306_v28, %v5314_v20 }
 0x46b   : > { %4260 = vst [vmem:[#allocation2 + $0x28] sm:$0xf] %v9750_v22  ;;  %5231 = vst [vmem:[#allocation2 + $0x38] sm:$0xf] %v9786_v48  ;;  %v9751_v61 = vpack.c.bf16 %v4063_v50, %v4063_v50  ;;  %v9787_v57 = vpack.c.bf16 %v5034_v51, %v5034_v51  ;;  %v4065_v8 = vpop.f32.mrb[111].mxu1  ;;  %v5036_v58 = vpop.f32.mrb[239].mxu0  ;;  %10023 = vmatprep.subr.bf16.mxu1 %v11326_v45  ;;  %v9380_v51 = vcombine.high %v5322_v41, %v5330_v39 }
 0x46c   : > { %v11346_v50 = vld [vmem:[%s13849_s4 + $0x2d8] sm:$0xff]  }
 0x46d   : > { %4261 = vst [vmem:[#allocation2 + $0x68] sm:$0xf] %v9751_v61  ;;  %5232 = vst [vmem:[#allocation2 + $0x78] sm:$0xf] %v9787_v57  ;;  %7038 = vmatmul.mubr.bf16.gmra.mrb[216].mxu1 %v9393_v19  ;;  %v11350_v61 = vld [vmem:[%s13849_s4 + $0x2e0] sm:$0xff]  }
 0x46e   : > { %7045 = vmatprep.mubr.bf16.mxu1 %v9410_v62  ;;  %10024 = vmatpush3.bf16.msra.mxu1 %v11327_v52  ;;  %v11347_v52 = vld [vmem:[%s13849_s4 + $0x298] sm:$0xff]  }
 0x46f   : > { %10025 = vmatprep.subr.bf16.mxu1 %v11328_v6 }
 0x470   : > { %v4068_v44 = vpop.f32.mrb[112].mxu1  ;;  %v5039_v63 = vpop.f32.mrb[240].mxu0 }
 0x471   : > { %v9752_v60 = vpack.c.bf16 %v4068_v44, %v4068_v44  ;;  %v9788_v42 = vpack.c.bf16 %v5039_v63, %v5039_v63  ;;  %v4070_v16 = vpop.f32.mrb[113].mxu1  ;;  %v5041_v0 = vpop.f32.mrb[241].mxu0  ;;  %v11352_v63 = vld [vmem:[%s13849_s4 + $0x2a0] sm:$0xff]  }
 0x472   : > { %v4071_v53 = vpop.f32.mrb[114].mxu1  ;;  %v5042_v56 = vpop.f32.mrb[242].mxu0  ;;  %10026 = vmatpush3.bf16.msra.mxu1 %v11329_v25  ;;  %v5346_v25 = vld [vmem:[#allocation2 + $0x1e0] sm:$0xff] }
 0x473   : > { %4262 = vst [vmem:[#allocation2 + $0xa8] sm:$0xf] %v9752_v60  ;;  %5233 = vst [vmem:[#allocation2 + $0xb8] sm:$0xf] %v9788_v42  ;;  %v9753_v3 = vpack.c.bf16 %v4071_v53, %v4071_v53  ;;  %v9789_v13 = vpack.c.bf16 %v5042_v56, %v5042_v56  ;;  %v4073_v4 = vpop.f32.mrb[115].mxu1  ;;  %v5044_v34 = vpop.f32.mrb[243].mxu0  ;;  %10057 = vmatprep.subr.bf16.mxu1 %v11334_v30 }
 0x474   : > { %v5338_v53 = vld [vmem:[#allocation2 + $0x1a0] sm:$0xff]  ;;  %v11355_v56 = vld [vmem:[%s13849_s4 + $0x2e8] sm:$0xff]   ;;  %v11360_v4 = vld [vmem:[%s13849_s4 + $0x2f0] sm:$0xff]  }
 0x475   : > { %4263 = vst [vmem:[#allocation2 + $0xe8] sm:$0xf] %v9753_v3  ;;  %5234 = vst [vmem:[#allocation2 + $0xf8] sm:$0xf] %v9789_v13  ;;  %7046 = vmatmul.mubr.bf16.gmra.mrb[220].mxu1 %v9409_v7  ;;  %v9396_v3 = vcombine.high %v5338_v53, %v5346_v25  ;;  %v11356_v13 = vld [vmem:[%s13849_s4 + $0x2a8] sm:$0xff]  }
 0x476   : > { %7085 = vmatprep.mubr.bf16.mxu1 %v9348_v10 }
 0x478   : > { %v4076_v14 = vpop.f32.mrb[116].mxu1  ;;  %v5047_v40 = vpop.f32.mrb[244].mxu0 }
 0x479   : > { %v9754_v37 = vpack.c.bf16 %v4076_v14, %v4076_v14  ;;  %v9790_v11 = vpack.c.bf16 %v5047_v40, %v5047_v40  ;;  %v4078_v59 = vpop.f32.mrb[117].mxu1  ;;  %v5049_v15 = vpop.f32.mrb[245].mxu0 }
 0x47a   : > { %v4079_v17 = vpop.f32.mrb[118].mxu1  ;;  %v5050_v46 = vpop.f32.mrb[246].mxu0  ;;  %v11361_v15 = vld [vmem:[%s13849_s4 + $0x2b0] sm:$0xff]  }
 0x47b   : > { %4264 = vst [vmem:[#allocation2 + $0x128] sm:$0xf] %v9754_v37  ;;  %5235 = vst [vmem:[#allocation2 + $0x138] sm:$0xf] %v9790_v11  ;;  %v9755_v23 = vpack.c.bf16 %v4079_v17, %v4079_v17  ;;  %v9791_v24 = vpack.c.bf16 %v5050_v46, %v5050_v46  ;;  %v4081_v26 = vpop.f32.mrb[119].mxu1  ;;  %v5052_v27 = vpop.f32.mrb[247].mxu0 }
 0x47c   : > { %v5354_v37 = vld [vmem:[#allocation2 + $0x220] sm:$0xff]  ;;  %v11363_v26 = vld [vmem:[%s13849_s4 + $0x2b8] sm:$0xff]  }
 0x47d   : > { %4265 = vst [vmem:[#allocation2 + $0x168] sm:$0xf] %v9755_v23  ;;  %5236 = vst [vmem:[#allocation2 + $0x178] sm:$0xf] %v9791_v24  ;;  %7086 = vmatmul.mubr.bf16.vlgmr.msra.gmra.mrb[224].mxu1 %v9347_v18  ;;  %v9395_v18 = vcombine.low %v5338_v53, %v5346_v25  ;;  %v11362_v23 = vld [vmem:[%s13849_s4 + $0x2f8] sm:$0xff]   ;;  %v9412_v24 = vcombine.high %v5354_v37, %v5354_v37  ;;  %v11364_v27 = vld [vmem:[%s13849_s4 + $0x340] sm:$0xff]  }
 0x47e   : > { %7093 = vmatprep.mubr.bf16.mxu1 %v9364_v29  ;;  %10058 = vmatpush3.bf16.msra.mxu1 %v11335_v1 }
 0x47f   : > { %10059 = vmatprep.subr.bf16.mxu1 %v11338_v5 }
 0x480   : > { %v4084_v35 = vpop.f32.mrb[120].mxu1  ;;  %v5055_v32 = vpop.f32.mrb[248].mxu0 }
 0x481   : > { %v9756_v38 = vpack.c.bf16 %v4084_v35, %v4084_v35  ;;  %v9792_v43 = vpack.c.bf16 %v5055_v32, %v5055_v32  ;;  %v4086_v9 = vpop.f32.mrb[121].mxu1  ;;  %v5057_v55 = vpop.f32.mrb[249].mxu0 }
 0x482   : > { %v4087_v2 = vpop.f32.mrb[122].mxu1  ;;  %v5058_v45 = vpop.f32.mrb[250].mxu0  ;;  %10060 = vmatpush3.bf16.msra.mxu1 %v11339_v33 }
 0x483   : > { %4266 = vst [vmem:[#allocation2 + $0x1a8] sm:$0xf] %v9756_v38  ;;  %5237 = vst [vmem:[#allocation2 + $0x1b8] sm:$0xf] %v9792_v43  ;;  %v9757_v47 = vpack.c.bf16 %v4087_v2, %v4087_v2  ;;  %v9793_v22 = vpack.c.bf16 %v5058_v45, %v5058_v45  ;;  %v4089_v48 = vpop.f32.mrb[123].mxu1  ;;  %v5060_v31 = vpop.f32.mrb[251].mxu0  ;;  %10061 = vmatprep.subr.bf16.mxu1 %v11342_v21  ;;  %v9411_v43 = vcombine.low %v5354_v37, %v5354_v37 }
 0x485   : > { %4267 = vst [vmem:[#allocation2 + $0x1e8] sm:$0xf] %v9757_v47  ;;  %5238 = vst [vmem:[#allocation2 + $0x1f8] sm:$0xf] %v9793_v22  ;;  %7094 = vmatmul.mubr.bf16.gmra.mrb[228].mxu1 %v9363_v49 }
 0x486   : > { %7101 = vmatprep.mubr.bf16.mxu1 %v9380_v51  ;;  %10062 = vmatpush3.bf16.msra.mxu1 %v11343_v12 }
 0x487   : > { %10063 = vmatprep.subr.bf16.mxu1 %v11346_v50 }
 0x488   : > { %v4092_v57 = vpop.f32.mrb[124].mxu1  ;;  %v5063_v8 = vpop.f32.mrb[252].mxu0 }
 0x489   : > { %v9758_v58 = vpack.c.bf16 %v4092_v57, %v4092_v57  ;;  %v9794_v19 = vpack.c.bf16 %v5063_v8, %v5063_v8  ;;  %v4094_v6 = vpop.f32.mrb[125].mxu1  ;;  %v5065_v62 = vpop.f32.mrb[253].mxu0 }
 0x48a   : > { %v4095_v30 = vpop.f32.mrb[126].mxu1  ;;  %v5066_v44 = vpop.f32.mrb[254].mxu0  ;;  %10064 = vmatpush3.bf16.msra.mxu1 %v11347_v52 }
 0x48b   : > { %4268 = vst [vmem:[#allocation2 + $0x228] sm:$0xf] %v9758_v58  ;;  %5239 = vst [vmem:[#allocation2 + $0x238] sm:$0xf] %v9794_v19  ;;  %v9759_v60 = vpack.c.bf16 %v4095_v30, %v4095_v30  ;;  %v9795_v42 = vpack.c.bf16 %v5066_v44, %v5066_v44  ;;  %v4097_v16 = vpop.f32.mrb[127].mxu1  ;;  %v5068_v0 = vpop.f32.mrb[255].mxu0  ;;  %10065 = vmatprep.subr.bf16.mxu1 %v11350_v61 }
 0x48d   : > { %4306 = vst [vmem:[#allocation2 + $0x2c] sm:$0xf] %v9759_v60  ;;  %5277 = vst [vmem:[#allocation2 + $0x3c] sm:$0xf] %v9795_v42  ;;  %7102 = vmatmul.mubr.bf16.gmra.mrb[232].mxu1 %v9379_v36  ;;  %v11365_v36 = vld [vmem:[%s13849_s4 + $0x300] sm:$0xff]  }
 0x48e   : > { %7109 = vmatprep.mubr.bf16.mxu1 %v9396_v3  ;;  %10066 = vmatpush3.bf16.msra.mxu1 %v11352_v63  ;;  %v11367_v3 = vld [vmem:[%s13849_s4 + $0x308] sm:$0xff]  }
 0x48f   : > { %10067 = vmatprep.subr.bf16.mxu1 %v11355_v56  ;;  %v11366_v56 = vld [vmem:[%s13849_s4 + $0x348] sm:$0xff]  }
 0x490   : > { %v4100_v34 = vpop.f32.mrb[128].mxu1  ;;  %v5071_v7 = vpop.f32.mrb[0].mxu0 }
 0x491   : > { %v9760_v54 = vpack.c.bf16 %v4100_v34, %v4100_v34  ;;  %v9796_v10 = vpack.c.bf16 %v5071_v7, %v5071_v7  ;;  %v4102_v14 = vpop.f32.mrb[129].mxu1  ;;  %v5073_v40 = vpop.f32.mrb[1].mxu0  ;;  %v11368_v34 = vld [vmem:[%s13849_s4 + $0x350] sm:$0xff]  }
 0x492   : > { %v4103_v11 = vpop.f32.mrb[130].mxu1  ;;  %v5074_v59 = vpop.f32.mrb[2].mxu0  ;;  %10068 = vmatpush3.bf16.msra.mxu1 %v11356_v13 }
 0x493   : > { %4307 = vst [vmem:[#allocation2 + $0x6c] sm:$0xf] %v9760_v54  ;;  %5278 = vst [vmem:[#allocation2 + $0x7c] sm:$0xf] %v9796_v10  ;;  %v9761_v20 = vpack.c.bf16 %v4103_v11, %v4103_v11  ;;  %v9797_v17 = vpack.c.bf16 %v5074_v59, %v5074_v59  ;;  %v4105_v46 = vpop.f32.mrb[131].mxu1  ;;  %v5076_v1 = vpop.f32.mrb[3].mxu0  ;;  %10069 = vmatprep.subr.bf16.mxu1 %v11360_v4 }
 0x494   : > { %v5293_v9 = vld [vmem:[#allocation2 + $0x38] sm:$0xff]  ;;  %v5291_v31 = vld [vmem:[#allocation2 + $0x28] sm:$0xff] }
 0x495   : > { %4308 = vst [vmem:[#allocation2 + $0xac] sm:$0xf] %v9761_v20  ;;  %5279 = vst [vmem:[#allocation2 + $0xbc] sm:$0xf] %v9797_v17  ;;  %7110 = vmatmul.mubr.bf16.gmra.mrb[236].mxu1 %v9395_v18 }
 0x496   : > { %7117 = vmatprep.mubr.bf16.mxu1 %v9412_v24  ;;  %10070 = vmatpush3.bf16.msra.mxu1 %v11361_v15 }
 0x497   : > { %10071 = vmatprep.subr.bf16.mxu1 %v11362_v23 }
 0x498   : > { %v4108_v28 = vpop.f32.mrb[132].mxu1  ;;  %v5079_v5 = vpop.f32.mrb[4].mxu0 }
 0x499   : > { %v9762_v29 = vpack.c.bf16 %v4108_v28, %v4108_v28  ;;  %v9798_v33 = vpack.c.bf16 %v5079_v5, %v5079_v5  ;;  %v4110_v21 = vpop.f32.mrb[133].mxu1  ;;  %v5081_v35 = vpop.f32.mrb[5].mxu0  ;;  %v11372_v5 = vld [vmem:[%s13849_s4 + $0x358] sm:$0xff]  }
 0x49a   : > { %v4111_v32 = vpop.f32.mrb[134].mxu1  ;;  %v5082_v38 = vpop.f32.mrb[6].mxu0  ;;  %v5301_v55 = vld [vmem:[#allocation2 + $0x78] sm:$0xff]  ;;  %v5299_v39 = vld [vmem:[#allocation2 + $0x68] sm:$0xff]  ;;  %10072 = vmatpush3.bf16.msra.mxu1 %v11363_v26  ;;  %v11374_v21 = vld [vmem:[%s13849_s4 + $0x360] sm:$0xff]  }
 0x49b   : > { %4309 = vst [vmem:[#allocation2 + $0xec] sm:$0xf] %v9762_v29  ;;  %5280 = vst [vmem:[#allocation2 + $0xfc] sm:$0xf] %v9798_v33  ;;  %v9763_v2 = vpack.c.bf16 %v4111_v32, %v4111_v32  ;;  %v9799_v45 = vpack.c.bf16 %v5082_v38, %v5082_v38  ;;  %v4113_v12 = vpop.f32.mrb[135].mxu1  ;;  %v5084_v47 = vpop.f32.mrb[7].mxu0  ;;  %v9353_v22 = vcombine.low %v5293_v9, %v5301_v55  ;;  %10103 = vmatprep.subr.bf16.mxu1 %v11364_v27 }
 0x49c   : > { %v9354_v48 = vcombine.high %v5293_v9, %v5301_v55  ;;  %v9350_v49 = vcombine.high %v5291_v31, %v5299_v39  ;;  %v9349_v8 = vcombine.low %v5291_v31, %v5299_v39  ;;  %v5309_v6 = vld [vmem:[#allocation2 + $0xb8] sm:$0xff]  ;;  %v5307_v0 = vld [vmem:[#allocation2 + $0xa8] sm:$0xff]  ;;  %v11369_v27 = vld [vmem:[%s13849_s4 + $0x310] sm:$0xff]  }
 0x49d   : > { %4310 = vst [vmem:[#allocation2 + $0x12c] sm:$0xf] %v9763_v2  ;;  %5281 = vst [vmem:[#allocation2 + $0x13c] sm:$0xf] %v9799_v45  ;;  %7118 = vmatmul.mubr.bf16.gmra.mrb[240].mxu1 %v9411_v43  ;;  %v11373_v29 = vld [vmem:[%s13849_s4 + $0x318] sm:$0xff]  }
 0x49e   : > { %7301 = vmatprep.mubr.bf16.mxu0 %v9354_v48  ;;  %7157 = vmatprep.mubr.bf16.mxu1 %v9350_v49  ;;  %v11377_v48 = vld [vmem:[%s13849_s4 + $0x320] sm:$0xff]  }
 0x49f   : > { %7302 = vmatmul.mubr.bf16.vlgmr.msra.gmra.mrb[16].mxu0 %v9353_v22 }
 0x4a0   : > { %v4116_v41 = vpop.f32.mrb[136].mxu1  ;;  %v5087_v50 = vpop.f32.mrb[8].mxu0 }
 0x4a1   : > { %v9764_v51 = vpack.c.bf16 %v4116_v41, %v4116_v41  ;;  %v9800_v52 = vpack.c.bf16 %v5087_v50, %v5087_v50  ;;  %v4118_v61 = vpop.f32.mrb[137].mxu1  ;;  %v5089_v57 = vpop.f32.mrb[9].mxu0  ;;  %v11378_v41 = vld [vmem:[%s13849_s4 + $0x368] sm:$0xff]  }
 0x4a2   : > { %v4119_v58 = vpop.f32.mrb[138].mxu1  ;;  %v5090_v19 = vpop.f32.mrb[10].mxu0  ;;  %v5317_v62 = vld [vmem:[#allocation2 + $0xf8] sm:$0xff]  ;;  %v5315_v25 = vld [vmem:[#allocation2 + $0xe8] sm:$0xff]  ;;  %v11380_v61 = vld [vmem:[%s13849_s4 + $0x370] sm:$0xff]  }
 0x4a3   : > { %4311 = vst [vmem:[#allocation2 + $0x16c] sm:$0xf] %v9764_v51  ;;  %5282 = vst [vmem:[#allocation2 + $0x17c] sm:$0xf] %v9800_v52  ;;  %v9765_v30 = vpack.c.bf16 %v4119_v58, %v4119_v58  ;;  %v9801_v44 = vpack.c.bf16 %v5090_v19, %v5090_v19  ;;  %v4121_v63 = vpop.f32.mrb[139].mxu1  ;;  %v5092_v60 = vpop.f32.mrb[11].mxu0  ;;  %v9369_v42 = vcombine.low %v5309_v6, %v5317_v62 }
 0x4a4   : > { %v9370_v16 = vcombine.high %v5309_v6, %v5317_v62  ;;  %v9366_v53 = vcombine.high %v5307_v0, %v5315_v25  ;;  %v9365_v11 = vcombine.low %v5307_v0, %v5315_v25  ;;  %v5325_v59 = vld [vmem:[#allocation2 + $0x138] sm:$0xff]  ;;  %v5323_v26 = vld [vmem:[#allocation2 + $0x128] sm:$0xff]  ;;  %v11381_v25 = vld [vmem:[%s13849_s4 + $0x330] sm:$0xff]  }
 0x4a5   : > { %4312 = vst [vmem:[#allocation2 + $0x1ac] sm:$0xf] %v9765_v30  ;;  %5283 = vst [vmem:[#allocation2 + $0x1bc] sm:$0xf] %v9801_v44  ;;  %7158 = vmatmul.mubr.bf16.vlgmr.msra.gmra.mrb[244].mxu1 %v9349_v8  ;;  %v11379_v51 = vld [vmem:[%s13849_s4 + $0x328] sm:$0xff]   ;;  %v11382_v60 = vld [vmem:[%s13849_s4 + $0x378] sm:$0xff]  }
 0x4a6   : > { %7309 = vmatprep.mubr.bf16.mxu0 %v9370_v16  ;;  %7165 = vmatprep.mubr.bf16.mxu1 %v9366_v53 }
 0x4a7   : > { %7310 = vmatmul.mubr.bf16.gmra.mrb[20].mxu0 %v9369_v42  ;;  %10104 = vmatpush3.bf16.msra.mxu1 %v11365_v36  ;;  %v11383_v42 = vld [vmem:[%s13849_s4 + $0x338] sm:$0xff]   ;;  %v5300_v36 = vld [vmem:[#allocation2 + $0x70] sm:$0xff] }
 0x4a8   : > { %v4124_v13 = vpop.f32.mrb[140].mxu1  ;;  %v5095_v4 = vpop.f32.mrb[12].mxu0  ;;  %10105 = vmatprep.subr.bf16.mxu1 %v11366_v56 }
 0x4a9   : > { %v9766_v7 = vpack.c.bf16 %v4124_v13, %v4124_v13  ;;  %v9802_v54 = vpack.c.bf16 %v5095_v4, %v5095_v4  ;;  %v4126_v10 = vpop.f32.mrb[141].mxu1  ;;  %v5097_v14 = vpop.f32.mrb[13].mxu0  ;;  %v5292_v4 = vld [vmem:[#allocation2 + $0x30] sm:$0xff] }
 0x4aa   : > { %v4127_v40 = vpop.f32.mrb[142].mxu1  ;;  %v5098_v37 = vpop.f32.mrb[14].mxu0  ;;  %v5333_v15 = vld [vmem:[#allocation2 + $0x178] sm:$0xff]  ;;  %v5331_v20 = vld [vmem:[#allocation2 + $0x168] sm:$0xff]  ;;  %v5316_v14 = vld [vmem:[#allocation2 + $0xf0] sm:$0xff] }
 0x4ab   : > { %4313 = vst [vmem:[#allocation2 + $0x1ec] sm:$0xf] %v9766_v7  ;;  %5284 = vst [vmem:[#allocation2 + $0x1fc] sm:$0xf] %v9802_v54  ;;  %v9767_v17 = vpack.c.bf16 %v4127_v40, %v4127_v40  ;;  %v9803_v46 = vpack.c.bf16 %v5098_v37, %v5098_v37  ;;  %v4129_v1 = vpop.f32.mrb[143].mxu1  ;;  %v5100_v18 = vpop.f32.mrb[15].mxu0  ;;  %v9385_v23 = vcombine.low %v5325_v59, %v5333_v15  ;;  %10106 = vmatpush3.bf16.msra.mxu1 %v11367_v3 }
 0x4ac   : > { %v9386_v24 = vcombine.high %v5325_v59, %v5333_v15  ;;  %v9382_v28 = vcombine.high %v5323_v26, %v5331_v20  ;;  %10107 = vmatprep.subr.bf16.mxu1 %v11368_v34  ;;  %v5341_v32 = vld [vmem:[#allocation2 + $0x1b8] sm:$0xff]  ;;  %v5339_v55 = vld [vmem:[#allocation2 + $0x1a8] sm:$0xff]  ;;  %v9381_v45 = vcombine.low %v5323_v26, %v5331_v20  ;;  %v9352_v7 = vcombine.high %v5292_v4, %v5300_v36  ;;  %v5308_v15 = vld [vmem:[#allocation2 + $0xb0] sm:$0xff] }
 0x4ad   : > { %4314 = vst [vmem:[#allocation2 + $0x22c] sm:$0xf] %v9767_v17  ;;  %5285 = vst [vmem:[#allocation2 + $0x23c] sm:$0xf] %v9803_v46  ;;  %7166 = vmatmul.mubr.bf16.gmra.mrb[248].mxu1 %v9365_v11  ;;  %v9351_v11 = vcombine.low %v5292_v4, %v5300_v36  ;;  %v9368_v17 = vcombine.high %v5308_v15, %v5316_v14  ;;  %v5332_v18 = vld [vmem:[#allocation2 + $0x170] sm:$0xff]  ;;  %v9367_v26 = vcombine.low %v5308_v15, %v5316_v14 }
 0x4ae   : > { %7317 = vmatprep.mubr.bf16.mxu0 %v9386_v24  ;;  %7173 = vmatprep.mubr.bf16.mxu1 %v9382_v28  ;;  %v5324_v28 = vld [vmem:[#allocation2 + $0x130] sm:$0xff] }
 0x4af   : > { %7318 = vmatmul.mubr.bf16.gmra.mrb[24].mxu0 %v9385_v23  ;;  %10108 = vmatpush3.bf16.msra.mxu1 %v11369_v27 }
 0x4b0   : > { %v9843_v33 = vpop.f32.mrb[144].mxu1  ;;  %10109 = vmatprep.subr.bf16.mxu1 %v11372_v5  ;;  %v9384_v5 = vcombine.high %v5324_v28, %v5332_v18 }
 0x4b1   : > { %v9844_v35 = vpop.f32.mrb[145].mxu1 }
 0x4b2   : > { %v13356_v38 = vadd.f32 %v9844_v35, %v9843_v33  ;;  %v9846_v43 = vpop.f32.mrb[146].mxu1  ;;  %v5349_v9 = vld [vmem:[#allocation2 + $0x1f8] sm:$0xff]  ;;  %v5347_v39 = vld [vmem:[#allocation2 + $0x1e8] sm:$0xff]  ;;  %v5348_v35 = vld [vmem:[#allocation2 + $0x1f0] sm:$0xff] }
 0x4b3   : > { %v9847_v2 = vpop.f32.mrb[147].mxu1  ;;  %v9401_v12 = vcombine.low %v5341_v32, %v5349_v9  ;;  %v9402_v47 = vcombine.high %v5341_v32, %v5349_v9  ;;  %v9398_v22 = vcombine.high %v5339_v55, %v5347_v39  ;;  %10110 = vmatpush3.bf16.msra.mxu1 %v11373_v29  ;;  %v9397_v6 = vcombine.low %v5339_v55, %v5347_v39  ;;  %v9338_v29 = vld [vmem:[%s13850_s5] ss:$0 sm:$0xff] }
 0x4b4   : > { %v13361_v31 = vadd.f32 %v9847_v2, %v9846_v43  ;;  %v5357_v49 = vld [vmem:[#allocation2 + $0x238] sm:$0xff]  ;;  %10111 = vmatprep.subr.bf16.mxu1 %v11374_v21  ;;  %v5355_v8 = vld [vmem:[#allocation2 + $0x228] sm:$0xff]  ;;  %v6800_v32 = vadd.f32 %v13356_v38, %v9338_v29  ;;  %v9383_v55 = vcombine.low %v5324_v28, %v5332_v18  ;;  %v5340_v2 = vld [vmem:[#allocation2 + $0x1b0] sm:$0xff] }
 0x4b5   : > { %7174 = vmatmul.mubr.bf16.gmra.mrb[252].mxu1 %v9381_v45  ;;  %7325 = vmatprep.mubr.bf16.mxu0 %v9402_v47  ;;  %v9418_v50 = vcombine.high %v5357_v49, %v5357_v49  ;;  %v9417_v30 = vcombine.low %v5357_v49, %v5357_v49  ;;  %v9414_v63 = vcombine.high %v5355_v8, %v5355_v8 }
 0x4b6   : > { %7181 = vmatprep.mubr.bf16.mxu1 %v9398_v22  ;;  %v9413_v3 = vcombine.low %v5355_v8, %v5355_v8  ;;  %v6803_v45 = vadd.f32 %v13361_v31, %v9338_v29  ;;  %v9400_v22 = vcombine.high %v5340_v2, %v5348_v35 }
 0x4b7   : > { %7326 = vmatmul.mubr.bf16.gmra.mrb[28].mxu0 %v9401_v12  ;;  %10112 = vmatpush3.bf16.msra.mxu1 %v11377_v48 }
 0x4b8   : > { %7333 = vmatprep.mubr.bf16.mxu0 %v9418_v50  ;;  %v9849_v52 = vpop.f32.mrb[148].mxu1  ;;  %10113 = vmatprep.subr.bf16.mxu1 %v11378_v41  ;;  %v5356_v50 = vld [vmem:[#allocation2 + $0x230] sm:$0xff] }
 0x4b9   : > { %v9850_v57 = vpop.f32.mrb[149].mxu1  ;;  %v9416_v31 = vcombine.high %v5356_v50, %v5356_v50 }
 0x4ba   : > { %v13372_v58 = vadd.f32 %v9850_v57, %v9849_v52  ;;  %v9852_v19 = vpop.f32.mrb[150].mxu1 }
 0x4bb   : > { %v9853_v62 = vpop.f32.mrb[151].mxu1  ;;  %10114 = vmatpush3.bf16.msra.mxu1 %v11379_v51 }
 0x4bc   : > { %v13377_v44 = vadd.f32 %v9853_v62, %v9852_v19  ;;  %10115 = vmatprep.subr.bf16.mxu1 %v11380_v61  ;;  %v6808_v51 = vadd.f32 %v13372_v58, %v9338_v29  ;;  %v9399_v61 = vcombine.low %v5340_v2, %v5348_v35 }
 0x4bd   : > { %7182 = vmatmul.mubr.bf16.gmra.mrb[0].mxu1 %v9397_v6 }
 0x4be   : > { %7189 = vmatprep.mubr.bf16.mxu1 %v9414_v63  ;;  %v6811_v8 = vadd.f32 %v13377_v44, %v9338_v29 }
 0x4bf   : > { %7334 = vmatmul.mubr.bf16.gmra.mrb[32].mxu0 %v9417_v30  ;;  %10116 = vmatpush3.bf16.msra.mxu1 %v11381_v25 }
 0x4c0   : > { %v9855_v16 = vpop.f32.mrb[152].mxu1  ;;  %10117 = vmatprep.subr.bf16.mxu1 %v11382_v60 }
 0x4c1   : > { %v9856_v0 = vpop.f32.mrb[153].mxu1 }
 0x4c2   : > { %v13385_v53 = vadd.f32 %v9856_v0, %v9855_v16  ;;  %v9858_v56 = vpop.f32.mrb[154].mxu1  ;;  %v9415_v16 = vcombine.low %v5356_v50, %v5356_v50 }
 0x4c3   : > { %v9859_v13 = vpop.f32.mrb[155].mxu1  ;;  %10118 = vmatpush3.bf16.msra.mxu1 %v11383_v42 }
 0x4c4   : > { %v13387_v34 = vadd.f32 %v9859_v13, %v9858_v56  ;;  %v6816_v63 = vadd.f32 %v13385_v53, %v9338_v29 }
 0x4c5   : > { %7190 = vmatmul.mubr.bf16.gmra.mrb[4].mxu1 %v9413_v3 }
 0x4c6   : > { %7229 = vmatprep.mubr.bf16.mxu1 %v9352_v7  ;;  %v6819_v0 = vadd.f32 %v13387_v34, %v9338_v29 }
 0x4c8   : > { %v9861_v54 = vpop.f32.mrb[156].mxu1 }
 0x4c9   : > { %v9862_v10 = vpop.f32.mrb[157].mxu1 }
 0x4ca   : > { %v13389_v40 = vadd.f32 %v9862_v10, %v9861_v54  ;;  %v9864_v37 = vpop.f32.mrb[158].mxu1 }
 0x4cb   : > { %v9865_v59 = vpop.f32.mrb[159].mxu1 }
 0x4cc   : > { %v13391_v20 = vadd.f32 %v9865_v59, %v9864_v37  ;;  %v6824_v4 = vadd.f32 %v13389_v40, %v9338_v29 }
 0x4cd   : > { %7230 = vmatmul.mubr.bf16.vlgmr.msra.gmra.mrb[8].mxu1 %v9351_v11 }
 0x4ce   : > { %7237 = vmatprep.mubr.bf16.mxu1 %v9368_v17  ;;  %v6827_v14 = vadd.f32 %v13391_v20, %v9338_v29 }
 0x4d0   : > { %v9867_v46 = vpop.f32.mrb[160].mxu1 }
 0x4d1   : > { %v9868_v1 = vpop.f32.mrb[161].mxu1 }
 0x4d2   : > { %v13393_v23 = vadd.f32 %v9868_v1, %v9867_v46  ;;  %v9870_v24 = vpop.f32.mrb[162].mxu1 }
 0x4d3   : > { %v9871_v27 = vpop.f32.mrb[163].mxu1 }
 0x4d4   : > { %v6832_v34 = vadd.f32 %v13393_v23, %v9338_v29 }
 0x4d5   : > { %7238 = vmatmul.mubr.bf16.gmra.mrb[12].mxu1 %v9367_v26 }
 0x4d6   : > { %7245 = vmatprep.mubr.bf16.mxu1 %v9384_v5 }
 0x4d8   : > { %v9889_v33 = vpop.f32.mrb[164].mxu1 }
 0x4d9   : > { %v9890_v21 = vpop.f32.mrb[165].mxu1 }
 0x4da   : > { %v9891_v43 = vadd.f32 %v9890_v21, %v9889_v33  ;;  %v9892_v9 = vpop.f32.mrb[166].mxu1 }
 0x4db   : > { %v9893_v39 = vpop.f32.mrb[167].mxu1 }
 0x4dc   : > { %v6872_v12 = vadd.f32 %v9891_v43, %v6800_v32  ;;  %v9894_v47 = vadd.f32 %v9893_v39, %v9892_v9  ;;  %v11386_v39 = vld [vmem:[%s13851_s6 + $0x40] sm:$0xff]  }
 0x4dd   : > { %7246 = vmatmul.mubr.bf16.gmra.mrb[16].mxu1 %v9383_v55  ;;  %10195 = vmatprep.subr.bf16.mxu1 %v11386_v39  ;;  %v11416_v39 = vld [vmem:[%s13851_s6 + $0xb0] sm:$0xff]  }
 0x4de   : > { %v6875_v48 = vadd.f32 %v9894_v47, %v6803_v45  ;;  %7253 = vmatprep.mubr.bf16.mxu1 %v9400_v22  ;;  %v11387_v45 = vld [vmem:[%s13851_s6] sm:$0xff]  }
 0x4df   : > { %10196 = vmatpush3.bf16.msra.mxu1 %v11387_v45 }
 0x4e0   : > { %v9895_v49 = vpop.f32.mrb[168].mxu1 }
 0x4e1   : > { %v9896_v41 = vpop.f32.mrb[169].mxu1 }
 0x4e2   : > { %v9897_v52 = vadd.f32 %v9896_v41, %v9895_v49  ;;  %v9898_v38 = vpop.f32.mrb[170].mxu1  ;;  %v11388_v49 = vld [vmem:[%s13851_s6 + $0x48] sm:$0xff]  }
 0x4e3   : > { %v9899_v57 = vpop.f32.mrb[171].mxu1  ;;  %10197 = vmatprep.subr.bf16.mxu1 %v11388_v49  ;;  %v11420_v49 = vld [vmem:[%s13851_s6 + $0xb8] sm:$0xff]  }
 0x4e4   : > { %v6880_v19 = vadd.f32 %v9897_v52, %v6808_v51  ;;  %v9900_v6 = vadd.f32 %v9899_v57, %v9898_v38  ;;  %v11389_v51 = vld [vmem:[%s13851_s6 + $0x8] sm:$0xff]   ;;  %v11390_v38 = vld [vmem:[%s13851_s6 + $0x50] sm:$0xff]  }
 0x4e5   : > { %7254 = vmatmul.mubr.bf16.gmra.mrb[20].mxu1 %v9399_v61  ;;  %v11391_v61 = vld [vmem:[%s13851_s6 + $0xc0] sm:$0xff]  }
 0x4e6   : > { %v6883_v62 = vadd.f32 %v9900_v6, %v6811_v8  ;;  %7261 = vmatprep.mubr.bf16.mxu1 %v9416_v31  ;;  %10198 = vmatpush3.bf16.msra.mxu1 %v11389_v51  ;;  %v11392_v8 = vld [vmem:[%s13851_s6 + $0x10] sm:$0xff]   ;;  %v11423_v51 = vld [vmem:[%s13851_s6 + $0x1c0] sm:$0xff]  }
 0x4e7   : > { %10199 = vmatprep.subr.bf16.mxu1 %v11390_v38  ;;  %10217 = vmatprep.subr.bf16.mxu0 %v11391_v61 }
 0x4e8   : > { %v9901_v25 = vpop.f32.mrb[172].mxu1 }
 0x4e9   : > { %v9902_v30 = vpop.f32.mrb[173].mxu1 }
 0x4ea   : > { %v9903_v60 = vadd.f32 %v9902_v30, %v9901_v25  ;;  %v9904_v42 = vpop.f32.mrb[174].mxu1  ;;  %10200 = vmatpush3.bf16.msra.mxu1 %v11392_v8  ;;  %v11394_v30 = vld [vmem:[%s13851_s6 + $0x58] sm:$0xff]  }
 0x4eb   : > { %v9905_v58 = vpop.f32.mrb[175].mxu1  ;;  %10201 = vmatprep.subr.bf16.mxu1 %v11394_v30 }
 0x4ec   : > { %v6888_v36 = vadd.f32 %v9903_v60, %v6816_v63  ;;  %v9906_v56 = vadd.f32 %v9905_v58, %v9904_v42  ;;  %v11395_v63 = vld [vmem:[%s13851_s6 + $0xc8] sm:$0xff]  }
 0x4ed   : > { %7262 = vmatmul.mubr.bf16.gmra.mrb[24].mxu1 %v9415_v16  ;;  %v11396_v16 = vld [vmem:[%s13851_s6 + $0x18] sm:$0xff]   ;;  %v11397_v58 = vld [vmem:[%s13851_s6 + $0x88] sm:$0xff]  }
 0x4ee   : > { %v6891_v44 = vadd.f32 %v9906_v56, %v6819_v0  ;;  %10202 = vmatpush3.bf16.msra.mxu1 %v11396_v16  ;;  %v11399_v56 = vld [vmem:[%s13851_s6 + $0xd0] sm:$0xff]  }
 0x4f0   : > { %v9907_v3 = vpop.f32.mrb[176].mxu1 }
 0x4f1   : > { %v9908_v13 = vpop.f32.mrb[177].mxu1 }
 0x4f2   : > { %v9909_v7 = vadd.f32 %v9908_v13, %v9907_v3  ;;  %v9910_v54 = vpop.f32.mrb[178].mxu1  ;;  %v11400_v3 = vld [vmem:[%s13851_s6 + $0x20] sm:$0xff]   ;;  %v11401_v13 = vld [vmem:[%s13851_s6 + $0x90] sm:$0xff]  }
 0x4f3   : > { %v9911_v10 = vpop.f32.mrb[179].mxu1 }
 0x4f4   : > { %v6896_v53 = vadd.f32 %v9909_v7, %v6824_v4  ;;  %v9912_v37 = vadd.f32 %v9911_v10, %v9910_v54 }
 0x4f6   : > { %v6899_v11 = vadd.f32 %v9912_v37, %v6827_v14  ;;  %v11402_v14 = vld [vmem:[%s13851_s6 + $0x68] sm:$0xff]  }
 0x4f8   : > { %v9913_v59 = vpop.f32.mrb[180].mxu1 }
 0x4f9   : > { %v9914_v15 = vpop.f32.mrb[181].mxu1 }
 0x4fa   : > { %v9915_v17 = vadd.f32 %v9914_v15, %v9913_v59  ;;  %v9916_v46 = vpop.f32.mrb[182].mxu1  ;;  %v11405_v59 = vld [vmem:[%s13851_s6 + $0x98] sm:$0xff]   ;;  %v11406_v15 = vld [vmem:[%s13851_s6 + $0x70] sm:$0xff]  }
 0x4fb   : > { %v9917_v1 = vpop.f32.mrb[183].mxu1  ;;  %v11408_v46 = vld [vmem:[%s13851_s6 + $0x30] sm:$0xff]  }
 0x4fc   : > { %v13407_v18 = vadd.f32 %v9915_v17, %v6832_v34  ;;  %v11407_v34 = vld [vmem:[%s13851_s6 + $0xe0] sm:$0xff]  }
 0x4fd   : > { %v11409_v1 = vld [vmem:[%s13851_s6 + $0xa0] sm:$0xff]  }
 0x500   : > { %v9935_v24 = vpop.f32.mrb[184].mxu1 }
 0x501   : > { %v9936_v26 = vpop.f32.mrb[185].mxu1 }
 0x502   : > { %v9937_v40 = vadd.f32 %v9936_v26, %v9935_v24  ;;  %v9938_v27 = vpop.f32.mrb[186].mxu1 }
 0x503   : > { %v9939_v28 = vpop.f32.mrb[187].mxu1 }
 0x504   : > { %v13409_v5 = vadd.f32 %v9937_v40, %v6872_v12  ;;  %v9940_v20 = vadd.f32 %v9939_v28, %v9938_v27  ;;  %v11410_v27 = vld [vmem:[%s13851_s6 + $0x78] sm:$0xff]   ;;  %v11411_v28 = vld [vmem:[%s13851_s6 + $0xe8] sm:$0xff]  }
 0x506   : > { %v13411_v33 = vadd.f32 %v9940_v20, %v6875_v48 }
 0x508   : > { %v9941_v21 = vpop.f32.mrb[188].mxu1 }
 0x509   : > { %v9942_v35 = vpop.f32.mrb[189].mxu1 }
 0x50a   : > { %v9943_v32 = vadd.f32 %v9942_v35, %v9941_v21  ;;  %v9944_v43 = vpop.f32.mrb[190].mxu1  ;;  %v11412_v35 = vld [vmem:[%s13851_s6 + $0x38] sm:$0xff]  }
 0x50b   : > { %v9945_v23 = vpop.f32.mrb[191].mxu1 }
 0x50c   : > { %v13413_v29 = vadd.f32 %v9943_v32, %v6880_v19  ;;  %v9946_v9 = vadd.f32 %v9945_v23, %v9944_v43  ;;  %v11393_v19 = vld [vmem:[%s13851_s6 + $0x80] sm:$0xff]   ;;  %v11413_v32 = vld [vmem:[%s13851_s6 + $0xa8] sm:$0xff]   ;;  %v11414_v23 = vld [vmem:[%s13851_s6 + $0xf0] sm:$0xff]  }
 0x50d   : > { %10218 = vmatpush3.bf16.msra.mxu0 %v11393_v19 }
 0x50e   : > { %v13415_v55 = vadd.f32 %v9946_v9, %v6883_v62  ;;  %10219 = vmatprep.subr.bf16.mxu0 %v11395_v63 }
 0x510   : > { %v9947_v2 = vpop.f32.mrb[192].mxu1 }
 0x511   : > { %v9948_v12 = vpop.f32.mrb[193].mxu1  ;;  %10220 = vmatpush3.bf16.msra.mxu0 %v11397_v58 }
 0x512   : > { %v9949_v47 = vadd.f32 %v9948_v12, %v9947_v2  ;;  %v9950_v22 = vpop.f32.mrb[194].mxu1  ;;  %10221 = vmatprep.subr.bf16.mxu0 %v11399_v56 }
 0x513   : > { %v9951_v48 = vpop.f32.mrb[195].mxu1 }
 0x514   : > { %v13426_v41 = vadd.f32 %v9949_v47, %v6888_v36  ;;  %v9952_v50 = vadd.f32 %v9951_v48, %v9950_v22  ;;  %v11398_v36 = vld [vmem:[%s13851_s6 + $0x60] sm:$0xff]   ;;  %v11418_v47 = vld [vmem:[%s13851_s6 + $0xf8] sm:$0xff]  }
 0x515   : > { %10203 = vmatprep.subr.bf16.mxu1 %v11398_v36  ;;  %10222 = vmatpush3.bf16.msra.mxu0 %v11401_v13 }
 0x516   : > { %v13431_v52 = vadd.f32 %v9952_v50, %v6891_v44  ;;  %10204 = vmatpush3.bf16.msra.mxu1 %v11400_v3 }
 0x517   : > { %10205 = vmatprep.subr.bf16.mxu1 %v11402_v14 }
 0x518   : > { %v9953_v57 = vpop.f32.mrb[196].mxu1 }
 0x519   : > { %v9954_v6 = vpop.f32.mrb[197].mxu1 }
 0x51a   : > { %v9955_v31 = vadd.f32 %v9954_v6, %v9953_v57  ;;  %v9956_v62 = vpop.f32.mrb[198].mxu1 }
 0x51b   : > { %v9957_v25 = vpop.f32.mrb[199].mxu1 }
 0x51c   : > { %v13451_v60 = vadd.f32 %v9955_v31, %v6896_v53  ;;  %v9958_v42 = vadd.f32 %v9957_v25, %v9956_v62  ;;  %v11403_v53 = vld [vmem:[%s13851_s6 + $0xd8] sm:$0xff]  }
 0x51d   : > { %10223 = vmatprep.subr.bf16.mxu0 %v11403_v53 }
 0x51e   : > { %v13459_v0 = vadd.f32 %v9958_v42, %v6899_v11  ;;  %v11404_v11 = vld [vmem:[%s13851_s6 + $0x28] sm:$0xff]   ;;  %10224 = vmatpush3.bf16.msra.mxu0 %v11405_v59 }
 0x51f   : > { %10206 = vmatpush3.bf16.msra.mxu1 %v11404_v11  ;;  %10225 = vmatprep.subr.bf16.mxu0 %v11407_v34 }
 0x520   : > { %v9959_v44 = vpop.f32.mrb[200].mxu1  ;;  %10207 = vmatprep.subr.bf16.mxu1 %v11406_v15 }
 0x521   : > { %v9960_v4 = vpop.f32.mrb[201].mxu1 }
 0x522   : > { %v9961_v7 = vadd.f32 %v9960_v4, %v9959_v44  ;;  %v9962_v54 = vpop.f32.mrb[202].mxu1  ;;  %10226 = vmatpush3.bf16.msra.mxu0 %v11409_v1 }
 0x523   : > { %v9963_v10 = vpop.f32.mrb[203].mxu1  ;;  %10208 = vmatpush3.bf16.msra.mxu1 %v11408_v46  ;;  %10227 = vmatprep.subr.bf16.mxu0 %v11411_v28 }
 0x524   : > { %v13480_v37 = vadd.f32 %v9961_v7, %v13407_v18  ;;  %10209 = vmatprep.subr.bf16.mxu1 %v11410_v27 }
 0x526   : > { %10228 = vmatpush3.bf16.msra.mxu0 %v11413_v32 }
 0x527   : > { %10210 = vmatpush3.bf16.msra.mxu1 %v11412_v35  ;;  %10229 = vmatprep.subr.bf16.mxu0 %v11414_v23 }
 0x528   : > { %v9981_v17 = vpop.f32.mrb[204].mxu1 }
 0x529   : > { %v9982_v18 = vpop.f32.mrb[205].mxu1 }
 0x52a   : > { %v9983_v24 = vadd.f32 %v9982_v18, %v9981_v17  ;;  %v9984_v26 = vpop.f32.mrb[206].mxu1  ;;  %10230 = vmatpush3.bf16.msra.mxu0 %v11416_v39 }
 0x52b   : > { %v9985_v40 = vpop.f32.mrb[207].mxu1  ;;  %10231 = vmatprep.subr.bf16.mxu0 %v11418_v47 }
 0x52c   : > { %v7016_v20 = vadd.f32 %v9983_v24, %v13409_v5  ;;  %v9986_v21 = vadd.f32 %v9985_v40, %v9984_v26  ;;  %v11415_v5 = vld [vmem:[%s13851_s6 + $0x140] sm:$0xff]  }
 0x52d   : > { %10239 = vmatprep.subr.bf16.mxu1 %v11415_v5 }
 0x52e   : > { %v7019_v43 = vadd.f32 %v9986_v21, %v13411_v33  ;;  %10232 = vmatpush3.bf16.msra.mxu0 %v11420_v49 }
 0x52f   : > { %10261 = vmatprep.subr.bf16.mxu0 %v11423_v51 }
 0x530   : > { %v9987_v9 = vpop.f32.mrb[208].mxu1 }
 0x531   : > { %v9988_v2 = vpop.f32.mrb[209].mxu1 }
 0x532   : > { %v9989_v45 = vadd.f32 %v9988_v2, %v9987_v9  ;;  %v9990_v33 = vpop.f32.mrb[210].mxu1 }
 0x533   : > { %v9991_v12 = vpop.f32.mrb[211].mxu1 }
 0x534   : > { %v7024_v22 = vadd.f32 %v9989_v45, %v13413_v29  ;;  %v9992_v48 = vadd.f32 %v9991_v12, %v9990_v33 }
 0x536   : > { %v7027_v50 = vadd.f32 %v9992_v48, %v13415_v55 }
 0x538   : > { %v9993_v38 = vpop.f32.mrb[212].mxu1 }
 0x539   : > { %v9994_v61 = vpop.f32.mrb[213].mxu1 }
 0x53a   : > { %v9995_v57 = vadd.f32 %v9994_v61, %v9993_v38  ;;  %v9996_v8 = vpop.f32.mrb[214].mxu1 }
 0x53b   : > { %v9997_v19 = vpop.f32.mrb[215].mxu1 }
 0x53c   : > { %v7032_v29 = vadd.f32 %v9995_v57, %v13426_v41  ;;  %v9998_v6 = vadd.f32 %v9997_v19, %v9996_v8 }
 0x53e   : > { %v7035_v31 = vadd.f32 %v9998_v6, %v13431_v52 }
 0x540   : > { %v9999_v62 = vpop.f32.mrb[216].mxu1 }
 0x541   : > { %v10000_v25 = vpop.f32.mrb[217].mxu1 }
 0x542   : > { %v10001_v30 = vadd.f32 %v10000_v25, %v9999_v62  ;;  %v10002_v55 = vpop.f32.mrb[218].mxu1 }
 0x543   : > { %v10003_v63 = vpop.f32.mrb[219].mxu1 }
 0x544   : > { %v7040_v42 = vadd.f32 %v10001_v30, %v13451_v60  ;;  %v10004_v16 = vadd.f32 %v10003_v63, %v10002_v55 }
 0x546   : > { %v7043_v58 = vadd.f32 %v10004_v16, %v13459_v0 }
 0x548   : > { %v10005_v36 = vpop.f32.mrb[220].mxu1 }
 0x549   : > { %v10006_v56 = vpop.f32.mrb[221].mxu1 }
 0x54a   : > { %v10007_v44 = vadd.f32 %v10006_v56, %v10005_v36  ;;  %v10008_v3 = vpop.f32.mrb[222].mxu1 }
 0x54b   : > { %v10009_v13 = vpop.f32.mrb[223].mxu1 }
 0x54c   : > { %v7048_v41 = vadd.f32 %v10007_v44, %v13480_v37 }
 0x550   : > { %v10027_v4 = vpop.f32.mrb[224].mxu1 }
 0x551   : > { %v10028_v7 = vpop.f32.mrb[225].mxu1 }
 0x552   : > { %v10029_v52 = vadd.f32 %v10028_v7, %v10027_v4  ;;  %v10030_v54 = vpop.f32.mrb[226].mxu1 }
 0x553   : > { %v10031_v10 = vpop.f32.mrb[227].mxu1 }
 0x554   : > { %v7088_v14 = vadd.f32 %v10029_v52, %v7016_v20  ;;  %v10032_v53 = vadd.f32 %v10031_v10, %v10030_v54 }
 0x556   : > { %v7091_v11 = vadd.f32 %v10032_v53, %v7019_v43 }
 0x558   : > { %v10033_v59 = vpop.f32.mrb[228].mxu1 }
 0x559   : > { %v10034_v60 = vpop.f32.mrb[229].mxu1 }
 0x55a   : > { %v10035_v15 = vadd.f32 %v10034_v60, %v10033_v59  ;;  %v10036_v34 = vpop.f32.mrb[230].mxu1 }
 0x55b   : > { %v10037_v0 = vpop.f32.mrb[231].mxu1 }
 0x55c   : > { %v7096_v17 = vadd.f32 %v10035_v15, %v7024_v22  ;;  %v10038_v46 = vadd.f32 %v10037_v0, %v10036_v34 }
 0x55e   : > { %v7099_v1 = vadd.f32 %v10038_v46, %v7027_v50 }
 0x560   : > { %v10039_v18 = vpop.f32.mrb[232].mxu1 }
 0x561   : > { %v10040_v24 = vpop.f32.mrb[233].mxu1 }
 0x562   : > { %v10041_v26 = vadd.f32 %v10040_v24, %v10039_v18  ;;  %v10042_v37 = vpop.f32.mrb[234].mxu1 }
 0x563   : > { %v10043_v40 = vpop.f32.mrb[235].mxu1 }
 0x564   : > { %v7104_v27 = vadd.f32 %v10041_v26, %v7032_v29  ;;  %v10044_v28 = vadd.f32 %v10043_v40, %v10042_v37 }
 0x566   : > { %v7107_v21 = vadd.f32 %v10044_v28, %v7035_v31 }
 0x568   : > { %v10045_v35 = vpop.f32.mrb[236].mxu1 }
 0x569   : > { %v10046_v20 = vpop.f32.mrb[237].mxu1 }
 0x56a   : > { %v10047_v32 = vadd.f32 %v10046_v20, %v10045_v35  ;;  %v10048_v43 = vpop.f32.mrb[238].mxu1 }
 0x56b   : > { %v10049_v23 = vpop.f32.mrb[239].mxu1 }
 0x56c   : > { %v13539_v5 = vadd.f32 %v10047_v32, %v7040_v42  ;;  %v10050_v9 = vadd.f32 %v10049_v23, %v10048_v43 }
 0x56e   : > { %v13541_v39 = vadd.f32 %v10050_v9, %v7043_v58 }
 0x570   : > { %v10051_v2 = vpop.f32.mrb[240].mxu1 }
 0x571   : > { %v10052_v45 = vpop.f32.mrb[241].mxu1 }
 0x572   : > { %v10165_v33 = vpop.f32.mrb[16].mxu0  ;;  %v10053_v12 = vadd.f32 %v10052_v45, %v10051_v2  ;;  %v10054_v47 = vpop.f32.mrb[242].mxu1 }
 0x573   : > { %v10166_v22 = vpop.f32.mrb[17].mxu0  ;;  %v10055_v49 = vpop.f32.mrb[243].mxu1 }
 0x574   : > { %v13543_v48 = vadd.f32 %v10166_v22, %v10165_v33  ;;  %v10168_v50 = vpop.f32.mrb[18].mxu0  ;;  %v13545_v51 = vadd.f32 %v10053_v12, %v7048_v41 }
 0x575   : > { %v10169_v38 = vpop.f32.mrb[19].mxu0 }
 0x576   : > { %v13547_v61 = vadd.f32 %v10169_v38, %v10168_v50 }
 0x578   : > { %v10073_v57 = vpop.f32.mrb[244].mxu1 }
 0x579   : > { %v10074_v8 = vpop.f32.mrb[245].mxu1 }
 0x57a   : > { %v10171_v19 = vpop.f32.mrb[20].mxu0  ;;  %v10075_v29 = vadd.f32 %v10074_v8, %v10073_v57  ;;  %v10076_v6 = vpop.f32.mrb[246].mxu1 }
 0x57b   : > { %v10172_v31 = vpop.f32.mrb[21].mxu0  ;;  %v10077_v25 = vpop.f32.mrb[247].mxu1 }
 0x57c   : > { %v13549_v62 = vadd.f32 %v10172_v31, %v10171_v19  ;;  %v10174_v30 = vpop.f32.mrb[22].mxu0  ;;  %v7160_v55 = vadd.f32 %v10075_v29, %v7088_v14  ;;  %v10078_v63 = vadd.f32 %v10077_v25, %v10076_v6 }
 0x57d   : > { %v10175_v42 = vpop.f32.mrb[23].mxu0 }
 0x57e   : > { %v13551_v16 = vadd.f32 %v10175_v42, %v10174_v30  ;;  %v7163_v58 = vadd.f32 %v10078_v63, %v7091_v11 }
 0x580   : > { %v10079_v36 = vpop.f32.mrb[248].mxu1 }
 0x581   : > { %v10080_v56 = vpop.f32.mrb[249].mxu1 }
 0x582   : > { %v10177_v44 = vpop.f32.mrb[24].mxu0  ;;  %v10081_v3 = vadd.f32 %v10080_v56, %v10079_v36  ;;  %v10082_v13 = vpop.f32.mrb[250].mxu1 }
 0x583   : > { %v10178_v41 = vpop.f32.mrb[25].mxu0  ;;  %v10083_v7 = vpop.f32.mrb[251].mxu1 }
 0x584   : > { %v13553_v4 = vadd.f32 %v10178_v41, %v10177_v44  ;;  %v10180_v52 = vpop.f32.mrb[26].mxu0  ;;  %v7168_v54 = vadd.f32 %v10081_v3, %v7096_v17  ;;  %v10084_v10 = vadd.f32 %v10083_v7, %v10082_v13 }
 0x585   : > { %v10181_v53 = vpop.f32.mrb[27].mxu0 }
 0x586   : > { %v13555_v59 = vadd.f32 %v10181_v53, %v10180_v52  ;;  %v7171_v14 = vadd.f32 %v10084_v10, %v7099_v1 }
 0x588   : > { %v10085_v60 = vpop.f32.mrb[252].mxu1 }
 0x589   : > { %v10086_v15 = vpop.f32.mrb[253].mxu1 }
 0x58a   : > { %v10183_v34 = vpop.f32.mrb[28].mxu0  ;;  %v10087_v11 = vadd.f32 %v10086_v15, %v10085_v60  ;;  %v10088_v0 = vpop.f32.mrb[254].mxu1 }
 0x58b   : > { %v10184_v46 = vpop.f32.mrb[29].mxu0  ;;  %v10089_v24 = vpop.f32.mrb[255].mxu1 }
 0x58c   : > { %v13557_v18 = vadd.f32 %v10184_v46, %v10183_v34  ;;  %v10186_v26 = vpop.f32.mrb[30].mxu0  ;;  %v13559_v37 = vadd.f32 %v10087_v11, %v7104_v27  ;;  %v10090_v40 = vadd.f32 %v10089_v24, %v10088_v0  ;;  %v11421_v0 = vld [vmem:[%s13851_s6 + $0x108] sm:$0xff]   ;;  %v11422_v24 = vld [vmem:[%s13851_s6 + $0x150] sm:$0xff]  }
 0x58d   : > { %v10187_v28 = vpop.f32.mrb[31].mxu0 }
 0x58e   : > { %v13561_v17 = vadd.f32 %v10187_v28, %v10186_v26  ;;  %v7179_v35 = vadd.f32 %v10090_v40, %v7107_v21 }
 0x590   : > { %v10091_v20 = vpop.f32.mrb[0].mxu1 }
 0x591   : > { %v10092_v32 = vpop.f32.mrb[1].mxu1 }
 0x592   : > { %v10189_v1 = vpop.f32.mrb[32].mxu0  ;;  %v10093_v43 = vadd.f32 %v10092_v32, %v10091_v20  ;;  %v10094_v23 = vpop.f32.mrb[2].mxu1 }
 0x593   : > { %v10190_v9 = vpop.f32.mrb[33].mxu0  ;;  %v10095_v45 = vpop.f32.mrb[3].mxu1 }
 0x594   : > { %v13563_v2 = vadd.f32 %v10190_v9, %v10189_v1  ;;  %v10192_v33 = vpop.f32.mrb[34].mxu0  ;;  %v13566_v12 = vadd.f32 %v10093_v43, %v13539_v5  ;;  %v10096_v27 = vadd.f32 %v10095_v45, %v10094_v23  ;;  %v11424_v1 = vld [vmem:[%s13851_s6 + $0x110] sm:$0xff]   ;;  %v11425_v43 = vld [vmem:[%s13851_s6 + $0x180] sm:$0xff]  }
 0x595   : > { %v10193_v47 = vpop.f32.mrb[35].mxu0 }
 0x596   : > { %v13569_v22 = vadd.f32 %v10096_v27, %v13541_v39 }
 0x598   : > { %v10097_v49 = vpop.f32.mrb[4].mxu1 }
 0x599   : > { %v10098_v21 = vpop.f32.mrb[5].mxu1 }
 0x59a   : > { %v10099_v50 = vadd.f32 %v10098_v21, %v10097_v49  ;;  %v10100_v38 = vpop.f32.mrb[6].mxu1  ;;  %v11428_v49 = vld [vmem:[%s13851_s6 + $0x118] sm:$0xff]   ;;  %v11429_v21 = vld [vmem:[%s13851_s6 + $0x188] sm:$0xff]  }
 0x59b   : > { %v10101_v57 = vpop.f32.mrb[7].mxu1  ;;  %v11431_v38 = vld [vmem:[%s13851_s6 + $0x1d0] sm:$0xff]  }
 0x59c   : > { %v13572_v8 = vadd.f32 %v10099_v50, %v13545_v51  ;;  %v11430_v50 = vld [vmem:[%s13851_s6 + $0x160] sm:$0xff]  }
 0x5a0   : > { %v10119_v19 = vpop.f32.mrb[8].mxu1 }
 0x5a1   : > { %v10120_v29 = vpop.f32.mrb[9].mxu1 }
 0x5a2   : > { %v10121_v6 = vadd.f32 %v10120_v29, %v10119_v19  ;;  %v10122_v31 = vpop.f32.mrb[10].mxu1 }
 0x5a3   : > { %v10123_v25 = vpop.f32.mrb[11].mxu1 }
 0x5a4   : > { %v7232_v5 = vadd.f32 %v10121_v6, %v7160_v55  ;;  %v10124_v30 = vadd.f32 %v10123_v25, %v10122_v31  ;;  %v11432_v31 = vld [vmem:[%s13851_s6 + $0x120] sm:$0xff]   ;;  %v11433_v25 = vld [vmem:[%s13851_s6 + $0x190] sm:$0xff]  }
 0x5a6   : > { %v7304_v63 = vadd.f32 %v13543_v48, %v7232_v5  ;;  %v7235_v42 = vadd.f32 %v10124_v30, %v7163_v58  ;;  %v11417_v48 = vld [vmem:[%s13851_s6 + $0x100] sm:$0xff]  }
 0x5a8   : > { %v7307_v39 = vadd.f32 %v13547_v61, %v7235_v42  ;;  %v10125_v36 = vpop.f32.mrb[12].mxu1  ;;  %v7341_v44 = vmax.f32 %v7304_v63, 0.0  ;;  %v11419_v61 = vld [vmem:[%s13851_s6 + $0x148] sm:$0xff]  }
 0x5a9   : > { %v10126_v56 = vpop.f32.mrb[13].mxu1 }
 0x5aa   : > { %v7342_v3 = vmax.f32 %v7307_v39, 0.0  ;;  %v10127_v13 = vadd.f32 %v10126_v56, %v10125_v36  ;;  %v10128_v41 = vpop.f32.mrb[14].mxu1  ;;  %v11492_v60 = vpack.c.bf16 %v7341_v44, %v7341_v44  ;;  %v11436_v44 = vld [vmem:[%s13851_s6 + $0x128] sm:$0xff]  }
 0x5ab   : > { %v10129_v51 = vpop.f32.mrb[15].mxu1 }
 0x5ac   : > { %v7240_v7 = vadd.f32 %v10127_v13, %v7168_v54  ;;  %v10130_v52 = vadd.f32 %v10129_v51, %v10128_v41  ;;  %v11493_v55 = vpack.c.bf16 %v7342_v3, %v7342_v3  ;;  %v11437_v3 = vld [vmem:[%s13851_s6 + $0x198] sm:$0xff]   ;;  %v11439_v41 = vld [vmem:[%s13851_s6 + $0x1e0] sm:$0xff]  }
 0x5ae   : > { %v7312_v10 = vadd.f32 %v13549_v62, %v7240_v7  ;;  %v7243_v53 = vadd.f32 %v10130_v52, %v7171_v14  ;;  %8020 = vmatprep.mubr.bf16.mxu1 %v11493_v55 }
 0x5af   : > { %8021 = vmatmul.mubr.bf16.vlgmr.msra.gmra.mrb[28].mxu1 %v11492_v60  ;;  %v11442_v60 = vld [vmem:[%s13851_s6 + $0x178] sm:$0xff]  }
 0x5b0   : > { %v7315_v58 = vadd.f32 %v13551_v16, %v7243_v53  ;;  %v10131_v15 = vpop.f32.mrb[16].mxu1  ;;  %v7343_v54 = vmax.f32 %v7312_v10, 0.0  ;;  %10240 = vmatpush3.bf16.msra.mxu1 %v11417_v48  ;;  %v11440_v10 = vld [vmem:[%s13851_s6 + $0x130] sm:$0xff]   ;;  %v11441_v53 = vld [vmem:[%s13851_s6 + $0x1a0] sm:$0xff]   ;;  %v11444_v48 = vld [vmem:[%s13851_s6 + $0x138] sm:$0xff]  }
 0x5b1   : > { %v10132_v34 = vpop.f32.mrb[17].mxu1  ;;  %10241 = vmatprep.subr.bf16.mxu1 %v11419_v61  ;;  %v11445_v61 = vld [vmem:[%s13851_s6 + $0x1a8] sm:$0xff]  }
 0x5b2   : > { %v7344_v11 = vmax.f32 %v7315_v58, 0.0  ;;  %v10133_v62 = vadd.f32 %v10132_v34, %v10131_v15  ;;  %v10134_v14 = vpop.f32.mrb[18].mxu1  ;;  %v11494_v20 = vpack.c.bf16 %v7343_v54, %v7343_v54  ;;  %v11446_v58 = vld [vmem:[%s13851_s6 + $0x1f0] sm:$0xff]   ;;  %v11448_v34 = vld [vmem:[%s13851_s6 + $0x200] sm:$0xff]  }
 0x5b3   : > { %v10135_v46 = vpop.f32.mrb[19].mxu1  ;;  %v11447_v15 = vld [vmem:[%s13851_s6 + $0x1b0] sm:$0xff]  }
 0x5b4   : > { %v7248_v16 = vadd.f32 %v10133_v62, %v13559_v37  ;;  %v10136_v26 = vadd.f32 %v10135_v46, %v10134_v14  ;;  %10242 = vmatpush3.bf16.msra.mxu1 %v11421_v0  ;;  %v11495_v32 = vpack.c.bf16 %v7344_v11, %v7344_v11  ;;  %v11426_v37 = vld [vmem:[%s13851_s6 + $0x158] sm:$0xff]   ;;  %v11509_v11 = vmov 0.0   ;;  %v11451_v0 = vld [vmem:[%s13851_s6 + $0x208] sm:$0xff]   ;;  %v11452_v46 = vld [vmem:[%s13851_s6 + $0x210] sm:$0xff]  }
 0x5b5   : > { %10243 = vmatprep.subr.bf16.mxu1 %v11422_v24  ;;  %v11449_v62 = vld [vmem:[%s13851_s6 + $0x1f8] sm:$0xff]  }
 0x5b6   : > { %v13592_v40 = vadd.f32 %v13553_v4, %v7248_v16  ;;  %v7251_v28 = vadd.f32 %v10136_v26, %v7179_v35  ;;  %v11427_v4 = vld [vmem:[%s13851_s6 + $0x1c8] sm:$0xff]   ;;  %8060 = vmatprep.mubr.bf16.mxu0 %v11495_v32  ;;  %v11450_v14 = vld [vmem:[%s13851_s6 + $0x1b8] sm:$0xff]   ;;  %v11454_v26 = vld [vmem:[%s13851_s6 + $0x220] sm:$0xff]  }
 0x5b7   : > { %8061 = vmatmul.mubr.bf16.vlgmr.msra.gmra.mrb[36].mxu0 %v11494_v20  ;;  %v11453_v16 = vld [vmem:[%s13851_s6 + $0x218] sm:$0xff]  }
 0x5b8   : > { %v7323_v35 = vadd.f32 %v13555_v59, %v7251_v28  ;;  %v10137_v23 = vpop.f32.mrb[20].mxu1  ;;  %v7345_v45 = vmax.f32 %v13592_v40, 0.0  ;;  %10244 = vmatpush3.bf16.msra.mxu1 %v11424_v1  ;;  %10262 = vmatpush3.bf16.msra.mxu0 %v11425_v43  ;;  %v11455_v40 = vld [vmem:[%s13851_s6 + $0x228] sm:$0xff]   ;;  %v11456_v28 = vld [vmem:[%s13851_s6 + $0x230] sm:$0xff]   ;;  %v11457_v20 = vld [vmem:[%s13851_s6 + $0x238] sm:$0xff]  }
 0x5b9   : > { %v10138_v9 = vpop.f32.mrb[21].mxu1  ;;  %10245 = vmatprep.subr.bf16.mxu1 %v11426_v37  ;;  %10263 = vmatprep.subr.bf16.mxu0 %v11427_v4  ;;  %v11459_v1 = vld [vmem:[%s13853_s8] sm:$0xff]   ;;  %v11460_v43 = vld [vmem:[%s13853_s8 + $0x8] sm:$0xff]   ;;  %v11461_v37 = vld [vmem:[%s13853_s8 + $0x10] sm:$0xff]  }
 0x5ba   : > { %v7346_v33 = vmax.f32 %v7323_v35, 0.0  ;;  %v10139_v27 = vadd.f32 %v10138_v9, %v10137_v23  ;;  %v10140_v47 = vpop.f32.mrb[22].mxu1  ;;  %v11498_v54 = vpack.c.bf16 %v7345_v45, %v7345_v45  ;;  %v11462_v4 = vld [vmem:[%s13853_s8 + $0x18] sm:$0xff]   ;;  %v11463_v35 = vld [vmem:[%s13853_s8 + $0x20] sm:$0xff]   ;;  %v11464_v23 = vld [vmem:[%s13853_s8 + $0x28] sm:$0xff]  }
 0x5bb   : > { %v10141_v59 = vpop.f32.mrb[23].mxu1  ;;  %v11465_v9 = vld [vmem:[%s13853_s8 + $0x30] sm:$0xff]   ;;  %v11466_v45 = vld [vmem:[%s13853_s8 + $0x38] sm:$0xff]  }
 0x5bc   : > { %v7256_v57 = vadd.f32 %v10139_v27, %v13566_v12  ;;  %v10142_v19 = vadd.f32 %v10141_v59, %v10140_v47  ;;  %10246 = vmatpush3.bf16.msra.mxu1 %v11428_v49  ;;  %10264 = vmatpush3.bf16.msra.mxu0 %v11429_v21  ;;  %v11496_v5 = vpack.c.bf16 %v7346_v33, %v7346_v33  ;;  %v11435_v12 = vld [vmem:[%s13851_s6 + $0x1d8] sm:$0xff]   ;;  %v11467_v33 = vld [vmem:[%s13855_s10] sm:$0xff]   ;;  %v11468_v27 = vld [vmem:[%s13855_s10 + $0x8] sm:$0xff]  }
 0x5bd   : > { %10247 = vmatprep.subr.bf16.mxu1 %v11430_v50  ;;  %10265 = vmatprep.subr.bf16.mxu0 %v11431_v38  ;;  %v11469_v47 = vld [vmem:[%s13855_s10 + $0x10] sm:$0xff]   ;;  %v11470_v49 = vld [vmem:[%s13855_s10 + $0x18] sm:$0xff]  }
 0x5be   : > { %v13622_v29 = vadd.f32 %v13557_v18, %v7256_v57  ;;  %v7259_v6 = vadd.f32 %v10142_v19, %v13569_v22  ;;  %v11434_v18 = vld [vmem:[%s13851_s6 + $0x168] sm:$0xff]   ;;  %8100 = vmatprep.mubr.bf16.mxu1 %v11496_v5  ;;  %v9547_v19 = vld [vmem:[%s13852_s7] ss:$0 sm:$0xff] }
 0x5c0   : > { %v7331_v22 = vadd.f32 %v13561_v17, %v7259_v6  ;;  %v10143_v30 = vpop.f32.mrb[24].mxu1  ;;  %v7347_v42 = vmax.f32 %v13622_v29, 0.0  ;;  %10248 = vmatpush3.bf16.msra.mxu1 %v11432_v31  ;;  %10266 = vmatpush3.bf16.msra.mxu0 %v11433_v25  ;;  %v11438_v17 = vld [vmem:[%s13851_s6 + $0x170] sm:$0xff]  }
 0x5c1   : > { %v10144_v63 = vpop.f32.mrb[25].mxu1  ;;  %10249 = vmatprep.subr.bf16.mxu1 %v11434_v18  ;;  %10267 = vmatprep.subr.bf16.mxu0 %v11435_v12 }
 0x5c2   : > { %v7348_v39 = vmax.f32 %v7331_v22, 0.0  ;;  %v10145_v36 = vadd.f32 %v10144_v63, %v10143_v30  ;;  %v10146_v56 = vpop.f32.mrb[26].mxu1  ;;  %v11499_v24 = vpack.c.bf16 %v7347_v42, %v7347_v42 }
 0x5c3   : > { %v10147_v13 = vpop.f32.mrb[27].mxu1 }
 0x5c4   : > { %v7264_v51 = vadd.f32 %v10145_v36, %v13572_v8  ;;  %10250 = vmatpush3.bf16.msra.mxu1 %v11436_v44  ;;  %10268 = vmatpush3.bf16.msra.mxu0 %v11437_v3  ;;  %v11497_v52 = vpack.c.bf16 %v7348_v39, %v7348_v39 }
 0x5c5   : > { %10251 = vmatprep.subr.bf16.mxu1 %v11438_v17  ;;  %10269 = vmatprep.subr.bf16.mxu0 %v11439_v41 }
 0x5c6   : > { %v7336_v7 = vadd.f32 %v13563_v2, %v7264_v51  ;;  %v11443_v2 = vld [vmem:[%s13851_s6 + $0x1e8] sm:$0xff]   ;;  %8140 = vmatprep.mubr.bf16.mxu0 %v11497_v52 }
 0x5c8   : > { %v7349_v8 = vmax.f32 %v7336_v7, 0.0  ;;  %10252 = vmatpush3.bf16.msra.mxu1 %v11440_v10  ;;  %10270 = vmatpush3.bf16.msra.mxu0 %v11441_v53 }
 0x5c9   : > { %10253 = vmatprep.subr.bf16.mxu1 %v11442_v60  ;;  %10271 = vmatprep.subr.bf16.mxu0 %v11443_v2 }
 0x5ca   : > { %v7366_v55 = vpack.c.bf16 %v7349_v8, %v7349_v8  ;;  %v11471_v8 = vld [vmem:[%s13855_s10 + $0x20] sm:$0xff]  }
 0x5cc   : > { %7367 = vst [vmem:[#allocation3 + $0x20] sm:$0xf] %v7366_v55  ;;  %10254 = vmatpush3.bf16.msra.mxu1 %v11444_v48  ;;  %10272 = vmatpush3.bf16.msra.mxu0 %v11445_v61  ;;  %v11472_v55 = vld [vmem:[%s13855_s10 + $0x28] sm:$0xff]   ;;  %v11473_v48 = vld [vmem:[%s13855_s10 + $0x30] sm:$0xff]   ;;  %v11474_v61 = vld [vmem:[%s13855_s10 + $0x38] sm:$0xff]  }
 0x5cd   : > { %10273 = vmatprep.subr.bf16.mxu0 %v11446_v58  ;;  %10319 = vmatprep.subr.bf16.mxu1 %v11509_v11  ;;  %v11475_v58 = vld [vmem:[%s13857_s12] sm:$0xff]  }
 0x5cf   : > { %8101 = vmatmul.mubr.bf16.vlgmr.msra.gmra.mrb[32].mxu1 %v11498_v54  ;;  %v11478_v54 = vld [vmem:[%s13857_s12 + $0x18] sm:$0xff]  }
 0x5d0   : > { %10274 = vmatpush3.bf16.msra.mxu0 %v11447_v15  ;;  %10320 = vmatpush3.bf16.msra.mxu1 %v11448_v34  ;;  %v11476_v15 = vld [vmem:[%s13857_s12 + $0x8] sm:$0xff]   ;;  %v11477_v34 = vld [vmem:[%s13857_s12 + $0x10] sm:$0xff]  }
 0x5d1   : > { %10275 = vmatprep.subr.bf16.mxu0 %v11449_v62  ;;  %10321 = vmatprep.subr.bf16.mxu1 %v11509_v11  ;;  %v9629_v62 = vld [vmem:[%s13854_s9] ss:$0 sm:$0xff] }
 0x5d2   : > { %10335 = vmatprep.mubr.msk.bf16.mxu1 %vm11510_vm0, %v11509_v11 }
 0x5d3   : > { %v11458_v32 = vld [vmem:[#allocation3 + $0x20] ss:$0 sps:$4 sm:$0xff]  }
 0x5d4   : > { %10276 = vmatpush3.bf16.msra.mxu0 %v11450_v14  ;;  %10322 = vmatpush3.bf16.msra.mxu1 %v11451_v0 }
 0x5d5   : > { %10323 = vmatprep.subr.bf16.mxu1 %v11509_v11  ;;  %10339 = vmatprep.subr.bf16.mxu0 %v11509_v11 }
 0x5d7   : > { %8141 = vmatmul.mubr.bf16.vlgmr.msra.gmra.mrb[40].mxu0 %v11499_v24 }
 0x5d8   : > { %10324 = vmatpush3.bf16.msra.mxu1 %v11452_v46  ;;  %10355 = vmatprep.mubr.msk.bf16.mxu0 %vm11510_vm0, %v11509_v11 }
 0x5d9   : > { %10325 = vmatprep.subr.bf16.mxu1 %v11509_v11  ;;  %10340 = vmatpush3.bf16.msra.mxu0 %v11459_v1  ;;  %v11482_v1 = vld [vmem:[%s13857_s12 + $0x38] sm:$0xff]  }
 0x5da   : > { %10341 = vmatprep.subr.bf16.mxu0 %v11509_v11 }
 0x5dc   : > { %10326 = vmatpush3.bf16.msra.mxu1 %v11453_v16 }
 0x5dd   : > { %10327 = vmatprep.subr.bf16.mxu1 %v11509_v11  ;;  %10342 = vmatpush3.bf16.msra.mxu0 %v11460_v43  ;;  %v9638_v43 = vld [vmem:[%s13856_s11] ss:$0 sm:$0xff] }
 0x5de   : > { %10343 = vmatprep.subr.bf16.mxu0 %v11509_v11 }
 0x5e0   : > { %10328 = vmatpush3.bf16.msra.mxu1 %v11454_v26 }
 0x5e1   : > { %10329 = vmatprep.subr.bf16.mxu1 %v11509_v11  ;;  %10344 = vmatpush3.bf16.msra.mxu0 %v11461_v37 }
 0x5e2   : > { %10345 = vmatprep.subr.bf16.mxu0 %v11509_v11 }
 0x5e4   : > { %10330 = vmatpush3.bf16.msra.mxu1 %v11455_v40 }
 0x5e5   : > { %10331 = vmatprep.subr.bf16.mxu1 %v11509_v11  ;;  %10346 = vmatpush3.bf16.msra.mxu0 %v11462_v4 }
 0x5e6   : > { %10347 = vmatprep.subr.bf16.mxu0 %v11509_v11 }
 0x5e8   : > { %10332 = vmatpush3.bf16.msra.mxu1 %v11456_v28  ;;  %v11479_v28 = vld [vmem:[%s13857_s12 + $0x20] sm:$0xff]  }
 0x5e9   : > { %10333 = vmatprep.subr.bf16.mxu1 %v11509_v11  ;;  %10348 = vmatpush3.bf16.msra.mxu0 %v11463_v35 }
 0x5ea   : > { %10349 = vmatprep.subr.bf16.mxu0 %v11509_v11 }
 0x5ec   : > { %10334 = vmatpush3.bf16.msra.mxu1 %v11457_v20  ;;  %v11480_v20 = vld [vmem:[%s13857_s12 + $0x28] sm:$0xff]  }
 0x5ed   : > { %10359 = vmatprep.subr.bf16.mxu1 %v11509_v11  ;;  %10350 = vmatpush3.bf16.msra.mxu0 %v11464_v23 }
 0x5ee   : > { %10351 = vmatprep.subr.bf16.mxu0 %v11509_v11 }
 0x5ef   : > { %10336 = vmatmul.mubr.bf16.vlgmr.msra.gmra.mrb[36].mxu1 %v11458_v32  ;;  %v11481_v32 = vld [vmem:[%s13857_s12 + $0x30] sm:$0xff]  }
 0x5f0   : > { %10375 = vmatprep.mubr.msk.bf16.mxu1 %vm11510_vm0, %v11509_v11  ;;  %10360 = vmatpush3.bf16.msra.mxu1 %v11467_v33 }
 0x5f1   : > { %10352 = vmatpush3.bf16.msra.mxu0 %v11465_v9  ;;  %10361 = vmatprep.subr.bf16.mxu1 %v11509_v11 }
 0x5f2   : > { %10353 = vmatprep.subr.bf16.mxu0 %v11509_v11 }
 0x5f4   : > { %10362 = vmatpush3.bf16.msra.mxu1 %v11468_v27 }
 0x5f5   : > { %10354 = vmatpush3.bf16.msra.mxu0 %v11466_v45  ;;  %10363 = vmatprep.subr.bf16.mxu1 %v11509_v11 }
 0x5f6   : > { %10379 = vmatprep.subr.bf16.mxu0 %v11509_v11 }
 0x5f8   : > { %10364 = vmatpush3.bf16.msra.mxu1 %v11469_v47  ;;  %v9656_v47 = vld [vmem:[%s13859_s14] ss:$0 sm:$0xff] }
 0x5f9   : > { %10365 = vmatprep.subr.bf16.mxu1 %v11509_v11 }
 0x5fc   : > { %10366 = vmatpush3.bf16.msra.mxu1 %v11470_v49 }
 0x5fd   : > { %10367 = vmatprep.subr.bf16.mxu1 %v11509_v11 }
 0x600   : > { %10368 = vmatpush3.bf16.msra.mxu1 %v11471_v8 }
 0x601   : > { %10369 = vmatprep.subr.bf16.mxu1 %v11509_v11 }
 0x604   : > { %10370 = vmatpush3.bf16.msra.mxu1 %v11472_v55 }
 0x605   : > { %10371 = vmatprep.subr.bf16.mxu1 %v11509_v11 }
 0x608   : > { %10372 = vmatpush3.bf16.msra.mxu1 %v11473_v48 }
 0x609   : > { %10373 = vmatprep.subr.bf16.mxu1 %v11509_v11 }
 0x60c   : > { %10374 = vmatpush3.bf16.msra.mxu1 %v11474_v61 }
 0x682   : > { %v10211_v21 = vpop.f32.mrb[28].mxu1 }
 0x683   : > { %v10212_v59 = vpop.f32.mrb[29].mxu1 }
 0x684   : > { %v10213_v50 = vadd.f32 %v10212_v59, %v10211_v21  ;;  %v10214_v38 = vpop.f32.mrb[30].mxu1 }
 0x685   : > { %v10215_v57 = vpop.f32.mrb[31].mxu1 }
 0x686   : > { %v8023_v31 = vadd.f32 %v10213_v50, %v9547_v19 }
 0x68a   : > { %v10233_v29 = vpop.f32.mrb[36].mxu0 }
 0x68b   : > { %v10234_v6 = vpop.f32.mrb[37].mxu0 }
 0x68c   : > { %v10235_v25 = vadd.f32 %v10234_v6, %v10233_v29  ;;  %v10236_v5 = vpop.f32.mrb[38].mxu0 }
 0x68d   : > { %v10237_v18 = vpop.f32.mrb[39].mxu0 }
 0x68e   : > { %v8063_v12 = vadd.f32 %v10235_v25, %v8023_v31 }
 0x6a2   : > { %v10255_v22 = vpop.f32.mrb[32].mxu1 }
 0x6a3   : > { %v10256_v30 = vpop.f32.mrb[33].mxu1 }
 0x6a4   : > { %v10257_v63 = vadd.f32 %v10256_v30, %v10255_v22  ;;  %v10258_v42 = vpop.f32.mrb[34].mxu1 }
 0x6a5   : > { %v10259_v39 = vpop.f32.mrb[35].mxu1 }
 0x6a6   : > { %v8103_v36 = vadd.f32 %v10257_v63, %v8063_v12 }
 0x6aa   : > { %v10277_v56 = vpop.f32.mrb[40].mxu0 }
 0x6ab   : > { %v10278_v44 = vpop.f32.mrb[41].mxu0 }
 0x6ac   : > { %v10279_v3 = vadd.f32 %v10278_v44, %v10277_v56  ;;  %v10280_v13 = vpop.f32.mrb[42].mxu0 }
 0x6ad   : > { %v10281_v17 = vpop.f32.mrb[43].mxu0 }
 0x6ae   : > { %v8143_v41 = vadd.f32 %v10279_v3, %v8103_v36 }
 0x6c2   : > { %v8182_v51 = vpop.f32.mrb[36].mxu1 }
 0x6c3   : > { %v8183_v7 = vadd.f32 %v8182_v51, %v8143_v41  ;;  %v10337_v52 = vpop.f32.mrb[37].mxu1 }
 0x6c4   : > { %v8185_v10 = vpop.f32.mrb[38].mxu1 }
 0x6c5   : > { %v8188_v53 = vmax.f32 %v8183_v7, 0.0  ;;  %v10338_v60 = vpop.f32.mrb[39].mxu1 }
 0x6c7   : > { %v8189_v2 = vpack.c.bf16 %v8188_v53, %v8188_v53 }
 0x6c9   : > { %10356 = vmatmul.mubr.bf16.vlgmr.msra.gmra.mrb[44].mxu0 %v8189_v2 }
 0x6ca   : > { %10395 = vmatprep.mubr.msk.bf16.mxu0 %vm11510_vm0, %v11509_v11  ;;  %10380 = vmatpush3.bf16.msra.mxu0 %v11475_v58 }
 0x6cb   : > { %10381 = vmatprep.subr.bf16.mxu0 %v11509_v11 }
 0x6ce   : > { %10382 = vmatpush3.bf16.msra.mxu0 %v11476_v15 }
 0x6cf   : > { %10383 = vmatprep.subr.bf16.mxu0 %v11509_v11 }
 0x6d2   : > { %10384 = vmatpush3.bf16.msra.mxu0 %v11477_v34 }
 0x6d3   : > { %10385 = vmatprep.subr.bf16.mxu0 %v11509_v11 }
 0x6d6   : > { %10386 = vmatpush3.bf16.msra.mxu0 %v11478_v54 }
 0x6d7   : > { %10387 = vmatprep.subr.bf16.mxu0 %v11509_v11 }
 0x6da   : > { %10388 = vmatpush3.bf16.msra.mxu0 %v11479_v28 }
 0x6db   : > { %10389 = vmatprep.subr.bf16.mxu0 %v11509_v11 }
 0x6de   : > { %10390 = vmatpush3.bf16.msra.mxu0 %v11480_v20 }
 0x6df   : > { %10391 = vmatprep.subr.bf16.mxu0 %v11509_v11 }
 0x6e2   : > { %10392 = vmatpush3.bf16.msra.mxu0 %v11481_v32 }
 0x6e3   : > { %10393 = vmatprep.subr.bf16.mxu0 %v11509_v11  ;;  %v9647_v11 = vld [vmem:[%s13858_s13] ss:$0 sm:$0xff] }
 0x6e6   : > { %10394 = vmatpush3.bf16.msra.mxu0 %v11482_v1 }
 0x79c   : > { %v8295_v14 = vpop.f32.mrb[44].mxu0 }
 0x79d   : > { %v8296_v0 = vadd.f32 %v9629_v62, %v8295_v14  ;;  %v10357_v46 = vpop.f32.mrb[45].mxu0 }
 0x79e   : > { %v8298_v24 = vpop.f32.mrb[46].mxu0 }
 0x79f   : > { %11483 = vtanh.f32 %v8296_v0  ;;  %v10358_v16 = vpop.f32.mrb[47].mxu0 }
 0x7a9   : > { %v11484_v26 = vpop.eup %11483 }
 0x7aa   : > { %v8302_v40 = vpack.c.bf16 %v11484_v26, %v11484_v26 }
 0x7ac   : > { %10376 = vmatmul.mubr.bf16.vlgmr.msra.gmra.mrb[40].mxu1 %v8302_v40 }
 0x87f   : > { %v8408_v37 = vpop.f32.mrb[40].mxu1 }
 0x880   : > { %v8409_v4 = vadd.f32 %v9638_v43, %v8408_v37  ;;  %v10377_v35 = vpop.f32.mrb[41].mxu1 }
 0x881   : > { %v8411_v23 = vpop.f32.mrb[42].mxu1 }
 0x882   : > { %11485 = vtanh.f32 %v8409_v4  ;;  %v10378_v9 = vpop.f32.mrb[43].mxu1 }
 0x88c   : > { %v11486_v45 = vpop.eup %11485 }
 0x88d   : > { %v8415_v33 = vpack.c.bf16 %v11486_v45, %v11486_v45 }
 0x88f   : > { %10396 = vmatmul.mubr.bf16.vlgmr.msra.gmra.mrb[48].mxu0 %v8415_v33 }
 0x962   : > { %v8521_v27 = vpop.f32.mrb[48].mxu0 }
 0x963   : > { %v8522_v49 = vadd.f32 %v9647_v11, %v8521_v27  ;;  %v10397_v21 = vpop.f32.mrb[49].mxu0 }
 0x964   : > { %v8524_v59 = vpop.f32.mrb[50].mxu0 }
 0x965   : > { %v8534_v50 = vadd.f32 %v9656_v47, %v8522_v49  ;;  %v10398_v38 = vpop.f32.mrb[51].mxu0 }
 0x967   : > { %8535 = vmax.xlane.f32.xlu0 %v8534_v50 }
 0x9f4   : > { %v8536_v57 = vpop.xlane.xlu0 %8535 }
 0x9f5   : > { %v8537_v19 = vsub.f32 %v8534_v50, %v8536_v57 }
 0x9f7   : > { %v8538_v29 = vmul.f32 1.442695, %v8537_v19 }
 0x9f9   : > { %11487 = vpow2.f32 %v8538_v29 }
 0xa03   : > { %v11488_v6 = vpop.eup %11487 }
 0xa04   : > { %8540 = vadd.xlane.f32.xlu0 %v11488_v6 }
 0xa91   : > { %v8541_v31 = vpop.xlane.xlu0 %8540 }
 0xa92   : > { %11489 = vlog2.f32 %v8541_v31 }
 0xa9c   : > { %v11490_v25 = vpop.eup %11489 }
 0xa9d   : > { %v8543_v5 = vmul.f32 0.6931472, %v11490_v25 }
 0xa9f   : > { %v8544_v18 = vadd.f32 %v8543_v5, %v8536_v57 }
 0xaa1   : > { %v8545_v12 = vsub.f32 %v8534_v50, %v8544_v18 }
 0xaa3   : > { %8546 = vst [vmem:[%s497_s24] sm:$0xff] %v8545_v12 }
 0xaa4 PF: > { %s25_s18 = sadd.s32 1, %s11506_s18  }
 0xaa5   : > { %p22_p5 = scmp.ge.s32.totalorder %s25_s18, 4  }
 0xaa7   :  { %24 = sbr.rel (!%p22_p5) target bundleno = 1 (0x1), region = 113 }

</bundles_post_ra>
